<compile_context>
chip_gen: v5e
topology: v5e:2x2
jax: 0.10.0
libtpu: 0.0.40
codegen_flags: <defaults>
</compile_context>

<pallas_src>
import functools
import math

import jax
import jax.numpy as jnp
from jax.experimental import pallas as pl
from jax.experimental.pallas import tpu as pltpu


# ----------------------------------------------------------------------------
# helpers
# ----------------------------------------------------------------------------
def _round_up(x, m):
    return ((x + m - 1) // m) * m


def _pick_batch_tile(b_pad):
    """Batch tile: multiple of 8, >=2 tiles when possible (v7x megacore)."""
    if b_pad <= 8:
        return b_pad
    for t in (64, 32, 16, 8):
        if b_pad % t == 0 and b_pad // t >= 2:
            return t
    return b_pad


def _pick_row_tile(rows):
    """Row tile for the CRF grid (rows is always a multiple of 8)."""
    for t in (512, 256, 128, 64, 32, 16, 8):
        if rows % t == 0:
            return t
    return rows


def _clamp_vmem(nbytes):
    # 64 MiB is <= physical VMEM on every generation (v7x has 64 MiB).
    return int(min(max(nbytes, 32 << 20), 64 << 20))


def _approx_sigmoid(x):
    # 1 / (1 + exp(-x)) with the divide on the EUP vrcp path.
    return pl.reciprocal(1.0 + jnp.exp(-x), approx=True)


# ----------------------------------------------------------------------------
# Fused bidirectional LSTM layer.
#
# Weight layout (built in init_params):
#   wih   : (I, 8H)  columns = [fwd(i,f,g,o) | bwd(i,f,g,o)], each block H wide
#   whh_f : (H, 4H)  forward recurrent weight  (columns i,f,g,o)
#   whh_b : (H, 4H)  backward recurrent weight
#   b     : (1, 8H)  combined b_ih + b_hh, same column layout as wih
# ----------------------------------------------------------------------------
def _bilstm_kernel(x_ref, wih_ref, whhf_ref, whhb_ref, b_ref,
                   y_ref, hn_ref, cn_ref, gxf_scr, gxb_scr):
    S, Bt, I = x_ref.shape
    H4 = whhf_ref.shape[1]
    H = H4 // 4
    H2 = 2 * H

    # (1) Hoisted input projection: one (S*Bt, I) x (I, 8H) MXU matmul for all
    #     timesteps and both directions; bias folded in here, not per step.
    xf = x_ref[...].reshape(S * Bt, I).astype(jnp.bfloat16)
    gx = jnp.dot(xf, wih_ref[...],
                 preferred_element_type=jnp.float32) + b_ref[...]      # (S*Bt, 8H) f32
    gxf_scr[...] = gx[:, 0:H4].astype(jnp.bfloat16)                    # fwd gate slab
    gxb_scr[...] = gx[:, H4:2 * H4].astype(jnp.bfloat16)               # bwd gate slab

    whh_f = whhf_ref[...]                                              # (H, 4H) bf16
    whh_b = whhb_ref[...]

    def lstm_cell(g, c):
        i_g = _approx_sigmoid(g[:, 0 * H:1 * H])
        f_g = _approx_sigmoid(g[:, 1 * H:2 * H])
        g_g = jnp.tanh(g[:, 2 * H:3 * H])
        o_g = _approx_sigmoid(g[:, 3 * H:4 * H])
        c_new = f_g * c + i_g * g_g
        h_new = o_g * jnp.tanh(c_new)
        return h_new, c_new

    def step(t, carry):
        hf, cf, hb, cb = carry                                         # (Bt, H) f32 each
        rev = S - 1 - t
        rf = pl.multiple_of(t * Bt, Bt)
        rb = pl.multiple_of(rev * Bt, Bt)
        gf = (gxf_scr[pl.ds(rf, Bt), :].astype(jnp.float32)
              + jnp.dot(hf.astype(jnp.bfloat16), whh_f,
                        preferred_element_type=jnp.float32))           # (Bt, 4H)
        gb = (gxb_scr[pl.ds(rb, Bt), :].astype(jnp.float32)
              + jnp.dot(hb.astype(jnp.bfloat16), whh_b,
                        preferred_element_type=jnp.float32))
        hf_new, cf_new = lstm_cell(gf, cf)
        hb_new, cb_new = lstm_cell(gb, cb)
        y_ref[t, :, 0:H] = hf_new.astype(y_ref.dtype)                  # fwd output @ t
        y_ref[rev, :, H:H2] = hb_new.astype(y_ref.dtype)               # bwd output @ S-1-t
        return hf_new, cf_new, hb_new, cb_new

    zeros = jnp.zeros((Bt, H), jnp.float32)
    hf, cf, hb, cb = jax.lax.fori_loop(0, S, step, (zeros, zeros, zeros, zeros),
                                       unroll=min(8, S))
    hn_ref[:, 0:H] = hf
    hn_ref[:, H:H2] = hb
    cn_ref[:, 0:H] = cf
    cn_ref[:, H:H2] = cb


def bilstm_layer(x, wih, whh_f, whh_b, b):
    """x: (S, B_pad, I) f32/bf16. Returns y (bf16), h_n, c_n (f32, [fwd|bwd])."""
    S, Bp, I = x.shape
    H4 = whh_f.shape[1]
    H = H4 // 4
    H2 = 2 * H
    b_tile = _pick_batch_tile(Bp)
    grid = (Bp // b_tile,)

    # per-grid-step VMEM footprint (blocks double-buffered) + headroom
    blocks = (S * b_tile * I * x.dtype.itemsize      # x tile
              + S * b_tile * H2 * 2                  # y tile (bf16)
              + 2 * b_tile * H2 * 4)                 # hn, cn tiles
    weights = I * 8 * H * 2 + 2 * H * H4 * 2 + 8 * H * 4
    scratch = 2 * S * b_tile * H4 * 2
    vmem_bytes = _clamp_vmem(2 * (blocks + weights) + scratch + (4 << 20))

    y, hn, cn = pl.pallas_call(
        _bilstm_kernel,
        out_shape=(jax.ShapeDtypeStruct((S, Bp, H2), jnp.bfloat16),    # lstm_out
                   jax.ShapeDtypeStruct((Bp, H2), jnp.float32),        # [h_n fwd | bwd]
                   jax.ShapeDtypeStruct((Bp, H2), jnp.float32)),       # [c_n fwd | bwd]
        grid=grid,
        in_specs=[pl.BlockSpec((S, b_tile, I), lambda bi: (0, bi, 0)),
                  pl.BlockSpec(wih.shape, lambda bi: (0, 0)),
                  pl.BlockSpec(whh_f.shape, lambda bi: (0, 0)),
                  pl.BlockSpec(whh_b.shape, lambda bi: (0, 0)),
                  pl.BlockSpec(b.shape, lambda bi: (0, 0))],
        out_specs=(pl.BlockSpec((S, b_tile, H2), lambda bi: (0, bi, 0)),
                   pl.BlockSpec((b_tile, H2), lambda bi: (bi, 0)),
                   pl.BlockSpec((b_tile, H2), lambda bi: (bi, 0))),
        scratch_shapes=[pltpu.VMEM((S * b_tile, H4), jnp.bfloat16),    # fwd gate slab
                        pltpu.VMEM((S * b_tile, H4), jnp.bfloat16)],   # bwd gate slab
        compiler_params=pltpu.CompilerParams(
            dimension_semantics=("parallel",),
            vmem_limit_bytes=vmem_bytes),
    )(x, wih, whh_f, whh_b, b)
    return y, hn, cn


# ----------------------------------------------------------------------------
# CRF head (CRF_S semantics): crf_out[t,b,i,j] = (W x[t,b] + b)[j] + trans[i,j]
# One lane-dense matmul per row tile:
#   slab[n, i*T+j] = feats[n] @ w_tiled[:, i*T+j] + (b[j] + trans[i,j])
# w_tiled = tile(W^T, T) and bias+transitions pre-folded, both zero-padded on the
# lane axis to a multiple of 128 so the output stores are unmasked.
# ----------------------------------------------------------------------------
def _crf_kernel(feat_ref, w_ref, add_ref, out_ref):
    f = feat_ref[...].astype(jnp.bfloat16)
    out_ref[...] = (jnp.dot(f, w_ref[...], preferred_element_type=jnp.float32)
                    + add_ref[...])


def crf_forward(lstm_out, w_tiled, add_flat, tagset):
    S, Bp, D = lstm_out.shape
    TTp = w_tiled.shape[1]
    rows = S * Bp
    row_tile = _pick_row_tile(rows)
    grid = (rows // row_tile,)

    blocks = row_tile * D * lstm_out.dtype.itemsize + row_tile * TTp * 4
    weights = D * TTp * 2 + TTp * 4
    vmem_bytes = _clamp_vmem(2 * (blocks + weights) + (2 << 20))

    slab = pl.pallas_call(
        _crf_kernel,
        out_shape=jax.ShapeDtypeStruct((rows, TTp), jnp.float32),
        grid=grid,
        in_specs=[pl.BlockSpec((row_tile, D), lambda r: (r, 0)),
                  pl.BlockSpec(w_tiled.shape, lambda r: (0, 0)),
                  pl.BlockSpec(add_flat.shape, lambda r: (0, 0))],
        out_specs=pl.BlockSpec((row_tile, TTp), lambda r: (r, 0)),
        compiler_params=pltpu.CompilerParams(
            dimension_semantics=("parallel",),
            vmem_limit_bytes=vmem_bytes),
    )(lstm_out.reshape(rows, D), w_tiled, add_flat)
    return slab[:, :tagset * tagset].reshape(S, Bp, tagset, tagset)


# ----------------------------------------------------------------------------
# Full model forward (mirrors LSTM_CRF.forward)
# ----------------------------------------------------------------------------
@functools.partial(jax.jit, static_argnames=("tagset",))
def lstm_crf_forward(feats, params, *, tagset):
    S, B = feats.shape
    embeds = jnp.take(params["embedding"], feats, axis=0)              # (S, B, E)
    x = embeds                                                         # dropout1 = identity

    # pad batch to a sublane multiple so per-step loads/stores are unmasked
    B_pad = _round_up(B, 8)
    if B_pad != B:
        x = jnp.pad(x, ((0, 0), (0, B_pad - B), (0, 0)))

    h_list, c_list = [], []
    for lp in params["lstm"]:
        H = lp["whh_f"].shape[0]
        y, hn, cn = bilstm_layer(x, lp["wih"], lp["whh_f"], lp["whh_b"], lp["b"])
        h_list += [hn[:B, :H], hn[:B, H:]]                             # layer-major: fwd, bwd
        c_list += [cn[:B, :H], cn[:B, H:]]
        x = y                                                          # next layer input (bf16)

    lstm_out = x                                                       # dropout2 = identity
    crf_out = crf_forward(lstm_out, params["crf_w_tiled"], params["crf_add"], tagset)
    crf_out = crf_out[:, :B]
    hidden = (jnp.stack(h_list, axis=0), jnp.stack(c_list, axis=0))
    return crf_out, hidden


# ----------------------------------------------------------------------------
# Parameter init (shapes / init per LSTM_CRF.__init__, init_lstm, CRF_S) plus
# the fused / pre-tiled layouts the kernels consume.
# ----------------------------------------------------------------------------
def init_params(key, vocab, emb_dim, hidden_dim, rnn_layers, tagset):
    H = hidden_dim // 2
    keys = iter(jax.random.split(key, 4 * rnn_layers + 3))

    emb = jax.random.normal(next(keys), (vocab, emb_dim), jnp.float32) * 0.1

    layers = []
    for layer in range(rnn_layers):
        in_dim = emb_dim if layer == 0 else hidden_dim
        per_dir = []
        for _d in range(2):
            # init_lstm: bound = sqrt(6 / (size(0)/4 + size(1)))
            bound_ih = math.sqrt(6.0 / (H + in_dim))
            w_ih = jax.random.uniform(next(keys), (4 * H, in_dim), jnp.float32,
                                      -bound_ih, bound_ih)
            bound_hh = math.sqrt(6.0 / (H + H))
            w_hh = jax.random.uniform(next(keys), (4 * H, H), jnp.float32,
                                      -bound_hh, bound_hh)
            # b_ih + b_hh combined: zeros, forget-gate slice = 1 + 1 = 2
            bias = jnp.zeros((4 * H,), jnp.float32).at[H:2 * H].set(2.0)
            per_dir.append((w_ih, w_hh, bias))
        (wf_ih, wf_hh, bf), (wb_ih, wb_hh, bb) = per_dir
        wih = jnp.concatenate([wf_ih.T, wb_ih.T], axis=1)              # (I, 8H) [fwd|bwd]
        b = jnp.concatenate([bf, bb])[None, :]                         # (1, 8H)
        layers.append({"wih": wih.astype(jnp.bfloat16),
                       "whh_f": wf_hh.T.astype(jnp.bfloat16),          # (H, 4H)
                       "whh_b": wb_hh.T.astype(jnp.bfloat16),          # (H, 4H)
                       "b": b})

    bound_crf = math.sqrt(6.0 / (hidden_dim + tagset))
    crf_w = jax.random.uniform(next(keys), (tagset, hidden_dim), jnp.float32,
                               -bound_crf, bound_crf)
    crf_b = jnp.zeros((tagset,), jnp.float32)
    trans = jax.random.uniform(next(keys), (tagset, tagset), jnp.float32, -0.1, 0.1)

    # Pre-tile emission weight along the output-lane axis, pre-fold bias+transitions,
    # and zero-pad the lane axis to a multiple of 128 for unmasked stores.
    tt = tagset * tagset
    tt_pad = _round_up(tt, 128)
    w_tiled = jnp.tile(crf_w.T, (1, tagset))                           # (D, T*T)
    w_tiled = jnp.pad(w_tiled, ((0, 0), (0, tt_pad - tt))).astype(jnp.bfloat16)
    add_flat = (trans + crf_b[None, :]).reshape(1, tt)                 # b[j] + trans[i,j]
    add_flat = jnp.pad(add_flat, ((0, 0), (0, tt_pad - tt)))

    return {"embedding": emb, "lstm": layers,
            "crf_w_tiled": w_tiled, "crf_add": add_flat}


if __name__ == "__main__":
    SEQ, BATCH = 8, 4
    VOCAB, EMB_DIM, HIDDEN_DIM, RNN_LAYERS, TAGSET = 20, 16, 32, 2, 6

    key = jax.random.PRNGKey(0)
    k_feat, k_par = jax.random.split(key)
    feats = jax.random.randint(k_feat, (SEQ, BATCH), 0, VOCAB, dtype=jnp.int32)
    params = init_params(k_par, VOCAB, EMB_DIM, HIDDEN_DIM, RNN_LAYERS, TAGSET)

    crf_out, (h_n, c_n) = lstm_crf_forward(feats, params, tagset=TAGSET)
    jax.block_until_ready(crf_out)
    jax.block_until_ready(h_n)
    jax.block_until_ready(c_n)

    assert crf_out.shape == (SEQ, BATCH, TAGSET, TAGSET)
    assert h_n.shape == (RNN_LAYERS * 2, BATCH, HIDDEN_DIM // 2)
    assert c_n.shape == (RNN_LAYERS * 2, BATCH, HIDDEN_DIM // 2)
    assert bool(jnp.all(jnp.isfinite(crf_out)))
    print("KERNEL_OK")
</pallas_src>

<mosaic_0001>
module attributes {stable_mosaic.version = 11 : i64} {
  func.func @_crf_kernel(%arg0: i32, %arg1: memref<64x32xbf16, #tpu.memory_space<vmem>>, %arg2: memref<32x128xbf16, #tpu.memory_space<vmem>>, %arg3: memref<1x128xf32, #tpu.memory_space<vmem>>, %arg4: memref<64x128xf32, #tpu.memory_space<vmem>>) attributes {dimension_semantics = [#tpu.dimension_semantics<parallel>], iteration_bounds = array<i64: 1>, scalar_prefetch = 0 : i64, scratch_operands = 0 : i64, tpu.core_type = #tpu.core_type<tc>, window_params = [{transform_indices = @transform_0, window_bounds = array<i64: 64, 32>}, {pipeline_mode = #tpu.pipeline_mode<synchronous>, transform_indices = @transform_1, window_bounds = array<i64: 32, 128>}, {pipeline_mode = #tpu.pipeline_mode<synchronous>, transform_indices = @transform_2, window_bounds = array<i64: 1, 128>}, {transform_indices = @transform_3, window_bounds = array<i64: 64, 128>}]} {
    %c0 = arith.constant 0 : index
    %c0_0 = arith.constant 0 : index
    %0 = vector.load %arg1[%c0, %c0_0] : memref<64x32xbf16, #tpu.memory_space<vmem>>, vector<64x32xbf16>
    %c0_1 = arith.constant 0 : index
    %c0_2 = arith.constant 0 : index
    %1 = vector.load %arg2[%c0_1, %c0_2] : memref<32x128xbf16, #tpu.memory_space<vmem>>, vector<32x128xbf16>
    %cst = arith.constant dense<0.000000e+00> : vector<64x128xf32>
    %2 = tpu.matmul %0, %1, %cst {dimension_numbers = #tpu.dot_dimension_numbers<[1], [0], [0], [1], [0, 0, 1, 1], [], []>} : vector<64x32xbf16>, vector<32x128xbf16>, vector<64x128xf32> -> vector<64x128xf32>
    %c0_3 = arith.constant 0 : index
    %c0_4 = arith.constant 0 : index
    %3 = vector.load %arg3[%c0_3, %c0_4] : memref<1x128xf32, #tpu.memory_space<vmem>>, vector<1x128xf32>
    %4 = vector.broadcast %3 : vector<1x128xf32> to vector<64x128xf32>
    %5 = arith.addf %2, %4 : vector<64x128xf32>
    %c0_5 = arith.constant 0 : index
    %c0_6 = arith.constant 0 : index
    %6 = vector.load %arg4[%c0_5, %c0_6] : memref<64x128xf32, #tpu.memory_space<vmem>>, vector<64x128xf32>
    tpu.vector_store %arg4[%c0_5, %c0_6], %5 {strides = array<i32>} : memref<64x128xf32, #tpu.memory_space<vmem>>, vector<64x128xf32>,
    return
  }
  func.func @transform_0(%arg0: i32) -> (i32, i32) {
    %c0_i32 = arith.constant 0 : i32
    %c0_i32_0 = arith.constant 0 : i32
    return %arg0, %c0_i32 : i32, i32
  }
  func.func @transform_1(%arg0: i32) -> (i32, i32) {
    %c0_i32 = arith.constant 0 : i32
    %c0_i32_0 = arith.constant 0 : i32
    %c0_i32_1 = arith.constant 0 : i32
    return %c0_i32, %c0_i32_0 : i32, i32
  }
  func.func @transform_2(%arg0: i32) -> (i32, i32) {
    %c0_i32 = arith.constant 0 : i32
    %c0_i32_0 = arith.constant 0 : i32
    %c0_i32_1 = arith.constant 0 : i32
    return %c0_i32, %c0_i32_0 : i32, i32
  }
  func.func @transform_3(%arg0: i32) -> (i32, i32) {
    %c0_i32 = arith.constant 0 : i32
    %c0_i32_0 = arith.constant 0 : i32
    return %arg0, %c0_i32 : i32, i32
  }
}

module attributes {stable_mosaic.version = 11 : i64} {
  func.func @_bilstm_kernel(%arg0: i32, %arg1: memref<8x8x16xf32, #tpu.memory_space<vmem>>, %arg2: memref<16x128xbf16, #tpu.memory_space<vmem>>, %arg3: memref<16x64xbf16, #tpu.memory_space<vmem>>, %arg4: memref<16x64xbf16, #tpu.memory_space<vmem>>, %arg5: memref<1x128xf32, #tpu.memory_space<vmem>>, %arg6: memref<8x8x32xbf16, #tpu.memory_space<vmem>>, %arg7: memref<8x32xf32, #tpu.memory_space<vmem>>, %arg8: memref<8x32xf32, #tpu.memory_space<vmem>>, %arg9: memref<64x64xbf16, #tpu.memory_space<vmem>>, %arg10: memref<64x64xbf16, #tpu.memory_space<vmem>>) attributes {dimension_semantics = [#tpu.dimension_semantics<parallel>], iteration_bounds = array<i64: 1>, scalar_prefetch = 0 : i64, scratch_operands = 2 : i64, tpu.core_type = #tpu.core_type<tc>, window_params = [{transform_indices = @transform_0, window_bounds = array<i64: 8, 8, 16>}, {pipeline_mode = #tpu.pipeline_mode<synchronous>, transform_indices = @transform_1, window_bounds = array<i64: 16, 128>}, {pipeline_mode = #tpu.pipeline_mode<synchronous>, transform_indices = @transform_2, window_bounds = array<i64: 16, 64>}, {pipeline_mode = #tpu.pipeline_mode<synchronous>, transform_indices = @transform_3, window_bounds = array<i64: 16, 64>}, {pipeline_mode = #tpu.pipeline_mode<synchronous>, transform_indices = @transform_4, window_bounds = array<i64: 1, 128>}, {transform_indices = @transform_5, window_bounds = array<i64: 8, 8, 32>}, {transform_indices = @transform_6, window_bounds = array<i64: 8, 32>}, {transform_indices = @transform_7, window_bounds = array<i64: 8, 32>}]} {
    %c0 = arith.constant 0 : index
    %c0_0 = arith.constant 0 : index
    %c0_1 = arith.constant 0 : index
    %0 = vector.load %arg1[%c0, %c0_0, %c0_1] : memref<8x8x16xf32, #tpu.memory_space<vmem>>, vector<8x8x16xf32>
    %1 = vector.shape_cast %0 : vector<8x8x16xf32> to vector<64x16xf32>
    %2 = arith.truncf %1 : vector<64x16xf32> to vector<64x16xbf16>
    %c0_2 = arith.constant 0 : index
    %c0_3 = arith.constant 0 : index
    %3 = vector.load %arg2[%c0_2, %c0_3] : memref<16x128xbf16, #tpu.memory_space<vmem>>, vector<16x128xbf16>
    %cst = arith.constant dense<0.000000e+00> : vector<64x128xf32>
    %4 = tpu.matmul %2, %3, %cst {dimension_numbers = #tpu.dot_dimension_numbers<[1], [0], [0], [1], [0, 0, 1, 1], [], []>} : vector<64x16xbf16>, vector<16x128xbf16>, vector<64x128xf32> -> vector<64x128xf32>
    %c0_4 = arith.constant 0 : index
    %c0_5 = arith.constant 0 : index
    %5 = vector.load %arg5[%c0_4, %c0_5] : memref<1x128xf32, #tpu.memory_space<vmem>>, vector<1x128xf32>
    %6 = vector.broadcast %5 : vector<1x128xf32> to vector<64x128xf32>
    %7 = arith.addf %4, %6 : vector<64x128xf32>
    %8 = vector.extract_strided_slice %7 {offsets = [0, 0], sizes = [64, 64], strides = [1, 1]} : vector<64x128xf32> to vector<64x64xf32>
    %9 = arith.truncf %8 : vector<64x64xf32> to vector<64x64xbf16>
    %c0_6 = arith.constant 0 : index
    %c0_7 = arith.constant 0 : index
    %10 = vector.load %arg9[%c0_6, %c0_7] : memref<64x64xbf16, #tpu.memory_space<vmem>>, vector<64x64xbf16>
    tpu.vector_store %arg9[%c0_6, %c0_7], %9 {strides = array<i32>} : memref<64x64xbf16, #tpu.memory_space<vmem>>, vector<64x64xbf16>,
    %11 = vector.extract_strided_slice %7 {offsets = [0, 64], sizes = [64, 64], strides = [1, 1]} : vector<64x128xf32> to vector<64x64xf32>
    %12 = arith.truncf %11 : vector<64x64xf32> to vector<64x64xbf16>
    %c0_8 = arith.constant 0 : index
    %c0_9 = arith.constant 0 : index
    %13 = vector.load %arg10[%c0_8, %c0_9] : memref<64x64xbf16, #tpu.memory_space<vmem>>, vector<64x64xbf16>
    tpu.vector_store %arg10[%c0_8, %c0_9], %12 {strides = array<i32>} : memref<64x64xbf16, #tpu.memory_space<vmem>>, vector<64x64xbf16>,
    %c0_10 = arith.constant 0 : index
    %c0_11 = arith.constant 0 : index
    %14 = vector.load %arg3[%c0_10, %c0_11] : memref<16x64xbf16, #tpu.memory_space<vmem>>, vector<16x64xbf16>
    %c0_12 = arith.constant 0 : index
    %c0_13 = arith.constant 0 : index
    %15 = vector.load %arg4[%c0_12, %c0_13] : memref<16x64xbf16, #tpu.memory_space<vmem>>, vector<16x64xbf16>
    %cst_14 = arith.constant 0.000000e+00 : f32
    %16 = vector.broadcast %cst_14 : f32 to vector<8x16xf32>
    %c0_i32 = arith.constant 0 : i32
    %c7_i32 = arith.constant 7 : i32
    %17 = arith.subi %c7_i32, %c0_i32 : i32
    %c8_i32 = arith.constant 8 : i32
    %18 = arith.muli %c0_i32, %c8_i32 : i32
    %19 = tpu.assume_multiple %18, 8 : i32
    %c8_i32_15 = arith.constant 8 : i32
    %20 = arith.muli %17, %c8_i32_15 : i32
    %21 = tpu.assume_multiple %20, 8 : i32
    %22 = arith.index_cast %19 : i32 to index
    %c0_16 = arith.constant 0 : index
    %23 = vector.load %arg9[%22, %c0_16] : memref<64x64xbf16, #tpu.memory_space<vmem>>, vector<8x64xbf16>
    %24 = arith.extf %23 : vector<8x64xbf16> to vector<8x64xf32>
    %25 = arith.truncf %16 : vector<8x16xf32> to vector<8x16xbf16>
    %cst_17 = arith.constant dense<0.000000e+00> : vector<8x64xf32>
    %26 = tpu.matmul %25, %14, %cst_17 {dimension_numbers = #tpu.dot_dimension_numbers<[1], [0], [0], [1], [0, 0, 1, 1], [], []>} : vector<8x16xbf16>, vector<16x64xbf16>, vector<8x64xf32> -> vector<8x64xf32>
    %27 = arith.addf %24, %26 : vector<8x64xf32>
    %28 = arith.index_cast %21 : i32 to index
    %c0_18 = arith.constant 0 : index
    %29 = vector.load %arg10[%28, %c0_18] : memref<64x64xbf16, #tpu.memory_space<vmem>>, vector<8x64xbf16>
    %30 = arith.extf %29 : vector<8x64xbf16> to vector<8x64xf32>
    %31 = arith.truncf %16 : vector<8x16xf32> to vector<8x16xbf16>
    %cst_19 = arith.constant dense<0.000000e+00> : vector<8x64xf32>
    %32 = tpu.matmul %31, %15, %cst_19 {dimension_numbers = #tpu.dot_dimension_numbers<[1], [0], [0], [1], [0, 0, 1, 1], [], []>} : vector<8x16xbf16>, vector<16x64xbf16>, vector<8x64xf32> -> vector<8x64xf32>
    %33 = arith.addf %30, %32 : vector<8x64xf32>
    %34 = vector.extract_strided_slice %27 {offsets = [0, 0], sizes = [8, 16], strides = [1, 1]} : vector<8x64xf32> to vector<8x16xf32>
    %cst_20 = arith.constant 0.000000e+00 : f32
    %35 = vector.broadcast %cst_20 : f32 to vector<8x16xf32>
    %36 = arith.subf %35, %34 : vector<8x16xf32>
    %37 = math.exp %36 : vector<8x16xf32>
    %cst_21 = arith.constant 1.000000e+00 : f32
    %38 = vector.broadcast %cst_21 : f32 to vector<8x16xf32>
    %39 = arith.addf %38, %37 : vector<8x16xf32>
    %40 = tpu.reciprocal %39 {approx = true} : vector<8x16xf32> -> vector<8x16xf32>
    %41 = vector.extract_strided_slice %27 {offsets = [0, 16], sizes = [8, 16], strides = [1, 1]} : vector<8x64xf32> to vector<8x16xf32>
    %cst_22 = arith.constant 0.000000e+00 : f32
    %42 = vector.broadcast %cst_22 : f32 to vector<8x16xf32>
    %43 = arith.subf %42, %41 : vector<8x16xf32>
    %44 = math.exp %43 : vector<8x16xf32>
    %cst_23 = arith.constant 1.000000e+00 : f32
    %45 = vector.broadcast %cst_23 : f32 to vector<8x16xf32>
    %46 = arith.addf %45, %44 : vector<8x16xf32>
    %47 = tpu.reciprocal %46 {approx = true} : vector<8x16xf32> -> vector<8x16xf32>
    %48 = vector.extract_strided_slice %27 {offsets = [0, 32], sizes = [8, 16], strides = [1, 1]} : vector<8x64xf32> to vector<8x16xf32>
    %49 = math.tanh %48 : vector<8x16xf32>
    %50 = vector.extract_strided_slice %27 {offsets = [0, 48], sizes = [8, 16], strides = [1, 1]} : vector<8x64xf32> to vector<8x16xf32>
    %cst_24 = arith.constant 0.000000e+00 : f32
    %51 = vector.broadcast %cst_24 : f32 to vector<8x16xf32>
    %52 = arith.subf %51, %50 : vector<8x16xf32>
    %53 = math.exp %52 : vector<8x16xf32>
    %cst_25 = arith.constant 1.000000e+00 : f32
    %54 = vector.broadcast %cst_25 : f32 to vector<8x16xf32>
    %55 = arith.addf %54, %53 : vector<8x16xf32>
    %56 = tpu.reciprocal %55 {approx = true} : vector<8x16xf32> -> vector<8x16xf32>
    %57 = arith.mulf %47, %16 : vector<8x16xf32>
    %58 = arith.mulf %40, %49 : vector<8x16xf32>
    %59 = arith.addf %57, %58 : vector<8x16xf32>
    %60 = math.tanh %59 : vector<8x16xf32>
    %61 = arith.mulf %56, %60 : vector<8x16xf32>
    %62 = vector.extract_strided_slice %33 {offsets = [0, 0], sizes = [8, 16], strides = [1, 1]} : vector<8x64xf32> to vector<8x16xf32>
    %cst_26 = arith.constant 0.000000e+00 : f32
    %63 = vector.broadcast %cst_26 : f32 to vector<8x16xf32>
    %64 = arith.subf %63, %62 : vector<8x16xf32>
    %65 = math.exp %64 : vector<8x16xf32>
    %cst_27 = arith.constant 1.000000e+00 : f32
    %66 = vector.broadcast %cst_27 : f32 to vector<8x16xf32>
    %67 = arith.addf %66, %65 : vector<8x16xf32>
    %68 = tpu.reciprocal %67 {approx = true} : vector<8x16xf32> -> vector<8x16xf32>
    %69 = vector.extract_strided_slice %33 {offsets = [0, 16], sizes = [8, 16], strides = [1, 1]} : vector<8x64xf32> to vector<8x16xf32>
    %cst_28 = arith.constant 0.000000e+00 : f32
    %70 = vector.broadcast %cst_28 : f32 to vector<8x16xf32>
    %71 = arith.subf %70, %69 : vector<8x16xf32>
    %72 = math.exp %71 : vector<8x16xf32>
    %cst_29 = arith.constant 1.000000e+00 : f32
    %73 = vector.broadcast %cst_29 : f32 to vector<8x16xf32>
    %74 = arith.addf %73, %72 : vector<8x16xf32>
    %75 = tpu.reciprocal %74 {approx = true} : vector<8x16xf32> -> vector<8x16xf32>
    %76 = vector.extract_strided_slice %33 {offsets = [0, 32], sizes = [8, 16], strides = [1, 1]} : vector<8x64xf32> to vector<8x16xf32>
    %77 = math.tanh %76 : vector<8x16xf32>
    %78 = vector.extract_strided_slice %33 {offsets = [0, 48], sizes = [8, 16], strides = [1, 1]} : vector<8x64xf32> to vector<8x16xf32>
    %cst_30 = arith.constant 0.000000e+00 : f32
    %79 = vector.broadcast %cst_30 : f32 to vector<8x16xf32>
    %80 = arith.subf %79, %78 : vector<8x16xf32>
    %81 = math.exp %80 : vector<8x16xf32>
    %cst_31 = arith.constant 1.000000e+00 : f32
    %82 = vector.broadcast %cst_31 : f32 to vector<8x16xf32>
    %83 = arith.addf %82, %81 : vector<8x16xf32>
    %84 = tpu.reciprocal %83 {approx = true} : vector<8x16xf32> -> vector<8x16xf32>
    %85 = arith.mulf %75, %16 : vector<8x16xf32>
    %86 = arith.mulf %68, %77 : vector<8x16xf32>
    %87 = arith.addf %85, %86 : vector<8x16xf32>
    %88 = math.tanh %87 : vector<8x16xf32>
    %89 = arith.mulf %84, %88 : vector<8x16xf32>
    %90 = arith.truncf %61 : vector<8x16xf32> to vector<8x16xbf16>
    %91 = arith.index_cast %c0_i32 : i32 to index
    %c0_32 = arith.constant 0 : index
    %c0_33 = arith.constant 0 : index
    %92 = vector.load %arg6[%91, %c0_32, %c0_33] : memref<8x8x32xbf16, #tpu.memory_space<vmem>>, vector<1x8x16xbf16>
    %93 = vector.shape_cast %92 : vector<1x8x16xbf16> to vector<8x16xbf16>
    %94 = vector.shape_cast %90 : vector<8x16xbf16> to vector<1x8x16xbf16>
    tpu.vector_store %arg6[%91, %c0_32, %c0_33], %94 {strides = array<i32>} : memref<8x8x32xbf16, #tpu.memory_space<vmem>>, vector<1x8x16xbf16>,
    %95 = arith.truncf %89 : vector<8x16xf32> to vector<8x16xbf16>
    %96 = arith.index_cast %17 : i32 to index
    %c0_34 = arith.constant 0 : index
    %c16 = arith.constant 16 : index
    %97 = vector.load %arg6[%96, %c0_34, %c16] : memref<8x8x32xbf16, #tpu.memory_space<vmem>>, vector<1x8x16xbf16>
    %98 = vector.shape_cast %97 : vector<1x8x16xbf16> to vector<8x16xbf16>
    %99 = vector.shape_cast %95 : vector<8x16xbf16> to vector<1x8x16xbf16>
    tpu.vector_store %arg6[%96, %c0_34, %c16], %99 {strides = array<i32>} : memref<8x8x32xbf16, #tpu.memory_space<vmem>>, vector<1x8x16xbf16>,
    %c1_i32 = arith.constant 1 : i32
    %c7_i32_35 = arith.constant 7 : i32
    %100 = arith.subi %c7_i32_35, %c1_i32 : i32
    %c8_i32_36 = arith.constant 8 : i32
    %101 = arith.muli %c1_i32, %c8_i32_36 : i32
    %102 = tpu.assume_multiple %101, 8 : i32
    %c8_i32_37 = arith.constant 8 : i32
    %103 = arith.muli %100, %c8_i32_37 : i32
    %104 = tpu.assume_multiple %103, 8 : i32
    %105 = arith.index_cast %102 : i32 to index
    %c0_38 = arith.constant 0 : index
    %106 = vector.load %arg9[%105, %c0_38] : memref<64x64xbf16, #tpu.memory_space<vmem>>, vector<8x64xbf16>
    %107 = arith.extf %106 : vector<8x64xbf16> to vector<8x64xf32>
    %108 = arith.truncf %61 : vector<8x16xf32> to vector<8x16xbf16>
    %cst_39 = arith.constant dense<0.000000e+00> : vector<8x64xf32>
    %109 = tpu.matmul %108, %14, %cst_39 {dimension_numbers = #tpu.dot_dimension_numbers<[1], [0], [0], [1], [0, 0, 1, 1], [], []>} : vector<8x16xbf16>, vector<16x64xbf16>, vector<8x64xf32> -> vector<8x64xf32>
    %110 = arith.addf %107, %109 : vector<8x64xf32>
    %111 = arith.index_cast %104 : i32 to index
    %c0_40 = arith.constant 0 : index
    %112 = vector.load %arg10[%111, %c0_40] : memref<64x64xbf16, #tpu.memory_space<vmem>>, vector<8x64xbf16>
    %113 = arith.extf %112 : vector<8x64xbf16> to vector<8x64xf32>
    %114 = arith.truncf %89 : vector<8x16xf32> to vector<8x16xbf16>
    %cst_41 = arith.constant dense<0.000000e+00> : vector<8x64xf32>
    %115 = tpu.matmul %114, %15, %cst_41 {dimension_numbers = #tpu.dot_dimension_numbers<[1], [0], [0], [1], [0, 0, 1, 1], [], []>} : vector<8x16xbf16>, vector<16x64xbf16>, vector<8x64xf32> -> vector<8x64xf32>
    %116 = arith.addf %113, %115 : vector<8x64xf32>
    %117 = vector.extract_strided_slice %110 {offsets = [0, 0], sizes = [8, 16], strides = [1, 1]} : vector<8x64xf32> to vector<8x16xf32>
    %cst_42 = arith.constant 0.000000e+00 : f32
    %118 = vector.broadcast %cst_42 : f32 to vector<8x16xf32>
    %119 = arith.subf %118, %117 : vector<8x16xf32>
    %120 = math.exp %119 : vector<8x16xf32>
    %cst_43 = arith.constant 1.000000e+00 : f32
    %121 = vector.broadcast %cst_43 : f32 to vector<8x16xf32>
    %122 = arith.addf %121, %120 : vector<8x16xf32>
    %123 = tpu.reciprocal %122 {approx = true} : vector<8x16xf32> -> vector<8x16xf32>
    %124 = vector.extract_strided_slice %110 {offsets = [0, 16], sizes = [8, 16], strides = [1, 1]} : vector<8x64xf32> to vector<8x16xf32>
    %cst_44 = arith.constant 0.000000e+00 : f32
    %125 = vector.broadcast %cst_44 : f32 to vector<8x16xf32>
    %126 = arith.subf %125, %124 : vector<8x16xf32>
    %127 = math.exp %126 : vector<8x16xf32>
    %cst_45 = arith.constant 1.000000e+00 : f32
    %128 = vector.broadcast %cst_45 : f32 to vector<8x16xf32>
    %129 = arith.addf %128, %127 : vector<8x16xf32>
    %130 = tpu.reciprocal %129 {approx = true} : vector<8x16xf32> -> vector<8x16xf32>
    %131 = vector.extract_strided_slice %110 {offsets = [0, 32], sizes = [8, 16], strides = [1, 1]} : vector<8x64xf32> to vector<8x16xf32>
    %132 = math.tanh %131 : vector<8x16xf32>
    %133 = vector.extract_strided_slice %110 {offsets = [0, 48], sizes = [8, 16], strides = [1, 1]} : vector<8x64xf32> to vector<8x16xf32>
    %cst_46 = arith.constant 0.000000e+00 : f32
    %134 = vector.broadcast %cst_46 : f32 to vector<8x16xf32>
    %135 = arith.subf %134, %133 : vector<8x16xf32>
    %136 = math.exp %135 : vector<8x16xf32>
    %cst_47 = arith.constant 1.000000e+00 : f32
    %137 = vector.broadcast %cst_47 : f32 to vector<8x16xf32>
    %138 = arith.addf %137, %136 : vector<8x16xf32>
    %139 = tpu.reciprocal %138 {approx = true} : vector<8x16xf32> -> vector<8x16xf32>
    %140 = arith.mulf %130, %59 : vector<8x16xf32>
    %141 = arith.mulf %123, %132 : vector<8x16xf32>
    %142 = arith.addf %140, %141 : vector<8x16xf32>
    %143 = math.tanh %142 : vector<8x16xf32>
    %144 = arith.mulf %139, %143 : vector<8x16xf32>
    %145 = vector.extract_strided_slice %116 {offsets = [0, 0], sizes = [8, 16], strides = [1, 1]} : vector<8x64xf32> to vector<8x16xf32>
    %cst_48 = arith.constant 0.000000e+00 : f32
    %146 = vector.broadcast %cst_48 : f32 to vector<8x16xf32>
    %147 = arith.subf %146, %145 : vector<8x16xf32>
    %148 = math.exp %147 : vector<8x16xf32>
    %cst_49 = arith.constant 1.000000e+00 : f32
    %149 = vector.broadcast %cst_49 : f32 to vector<8x16xf32>
    %150 = arith.addf %149, %148 : vector<8x16xf32>
    %151 = tpu.reciprocal %150 {approx = true} : vector<8x16xf32> -> vector<8x16xf32>
    %152 = vector.extract_strided_slice %116 {offsets = [0, 16], sizes = [8, 16], strides = [1, 1]} : vector<8x64xf32> to vector<8x16xf32>
    %cst_50 = arith.constant 0.000000e+00 : f32
    %153 = vector.broadcast %cst_50 : f32 to vector<8x16xf32>
    %154 = arith.subf %153, %152 : vector<8x16xf32>
    %155 = math.exp %154 : vector<8x16xf32>
    %cst_51 = arith.constant 1.000000e+00 : f32
    %156 = vector.broadcast %cst_51 : f32 to vector<8x16xf32>
    %157 = arith.addf %156, %155 : vector<8x16xf32>
    %158 = tpu.reciprocal %157 {approx = true} : vector<8x16xf32> -> vector<8x16xf32>
    %159 = vector.extract_strided_slice %116 {offsets = [0, 32], sizes = [8, 16], strides = [1, 1]} : vector<8x64xf32> to vector<8x16xf32>
    %160 = math.tanh %159 : vector<8x16xf32>
    %161 = vector.extract_strided_slice %116 {offsets = [0, 48], sizes = [8, 16], strides = [1, 1]} : vector<8x64xf32> to vector<8x16xf32>
    %cst_52 = arith.constant 0.000000e+00 : f32
    %162 = vector.broadcast %cst_52 : f32 to vector<8x16xf32>
    %163 = arith.subf %162, %161 : vector<8x16xf32>
    %164 = math.exp %163 : vector<8x16xf32>
    %cst_53 = arith.constant 1.000000e+00 : f32
    %165 = vector.broadcast %cst_53 : f32 to vector<8x16xf32>
    %166 = arith.addf %165, %164 : vector<8x16xf32>
    %167 = tpu.reciprocal %166 {approx = true} : vector<8x16xf32> -> vector<8x16xf32>
    %168 = arith.mulf %158, %87 : vector<8x16xf32>
    %169 = arith.mulf %151, %160 : vector<8x16xf32>
    %170 = arith.addf %168, %169 : vector<8x16xf32>
    %171 = math.tanh %170 : vector<8x16xf32>
    %172 = arith.mulf %167, %171 : vector<8x16xf32>
    %173 = arith.truncf %144 : vector<8x16xf32> to vector<8x16xbf16>
    %174 = arith.index_cast %c1_i32 : i32 to index
    %c0_54 = arith.constant 0 : index
    %c0_55 = arith.constant 0 : index
    %175 = vector.load %arg6[%174, %c0_54, %c0_55] : memref<8x8x32xbf16, #tpu.memory_space<vmem>>, vector<1x8x16xbf16>
    %176 = vector.shape_cast %175 : vector<1x8x16xbf16> to vector<8x16xbf16>
    %177 = vector.shape_cast %173 : vector<8x16xbf16> to vector<1x8x16xbf16>
    tpu.vector_store %arg6[%174, %c0_54, %c0_55], %177 {strides = array<i32>} : memref<8x8x32xbf16, #tpu.memory_space<vmem>>, vector<1x8x16xbf16>,
    %178 = arith.truncf %172 : vector<8x16xf32> to vector<8x16xbf16>
    %179 = arith.index_cast %100 : i32 to index
    %c0_56 = arith.constant 0 : index
    %c16_57 = arith.constant 16 : index
    %180 = vector.load %arg6[%179, %c0_56, %c16_57] : memref<8x8x32xbf16, #tpu.memory_space<vmem>>, vector<1x8x16xbf16>
    %181 = vector.shape_cast %180 : vector<1x8x16xbf16> to vector<8x16xbf16>
    %182 = vector.shape_cast %178 : vector<8x16xbf16> to vector<1x8x16xbf16>
    tpu.vector_store %arg6[%179, %c0_56, %c16_57], %182 {strides = array<i32>} : memref<8x8x32xbf16, #tpu.memory_space<vmem>>, vector<1x8x16xbf16>,
    %c2_i32 = arith.constant 2 : i32
    %c7_i32_58 = arith.constant 7 : i32
    %183 = arith.subi %c7_i32_58, %c2_i32 : i32
    %c8_i32_59 = arith.constant 8 : i32
    %184 = arith.muli %c2_i32, %c8_i32_59 : i32
    %185 = tpu.assume_multiple %184, 8 : i32
    %c8_i32_60 = arith.constant 8 : i32
    %186 = arith.muli %183, %c8_i32_60 : i32
    %187 = tpu.assume_multiple %186, 8 : i32
    %188 = arith.index_cast %185 : i32 to index
    %c0_61 = arith.constant 0 : index
    %189 = vector.load %arg9[%188, %c0_61] : memref<64x64xbf16, #tpu.memory_space<vmem>>, vector<8x64xbf16>
    %190 = arith.extf %189 : vector<8x64xbf16> to vector<8x64xf32>
    %191 = arith.truncf %144 : vector<8x16xf32> to vector<8x16xbf16>
    %cst_62 = arith.constant dense<0.000000e+00> : vector<8x64xf32>
    %192 = tpu.matmul %191, %14, %cst_62 {dimension_numbers = #tpu.dot_dimension_numbers<[1], [0], [0], [1], [0, 0, 1, 1], [], []>} : vector<8x16xbf16>, vector<16x64xbf16>, vector<8x64xf32> -> vector<8x64xf32>
    %193 = arith.addf %190, %192 : vector<8x64xf32>
    %194 = arith.index_cast %187 : i32 to index
    %c0_63 = arith.constant 0 : index
    %195 = vector.load %arg10[%194, %c0_63] : memref<64x64xbf16, #tpu.memory_space<vmem>>, vector<8x64xbf16>
    %196 = arith.extf %195 : vector<8x64xbf16> to vector<8x64xf32>
    %197 = arith.truncf %172 : vector<8x16xf32> to vector<8x16xbf16>
    %cst_64 = arith.constant dense<0.000000e+00> : vector<8x64xf32>
    %198 = tpu.matmul %197, %15, %cst_64 {dimension_numbers = #tpu.dot_dimension_numbers<[1], [0], [0], [1], [0, 0, 1, 1], [], []>} : vector<8x16xbf16>, vector<16x64xbf16>, vector<8x64xf32> -> vector<8x64xf32>
    %199 = arith.addf %196, %198 : vector<8x64xf32>
    %200 = vector.extract_strided_slice %193 {offsets = [0, 0], sizes = [8, 16], strides = [1, 1]} : vector<8x64xf32> to vector<8x16xf32>
    %cst_65 = arith.constant 0.000000e+00 : f32
    %201 = vector.broadcast %cst_65 : f32 to vector<8x16xf32>
    %202 = arith.subf %201, %200 : vector<8x16xf32>
    %203 = math.exp %202 : vector<8x16xf32>
    %cst_66 = arith.constant 1.000000e+00 : f32
    %204 = vector.broadcast %cst_66 : f32 to vector<8x16xf32>
    %205 = arith.addf %204, %203 : vector<8x16xf32>
    %206 = tpu.reciprocal %205 {approx = true} : vector<8x16xf32> -> vector<8x16xf32>
    %207 = vector.extract_strided_slice %193 {offsets = [0, 16], sizes = [8, 16], strides = [1, 1]} : vector<8x64xf32> to vector<8x16xf32>
    %cst_67 = arith.constant 0.000000e+00 : f32
    %208 = vector.broadcast %cst_67 : f32 to vector<8x16xf32>
    %209 = arith.subf %208, %207 : vector<8x16xf32>
    %210 = math.exp %209 : vector<8x16xf32>
    %cst_68 = arith.constant 1.000000e+00 : f32
    %211 = vector.broadcast %cst_68 : f32 to vector<8x16xf32>
    %212 = arith.addf %211, %210 : vector<8x16xf32>
    %213 = tpu.reciprocal %212 {approx = true} : vector<8x16xf32> -> vector<8x16xf32>
    %214 = vector.extract_strided_slice %193 {offsets = [0, 32], sizes = [8, 16], strides = [1, 1]} : vector<8x64xf32> to vector<8x16xf32>
    %215 = math.tanh %214 : vector<8x16xf32>
    %216 = vector.extract_strided_slice %193 {offsets = [0, 48], sizes = [8, 16], strides = [1, 1]} : vector<8x64xf32> to vector<8x16xf32>
    %cst_69 = arith.constant 0.000000e+00 : f32
    %217 = vector.broadcast %cst_69 : f32 to vector<8x16xf32>
    %218 = arith.subf %217, %216 : vector<8x16xf32>
    %219 = math.exp %218 : vector<8x16xf32>
    %cst_70 = arith.constant 1.000000e+00 : f32
    %220 = vector.broadcast %cst_70 : f32 to vector<8x16xf32>
    %221 = arith.addf %220, %219 : vector<8x16xf32>
    %222 = tpu.reciprocal %221 {approx = true} : vector<8x16xf32> -> vector<8x16xf32>
    %223 = arith.mulf %213, %142 : vector<8x16xf32>
    %224 = arith.mulf %206, %215 : vector<8x16xf32>
    %225 = arith.addf %223, %224 : vector<8x16xf32>
    %226 = math.tanh %225 : vector<8x16xf32>
    %227 = arith.mulf %222, %226 : vector<8x16xf32>
    %228 = vector.extract_strided_slice %199 {offsets = [0, 0], sizes = [8, 16], strides = [1, 1]} : vector<8x64xf32> to vector<8x16xf32>
    %cst_71 = arith.constant 0.000000e+00 : f32
    %229 = vector.broadcast %cst_71 : f32 to vector<8x16xf32>
    %230 = arith.subf %229, %228 : vector<8x16xf32>
    %231 = math.exp %230 : vector<8x16xf32>
    %cst_72 = arith.constant 1.000000e+00 : f32
    %232 = vector.broadcast %cst_72 : f32 to vector<8x16xf32>
    %233 = arith.addf %232, %231 : vector<8x16xf32>
    %234 = tpu.reciprocal %233 {approx = true} : vector<8x16xf32> -> vector<8x16xf32>
    %235 = vector.extract_strided_slice %199 {offsets = [0, 16], sizes = [8, 16], strides = [1, 1]} : vector<8x64xf32> to vector<8x16xf32>
    %cst_73 = arith.constant 0.000000e+00 : f32
    %236 = vector.broadcast %cst_73 : f32 to vector<8x16xf32>
    %237 = arith.subf %236, %235 : vector<8x16xf32>
    %238 = math.exp %237 : vector<8x16xf32>
    %cst_74 = arith.constant 1.000000e+00 : f32
    %239 = vector.broadcast %cst_74 : f32 to vector<8x16xf32>
    %240 = arith.addf %239, %238 : vector<8x16xf32>
    %241 = tpu.reciprocal %240 {approx = true} : vector<8x16xf32> -> vector<8x16xf32>
    %242 = vector.extract_strided_slice %199 {offsets = [0, 32], sizes = [8, 16], strides = [1, 1]} : vector<8x64xf32> to vector<8x16xf32>
    %243 = math.tanh %242 : vector<8x16xf32>
    %244 = vector.extract_strided_slice %199 {offsets = [0, 48], sizes = [8, 16], strides = [1, 1]} : vector<8x64xf32> to vector<8x16xf32>
    %cst_75 = arith.constant 0.000000e+00 : f32
    %245 = vector.broadcast %cst_75 : f32 to vector<8x16xf32>
    %246 = arith.subf %245, %244 : vector<8x16xf32>
    %247 = math.exp %246 : vector<8x16xf32>
    %cst_76 = arith.constant 1.000000e+00 : f32
    %248 = vector.broadcast %cst_76 : f32 to vector<8x16xf32>
    %249 = arith.addf %248, %247 : vector<8x16xf32>
    %250 = tpu.reciprocal %249 {approx = true} : vector<8x16xf32> -> vector<8x16xf32>
    %251 = arith.mulf %241, %170 : vector<8x16xf32>
    %252 = arith.mulf %234, %243 : vector<8x16xf32>
    %253 = arith.addf %251, %252 : vector<8x16xf32>
    %254 = math.tanh %253 : vector<8x16xf32>
    %255 = arith.mulf %250, %254 : vector<8x16xf32>
    %256 = arith.truncf %227 : vector<8x16xf32> to vector<8x16xbf16>
    %257 = arith.index_cast %c2_i32 : i32 to index
    %c0_77 = arith.constant 0 : index
    %c0_78 = arith.constant 0 : index
    %258 = vector.load %arg6[%257, %c0_77, %c0_78] : memref<8x8x32xbf16, #tpu.memory_space<vmem>>, vector<1x8x16xbf16>
    %259 = vector.shape_cast %258 : vector<1x8x16xbf16> to vector<8x16xbf16>
    %260 = vector.shape_cast %256 : vector<8x16xbf16> to vector<1x8x16xbf16>
    tpu.vector_store %arg6[%257, %c0_77, %c0_78], %260 {strides = array<i32>} : memref<8x8x32xbf16, #tpu.memory_space<vmem>>, vector<1x8x16xbf16>,
    %261 = arith.truncf %255 : vector<8x16xf32> to vector<8x16xbf16>
    %262 = arith.index_cast %183 : i32 to index
    %c0_79 = arith.constant 0 : index
    %c16_80 = arith.constant 16 : index
    %263 = vector.load %arg6[%262, %c0_79, %c16_80] : memref<8x8x32xbf16, #tpu.memory_space<vmem>>, vector<1x8x16xbf16>
    %264 = vector.shape_cast %263 : vector<1x8x16xbf16> to vector<8x16xbf16>
    %265 = vector.shape_cast %261 : vector<8x16xbf16> to vector<1x8x16xbf16>
    tpu.vector_store %arg6[%262, %c0_79, %c16_80], %265 {strides = array<i32>} : memref<8x8x32xbf16, #tpu.memory_space<vmem>>, vector<1x8x16xbf16>,
    %c3_i32 = arith.constant 3 : i32
    %c7_i32_81 = arith.constant 7 : i32
    %266 = arith.subi %c7_i32_81, %c3_i32 : i32
    %c8_i32_82 = arith.constant 8 : i32
    %267 = arith.muli %c3_i32, %c8_i32_82 : i32
    %268 = tpu.assume_multiple %267, 8 : i32
    %c8_i32_83 = arith.constant 8 : i32
    %269 = arith.muli %266, %c8_i32_83 : i32
    %270 = tpu.assume_multiple %269, 8 : i32
    %271 = arith.index_cast %268 : i32 to index
    %c0_84 = arith.constant 0 : index
    %272 = vector.load %arg9[%271, %c0_84] : memref<64x64xbf16, #tpu.memory_space<vmem>>, vector<8x64xbf16>
    %273 = arith.extf %272 : vector<8x64xbf16> to vector<8x64xf32>
    %274 = arith.truncf %227 : vector<8x16xf32> to vector<8x16xbf16>
    %cst_85 = arith.constant dense<0.000000e+00> : vector<8x64xf32>
    %275 = tpu.matmul %274, %14, %cst_85 {dimension_numbers = #tpu.dot_dimension_numbers<[1], [0], [0], [1], [0, 0, 1, 1], [], []>} : vector<8x16xbf16>, vector<16x64xbf16>, vector<8x64xf32> -> vector<8x64xf32>
    %276 = arith.addf %273, %275 : vector<8x64xf32>
    %277 = arith.index_cast %270 : i32 to index
    %c0_86 = arith.constant 0 : index
    %278 = vector.load %arg10[%277, %c0_86] : memref<64x64xbf16, #tpu.memory_space<vmem>>, vector<8x64xbf16>
    %279 = arith.extf %278 : vector<8x64xbf16> to vector<8x64xf32>
    %280 = arith.truncf %255 : vector<8x16xf32> to vector<8x16xbf16>
    %cst_87 = arith.constant dense<0.000000e+00> : vector<8x64xf32>
    %281 = tpu.matmul %280, %15, %cst_87 {dimension_numbers = #tpu.dot_dimension_numbers<[1], [0], [0], [1], [0, 0, 1, 1], [], []>} : vector<8x16xbf16>, vector<16x64xbf16>, vector<8x64xf32> -> vector<8x64xf32>
    %282 = arith.addf %279, %281 : vector<8x64xf32>
    %283 = vector.extract_strided_slice %276 {offsets = [0, 0], sizes = [8, 16], strides = [1, 1]} : vector<8x64xf32> to vector<8x16xf32>
    %cst_88 = arith.constant 0.000000e+00 : f32
    %284 = vector.broadcast %cst_88 : f32 to vector<8x16xf32>
    %285 = arith.subf %284, %283 : vector<8x16xf32>
    %286 = math.exp %285 : vector<8x16xf32>
    %cst_89 = arith.constant 1.000000e+00 : f32
    %287 = vector.broadcast %cst_89 : f32 to vector<8x16xf32>
    %288 = arith.addf %287, %286 : vector<8x16xf32>
    %289 = tpu.reciprocal %288 {approx = true} : vector<8x16xf32> -> vector<8x16xf32>
    %290 = vector.extract_strided_slice %276 {offsets = [0, 16], sizes = [8, 16], strides = [1, 1]} : vector<8x64xf32> to vector<8x16xf32>
    %cst_90 = arith.constant 0.000000e+00 : f32
    %291 = vector.broadcast %cst_90 : f32 to vector<8x16xf32>
    %292 = arith.subf %291, %290 : vector<8x16xf32>
    %293 = math.exp %292 : vector<8x16xf32>
    %cst_91 = arith.constant 1.000000e+00 : f32
    %294 = vector.broadcast %cst_91 : f32 to vector<8x16xf32>
    %295 = arith.addf %294, %293 : vector<8x16xf32>
    %296 = tpu.reciprocal %295 {approx = true} : vector<8x16xf32> -> vector<8x16xf32>
    %297 = vector.extract_strided_slice %276 {offsets = [0, 32], sizes = [8, 16], strides = [1, 1]} : vector<8x64xf32> to vector<8x16xf32>
    %298 = math.tanh %297 : vector<8x16xf32>
    %299 = vector.extract_strided_slice %276 {offsets = [0, 48], sizes = [8, 16], strides = [1, 1]} : vector<8x64xf32> to vector<8x16xf32>
    %cst_92 = arith.constant 0.000000e+00 : f32
    %300 = vector.broadcast %cst_92 : f32 to vector<8x16xf32>
    %301 = arith.subf %300, %299 : vector<8x16xf32>
    %302 = math.exp %301 : vector<8x16xf32>
    %cst_93 = arith.constant 1.000000e+00 : f32
    %303 = vector.broadcast %cst_93 : f32 to vector<8x16xf32>
    %304 = arith.addf %303, %302 : vector<8x16xf32>
    %305 = tpu.reciprocal %304 {approx = true} : vector<8x16xf32> -> vector<8x16xf32>
    %306 = arith.mulf %296, %225 : vector<8x16xf32>
    %307 = arith.mulf %289, %298 : vector<8x16xf32>
    %308 = arith.addf %306, %307 : vector<8x16xf32>
    %309 = math.tanh %308 : vector<8x16xf32>
    %310 = arith.mulf %305, %309 : vector<8x16xf32>
    %311 = vector.extract_strided_slice %282 {offsets = [0, 0], sizes = [8, 16], strides = [1, 1]} : vector<8x64xf32> to vector<8x16xf32>
    %cst_94 = arith.constant 0.000000e+00 : f32
    %312 = vector.broadcast %cst_94 : f32 to vector<8x16xf32>
    %313 = arith.subf %312, %311 : vector<8x16xf32>
    %314 = math.exp %313 : vector<8x16xf32>
    %cst_95 = arith.constant 1.000000e+00 : f32
    %315 = vector.broadcast %cst_95 : f32 to vector<8x16xf32>
    %316 = arith.addf %315, %314 : vector<8x16xf32>
    %317 = tpu.reciprocal %316 {approx = true} : vector<8x16xf32> -> vector<8x16xf32>
    %318 = vector.extract_strided_slice %282 {offsets = [0, 16], sizes = [8, 16], strides = [1, 1]} : vector<8x64xf32> to vector<8x16xf32>
    %cst_96 = arith.constant 0.000000e+00 : f32
    %319 = vector.broadcast %cst_96 : f32 to vector<8x16xf32>
    %320 = arith.subf %319, %318 : vector<8x16xf32>
    %321 = math.exp %320 : vector<8x16xf32>
    %cst_97 = arith.constant 1.000000e+00 : f32
    %322 = vector.broadcast %cst_97 : f32 to vector<8x16xf32>
    %323 = arith.addf %322, %321 : vector<8x16xf32>
    %324 = tpu.reciprocal %323 {approx = true} : vector<8x16xf32> -> vector<8x16xf32>
    %325 = vector.extract_strided_slice %282 {offsets = [0, 32], sizes = [8, 16], strides = [1, 1]} : vector<8x64xf32> to vector<8x16xf32>
    %326 = math.tanh %325 : vector<8x16xf32>
    %327 = vector.extract_strided_slice %282 {offsets = [0, 48], sizes = [8, 16], strides = [1, 1]} : vector<8x64xf32> to vector<8x16xf32>
    %cst_98 = arith.constant 0.000000e+00 : f32
    %328 = vector.broadcast %cst_98 : f32 to vector<8x16xf32>
    %329 = arith.subf %328, %327 : vector<8x16xf32>
    %330 = math.exp %329 : vector<8x16xf32>
    %cst_99 = arith.constant 1.000000e+00 : f32
    %331 = vector.broadcast %cst_99 : f32 to vector<8x16xf32>
    %332 = arith.addf %331, %330 : vector<8x16xf32>
    %333 = tpu.reciprocal %332 {approx = true} : vector<8x16xf32> -> vector<8x16xf32>
    %334 = arith.mulf %324, %253 : vector<8x16xf32>
    %335 = arith.mulf %317, %326 : vector<8x16xf32>
    %336 = arith.addf %334, %335 : vector<8x16xf32>
    %337 = math.tanh %336 : vector<8x16xf32>
    %338 = arith.mulf %333, %337 : vector<8x16xf32>
    %339 = arith.truncf %310 : vector<8x16xf32> to vector<8x16xbf16>
    %340 = arith.index_cast %c3_i32 : i32 to index
    %c0_100 = arith.constant 0 : index
    %c0_101 = arith.constant 0 : index
    %341 = vector.load %arg6[%340, %c0_100, %c0_101] : memref<8x8x32xbf16, #tpu.memory_space<vmem>>, vector<1x8x16xbf16>
    %342 = vector.shape_cast %341 : vector<1x8x16xbf16> to vector<8x16xbf16>
    %343 = vector.shape_cast %339 : vector<8x16xbf16> to vector<1x8x16xbf16>
    tpu.vector_store %arg6[%340, %c0_100, %c0_101], %343 {strides = array<i32>} : memref<8x8x32xbf16, #tpu.memory_space<vmem>>, vector<1x8x16xbf16>,
    %344 = arith.truncf %338 : vector<8x16xf32> to vector<8x16xbf16>
    %345 = arith.index_cast %266 : i32 to index
    %c0_102 = arith.constant 0 : index
    %c16_103 = arith.constant 16 : index
    %346 = vector.load %arg6[%345, %c0_102, %c16_103] : memref<8x8x32xbf16, #tpu.memory_space<vmem>>, vector<1x8x16xbf16>
    %347 = vector.shape_cast %346 : vector<1x8x16xbf16> to vector<8x16xbf16>
    %348 = vector.shape_cast %344 : vector<8x16xbf16> to vector<1x8x16xbf16>
    tpu.vector_store %arg6[%345, %c0_102, %c16_103], %348 {strides = array<i32>} : memref<8x8x32xbf16, #tpu.memory_space<vmem>>, vector<1x8x16xbf16>,
    %c4_i32 = arith.constant 4 : i32
    %c7_i32_104 = arith.constant 7 : i32
    %349 = arith.subi %c7_i32_104, %c4_i32 : i32
    %c8_i32_105 = arith.constant 8 : i32
    %350 = arith.muli %c4_i32, %c8_i32_105 : i32
    %351 = tpu.assume_multiple %350, 8 : i32
    %c8_i32_106 = arith.constant 8 : i32
    %352 = arith.muli %349, %c8_i32_106 : i32
    %353 = tpu.assume_multiple %352, 8 : i32
    %354 = arith.index_cast %351 : i32 to index
    %c0_107 = arith.constant 0 : index
    %355 = vector.load %arg9[%354, %c0_107] : memref<64x64xbf16, #tpu.memory_space<vmem>>, vector<8x64xbf16>
    %356 = arith.extf %355 : vector<8x64xbf16> to vector<8x64xf32>
    %357 = arith.truncf %310 : vector<8x16xf32> to vector<8x16xbf16>
    %cst_108 = arith.constant dense<0.000000e+00> : vector<8x64xf32>
    %358 = tpu.matmul %357, %14, %cst_108 {dimension_numbers = #tpu.dot_dimension_numbers<[1], [0], [0], [1], [0, 0, 1, 1], [], []>} : vector<8x16xbf16>, vector<16x64xbf16>, vector<8x64xf32> -> vector<8x64xf32>
    %359 = arith.addf %356, %358 : vector<8x64xf32>
    %360 = arith.index_cast %353 : i32 to index
    %c0_109 = arith.constant 0 : index
    %361 = vector.load %arg10[%360, %c0_109] : memref<64x64xbf16, #tpu.memory_space<vmem>>, vector<8x64xbf16>
    %362 = arith.extf %361 : vector<8x64xbf16> to vector<8x64xf32>
    %363 = arith.truncf %338 : vector<8x16xf32> to vector<8x16xbf16>
    %cst_110 = arith.constant dense<0.000000e+00> : vector<8x64xf32>
    %364 = tpu.matmul %363, %15, %cst_110 {dimension_numbers = #tpu.dot_dimension_numbers<[1], [0], [0], [1], [0, 0, 1, 1], [], []>} : vector<8x16xbf16>, vector<16x64xbf16>, vector<8x64xf32> -> vector<8x64xf32>
    %365 = arith.addf %362, %364 : vector<8x64xf32>
    %366 = vector.extract_strided_slice %359 {offsets = [0, 0], sizes = [8, 16], strides = [1, 1]} : vector<8x64xf32> to vector<8x16xf32>
    %cst_111 = arith.constant 0.000000e+00 : f32
    %367 = vector.broadcast %cst_111 : f32 to vector<8x16xf32>
    %368 = arith.subf %367, %366 : vector<8x16xf32>
    %369 = math.exp %368 : vector<8x16xf32>
    %cst_112 = arith.constant 1.000000e+00 : f32
    %370 = vector.broadcast %cst_112 : f32 to vector<8x16xf32>
    %371 = arith.addf %370, %369 : vector<8x16xf32>
    %372 = tpu.reciprocal %371 {approx = true} : vector<8x16xf32> -> vector<8x16xf32>
    %373 = vector.extract_strided_slice %359 {offsets = [0, 16], sizes = [8, 16], strides = [1, 1]} : vector<8x64xf32> to vector<8x16xf32>
    %cst_113 = arith.constant 0.000000e+00 : f32
    %374 = vector.broadcast %cst_113 : f32 to vector<8x16xf32>
    %375 = arith.subf %374, %373 : vector<8x16xf32>
    %376 = math.exp %375 : vector<8x16xf32>
    %cst_114 = arith.constant 1.000000e+00 : f32
    %377 = vector.broadcast %cst_114 : f32 to vector<8x16xf32>
    %378 = arith.addf %377, %376 : vector<8x16xf32>
    %379 = tpu.reciprocal %378 {approx = true} : vector<8x16xf32> -> vector<8x16xf32>
    %380 = vector.extract_strided_slice %359 {offsets = [0, 32], sizes = [8, 16], strides = [1, 1]} : vector<8x64xf32> to vector<8x16xf32>
    %381 = math.tanh %380 : vector<8x16xf32>
    %382 = vector.extract_strided_slice %359 {offsets = [0, 48], sizes = [8, 16], strides = [1, 1]} : vector<8x64xf32> to vector<8x16xf32>
    %cst_115 = arith.constant 0.000000e+00 : f32
    %383 = vector.broadcast %cst_115 : f32 to vector<8x16xf32>
    %384 = arith.subf %383, %382 : vector<8x16xf32>
    %385 = math.exp %384 : vector<8x16xf32>
    %cst_116 = arith.constant 1.000000e+00 : f32
    %386 = vector.broadcast %cst_116 : f32 to vector<8x16xf32>
    %387 = arith.addf %386, %385 : vector<8x16xf32>
    %388 = tpu.reciprocal %387 {approx = true} : vector<8x16xf32> -> vector<8x16xf32>
    %389 = arith.mulf %379, %308 : vector<8x16xf32>
    %390 = arith.mulf %372, %381 : vector<8x16xf32>
    %391 = arith.addf %389, %390 : vector<8x16xf32>
    %392 = math.tanh %391 : vector<8x16xf32>
    %393 = arith.mulf %388, %392 : vector<8x16xf32>
    %394 = vector.extract_strided_slice %365 {offsets = [0, 0], sizes = [8, 16], strides = [1, 1]} : vector<8x64xf32> to vector<8x16xf32>
    %cst_117 = arith.constant 0.000000e+00 : f32
    %395 = vector.broadcast %cst_117 : f32 to vector<8x16xf32>
    %396 = arith.subf %395, %394 : vector<8x16xf32>
    %397 = math.exp %396 : vector<8x16xf32>
    %cst_118 = arith.constant 1.000000e+00 : f32
    %398 = vector.broadcast %cst_118 : f32 to vector<8x16xf32>
    %399 = arith.addf %398, %397 : vector<8x16xf32>
    %400 = tpu.reciprocal %399 {approx = true} : vector<8x16xf32> -> vector<8x16xf32>
    %401 = vector.extract_strided_slice %365 {offsets = [0, 16], sizes = [8, 16], strides = [1, 1]} : vector<8x64xf32> to vector<8x16xf32>
    %cst_119 = arith.constant 0.000000e+00 : f32
    %402 = vector.broadcast %cst_119 : f32 to vector<8x16xf32>
    %403 = arith.subf %402, %401 : vector<8x16xf32>
    %404 = math.exp %403 : vector<8x16xf32>
    %cst_120 = arith.constant 1.000000e+00 : f32
    %405 = vector.broadcast %cst_120 : f32 to vector<8x16xf32>
    %406 = arith.addf %405, %404 : vector<8x16xf32>
    %407 = tpu.reciprocal %406 {approx = true} : vector<8x16xf32> -> vector<8x16xf32>
    %408 = vector.extract_strided_slice %365 {offsets = [0, 32], sizes = [8, 16], strides = [1, 1]} : vector<8x64xf32> to vector<8x16xf32>
    %409 = math.tanh %408 : vector<8x16xf32>
    %410 = vector.extract_strided_slice %365 {offsets = [0, 48], sizes = [8, 16], strides = [1, 1]} : vector<8x64xf32> to vector<8x16xf32>
    %cst_121 = arith.constant 0.000000e+00 : f32
    %411 = vector.broadcast %cst_121 : f32 to vector<8x16xf32>
    %412 = arith.subf %411, %410 : vector<8x16xf32>
    %413 = math.exp %412 : vector<8x16xf32>
    %cst_122 = arith.constant 1.000000e+00 : f32
    %414 = vector.broadcast %cst_122 : f32 to vector<8x16xf32>
    %415 = arith.addf %414, %413 : vector<8x16xf32>
    %416 = tpu.reciprocal %415 {approx = true} : vector<8x16xf32> -> vector<8x16xf32>
    %417 = arith.mulf %407, %336 : vector<8x16xf32>
    %418 = arith.mulf %400, %409 : vector<8x16xf32>
    %419 = arith.addf %417, %418 : vector<8x16xf32>
    %420 = math.tanh %419 : vector<8x16xf32>
    %421 = arith.mulf %416, %420 : vector<8x16xf32>
    %422 = arith.truncf %393 : vector<8x16xf32> to vector<8x16xbf16>
    %423 = arith.index_cast %c4_i32 : i32 to index
    %c0_123 = arith.constant 0 : index
    %c0_124 = arith.constant 0 : index
    %424 = vector.load %arg6[%423, %c0_123, %c0_124] : memref<8x8x32xbf16, #tpu.memory_space<vmem>>, vector<1x8x16xbf16>
    %425 = vector.shape_cast %424 : vector<1x8x16xbf16> to vector<8x16xbf16>
    %426 = vector.shape_cast %422 : vector<8x16xbf16> to vector<1x8x16xbf16>
    tpu.vector_store %arg6[%423, %c0_123, %c0_124], %426 {strides = array<i32>} : memref<8x8x32xbf16, #tpu.memory_space<vmem>>, vector<1x8x16xbf16>,
    %427 = arith.truncf %421 : vector<8x16xf32> to vector<8x16xbf16>
    %428 = arith.index_cast %349 : i32 to index
    %c0_125 = arith.constant 0 : index
    %c16_126 = arith.constant 16 : index
    %429 = vector.load %arg6[%428, %c0_125, %c16_126] : memref<8x8x32xbf16, #tpu.memory_space<vmem>>, vector<1x8x16xbf16>
    %430 = vector.shape_cast %429 : vector<1x8x16xbf16> to vector<8x16xbf16>
    %431 = vector.shape_cast %427 : vector<8x16xbf16> to vector<1x8x16xbf16>
    tpu.vector_store %arg6[%428, %c0_125, %c16_126], %431 {strides = array<i32>} : memref<8x8x32xbf16, #tpu.memory_space<vmem>>, vector<1x8x16xbf16>,
    %c5_i32 = arith.constant 5 : i32
    %c7_i32_127 = arith.constant 7 : i32
    %432 = arith.subi %c7_i32_127, %c5_i32 : i32
    %c8_i32_128 = arith.constant 8 : i32
    %433 = arith.muli %c5_i32, %c8_i32_128 : i32
    %434 = tpu.assume_multiple %433, 8 : i32
    %c8_i32_129 = arith.constant 8 : i32
    %435 = arith.muli %432, %c8_i32_129 : i32
    %436 = tpu.assume_multiple %435, 8 : i32
    %437 = arith.index_cast %434 : i32 to index
    %c0_130 = arith.constant 0 : index
    %438 = vector.load %arg9[%437, %c0_130] : memref<64x64xbf16, #tpu.memory_space<vmem>>, vector<8x64xbf16>
    %439 = arith.extf %438 : vector<8x64xbf16> to vector<8x64xf32>
    %440 = arith.truncf %393 : vector<8x16xf32> to vector<8x16xbf16>
    %cst_131 = arith.constant dense<0.000000e+00> : vector<8x64xf32>
    %441 = tpu.matmul %440, %14, %cst_131 {dimension_numbers = #tpu.dot_dimension_numbers<[1], [0], [0], [1], [0, 0, 1, 1], [], []>} : vector<8x16xbf16>, vector<16x64xbf16>, vector<8x64xf32> -> vector<8x64xf32>
    %442 = arith.addf %439, %441 : vector<8x64xf32>
    %443 = arith.index_cast %436 : i32 to index
    %c0_132 = arith.constant 0 : index
    %444 = vector.load %arg10[%443, %c0_132] : memref<64x64xbf16, #tpu.memory_space<vmem>>, vector<8x64xbf16>
    %445 = arith.extf %444 : vector<8x64xbf16> to vector<8x64xf32>
    %446 = arith.truncf %421 : vector<8x16xf32> to vector<8x16xbf16>
    %cst_133 = arith.constant dense<0.000000e+00> : vector<8x64xf32>
    %447 = tpu.matmul %446, %15, %cst_133 {dimension_numbers = #tpu.dot_dimension_numbers<[1], [0], [0], [1], [0, 0, 1, 1], [], []>} : vector<8x16xbf16>, vector<16x64xbf16>, vector<8x64xf32> -> vector<8x64xf32>
    %448 = arith.addf %445, %447 : vector<8x64xf32>
    %449 = vector.extract_strided_slice %442 {offsets = [0, 0], sizes = [8, 16], strides = [1, 1]} : vector<8x64xf32> to vector<8x16xf32>
    %cst_134 = arith.constant 0.000000e+00 : f32
    %450 = vector.broadcast %cst_134 : f32 to vector<8x16xf32>
    %451 = arith.subf %450, %449 : vector<8x16xf32>
    %452 = math.exp %451 : vector<8x16xf32>
    %cst_135 = arith.constant 1.000000e+00 : f32
    %453 = vector.broadcast %cst_135 : f32 to vector<8x16xf32>
    %454 = arith.addf %453, %452 : vector<8x16xf32>
    %455 = tpu.reciprocal %454 {approx = true} : vector<8x16xf32> -> vector<8x16xf32>
    %456 = vector.extract_strided_slice %442 {offsets = [0, 16], sizes = [8, 16], strides = [1, 1]} : vector<8x64xf32> to vector<8x16xf32>
    %cst_136 = arith.constant 0.000000e+00 : f32
    %457 = vector.broadcast %cst_136 : f32 to vector<8x16xf32>
    %458 = arith.subf %457, %456 : vector<8x16xf32>
    %459 = math.exp %458 : vector<8x16xf32>
    %cst_137 = arith.constant 1.000000e+00 : f32
    %460 = vector.broadcast %cst_137 : f32 to vector<8x16xf32>
    %461 = arith.addf %460, %459 : vector<8x16xf32>
    %462 = tpu.reciprocal %461 {approx = true} : vector<8x16xf32> -> vector<8x16xf32>
    %463 = vector.extract_strided_slice %442 {offsets = [0, 32], sizes = [8, 16], strides = [1, 1]} : vector<8x64xf32> to vector<8x16xf32>
    %464 = math.tanh %463 : vector<8x16xf32>
    %465 = vector.extract_strided_slice %442 {offsets = [0, 48], sizes = [8, 16], strides = [1, 1]} : vector<8x64xf32> to vector<8x16xf32>
    %cst_138 = arith.constant 0.000000e+00 : f32
    %466 = vector.broadcast %cst_138 : f32 to vector<8x16xf32>
    %467 = arith.subf %466, %465 : vector<8x16xf32>
    %468 = math.exp %467 : vector<8x16xf32>
    %cst_139 = arith.constant 1.000000e+00 : f32
    %469 = vector.broadcast %cst_139 : f32 to vector<8x16xf32>
    %470 = arith.addf %469, %468 : vector<8x16xf32>
    %471 = tpu.reciprocal %470 {approx = true} : vector<8x16xf32> -> vector<8x16xf32>
    %472 = arith.mulf %462, %391 : vector<8x16xf32>
    %473 = arith.mulf %455, %464 : vector<8x16xf32>
    %474 = arith.addf %472, %473 : vector<8x16xf32>
    %475 = math.tanh %474 : vector<8x16xf32>
    %476 = arith.mulf %471, %475 : vector<8x16xf32>
    %477 = vector.extract_strided_slice %448 {offsets = [0, 0], sizes = [8, 16], strides = [1, 1]} : vector<8x64xf32> to vector<8x16xf32>
    %cst_140 = arith.constant 0.000000e+00 : f32
    %478 = vector.broadcast %cst_140 : f32 to vector<8x16xf32>
    %479 = arith.subf %478, %477 : vector<8x16xf32>
    %480 = math.exp %479 : vector<8x16xf32>
    %cst_141 = arith.constant 1.000000e+00 : f32
    %481 = vector.broadcast %cst_141 : f32 to vector<8x16xf32>
    %482 = arith.addf %481, %480 : vector<8x16xf32>
    %483 = tpu.reciprocal %482 {approx = true} : vector<8x16xf32> -> vector<8x16xf32>
    %484 = vector.extract_strided_slice %448 {offsets = [0, 16], sizes = [8, 16], strides = [1, 1]} : vector<8x64xf32> to vector<8x16xf32>
    %cst_142 = arith.constant 0.000000e+00 : f32
    %485 = vector.broadcast %cst_142 : f32 to vector<8x16xf32>
    %486 = arith.subf %485, %484 : vector<8x16xf32>
    %487 = math.exp %486 : vector<8x16xf32>
    %cst_143 = arith.constant 1.000000e+00 : f32
    %488 = vector.broadcast %cst_143 : f32 to vector<8x16xf32>
    %489 = arith.addf %488, %487 : vector<8x16xf32>
    %490 = tpu.reciprocal %489 {approx = true} : vector<8x16xf32> -> vector<8x16xf32>
    %491 = vector.extract_strided_slice %448 {offsets = [0, 32], sizes = [8, 16], strides = [1, 1]} : vector<8x64xf32> to vector<8x16xf32>
    %492 = math.tanh %491 : vector<8x16xf32>
    %493 = vector.extract_strided_slice %448 {offsets = [0, 48], sizes = [8, 16], strides = [1, 1]} : vector<8x64xf32> to vector<8x16xf32>
    %cst_144 = arith.constant 0.000000e+00 : f32
    %494 = vector.broadcast %cst_144 : f32 to vector<8x16xf32>
    %495 = arith.subf %494, %493 : vector<8x16xf32>
    %496 = math.exp %495 : vector<8x16xf32>
    %cst_145 = arith.constant 1.000000e+00 : f32
    %497 = vector.broadcast %cst_145 : f32 to vector<8x16xf32>
    %498 = arith.addf %497, %496 : vector<8x16xf32>
    %499 = tpu.reciprocal %498 {approx = true} : vector<8x16xf32> -> vector<8x16xf32>
    %500 = arith.mulf %490, %419 : vector<8x16xf32>
    %501 = arith.mulf %483, %492 : vector<8x16xf32>
    %502 = arith.addf %500, %501 : vector<8x16xf32>
    %503 = math.tanh %502 : vector<8x16xf32>
    %504 = arith.mulf %499, %503 : vector<8x16xf32>
    %505 = arith.truncf %476 : vector<8x16xf32> to vector<8x16xbf16>
    %506 = arith.index_cast %c5_i32 : i32 to index
    %c0_146 = arith.constant 0 : index
    %c0_147 = arith.constant 0 : index
    %507 = vector.load %arg6[%506, %c0_146, %c0_147] : memref<8x8x32xbf16, #tpu.memory_space<vmem>>, vector<1x8x16xbf16>
    %508 = vector.shape_cast %507 : vector<1x8x16xbf16> to vector<8x16xbf16>
    %509 = vector.shape_cast %505 : vector<8x16xbf16> to vector<1x8x16xbf16>
    tpu.vector_store %arg6[%506, %c0_146, %c0_147], %509 {strides = array<i32>} : memref<8x8x32xbf16, #tpu.memory_space<vmem>>, vector<1x8x16xbf16>,
    %510 = arith.truncf %504 : vector<8x16xf32> to vector<8x16xbf16>
    %511 = arith.index_cast %432 : i32 to index
    %c0_148 = arith.constant 0 : index
    %c16_149 = arith.constant 16 : index
    %512 = vector.load %arg6[%511, %c0_148, %c16_149] : memref<8x8x32xbf16, #tpu.memory_space<vmem>>, vector<1x8x16xbf16>
    %513 = vector.shape_cast %512 : vector<1x8x16xbf16> to vector<8x16xbf16>
    %514 = vector.shape_cast %510 : vector<8x16xbf16> to vector<1x8x16xbf16>
    tpu.vector_store %arg6[%511, %c0_148, %c16_149], %514 {strides = array<i32>} : memref<8x8x32xbf16, #tpu.memory_space<vmem>>, vector<1x8x16xbf16>,
    %c6_i32 = arith.constant 6 : i32
    %c7_i32_150 = arith.constant 7 : i32
    %515 = arith.subi %c7_i32_150, %c6_i32 : i32
    %c8_i32_151 = arith.constant 8 : i32
    %516 = arith.muli %c6_i32, %c8_i32_151 : i32
    %517 = tpu.assume_multiple %516, 8 : i32
    %c8_i32_152 = arith.constant 8 : i32
    %518 = arith.muli %515, %c8_i32_152 : i32
    %519 = tpu.assume_multiple %518, 8 : i32
    %520 = arith.index_cast %517 : i32 to index
    %c0_153 = arith.constant 0 : index
    %521 = vector.load %arg9[%520, %c0_153] : memref<64x64xbf16, #tpu.memory_space<vmem>>, vector<8x64xbf16>
    %522 = arith.extf %521 : vector<8x64xbf16> to vector<8x64xf32>
    %523 = arith.truncf %476 : vector<8x16xf32> to vector<8x16xbf16>
    %cst_154 = arith.constant dense<0.000000e+00> : vector<8x64xf32>
    %524 = tpu.matmul %523, %14, %cst_154 {dimension_numbers = #tpu.dot_dimension_numbers<[1], [0], [0], [1], [0, 0, 1, 1], [], []>} : vector<8x16xbf16>, vector<16x64xbf16>, vector<8x64xf32> -> vector<8x64xf32>
    %525 = arith.addf %522, %524 : vector<8x64xf32>
    %526 = arith.index_cast %519 : i32 to index
    %c0_155 = arith.constant 0 : index
    %527 = vector.load %arg10[%526, %c0_155] : memref<64x64xbf16, #tpu.memory_space<vmem>>, vector<8x64xbf16>
    %528 = arith.extf %527 : vector<8x64xbf16> to vector<8x64xf32>
    %529 = arith.truncf %504 : vector<8x16xf32> to vector<8x16xbf16>
    %cst_156 = arith.constant dense<0.000000e+00> : vector<8x64xf32>
    %530 = tpu.matmul %529, %15, %cst_156 {dimension_numbers = #tpu.dot_dimension_numbers<[1], [0], [0], [1], [0, 0, 1, 1], [], []>} : vector<8x16xbf16>, vector<16x64xbf16>, vector<8x64xf32> -> vector<8x64xf32>
    %531 = arith.addf %528, %530 : vector<8x64xf32>
    %532 = vector.extract_strided_slice %525 {offsets = [0, 0], sizes = [8, 16], strides = [1, 1]} : vector<8x64xf32> to vector<8x16xf32>
    %cst_157 = arith.constant 0.000000e+00 : f32
    %533 = vector.broadcast %cst_157 : f32 to vector<8x16xf32>
    %534 = arith.subf %533, %532 : vector<8x16xf32>
    %535 = math.exp %534 : vector<8x16xf32>
    %cst_158 = arith.constant 1.000000e+00 : f32
    %536 = vector.broadcast %cst_158 : f32 to vector<8x16xf32>
    %537 = arith.addf %536, %535 : vector<8x16xf32>
    %538 = tpu.reciprocal %537 {approx = true} : vector<8x16xf32> -> vector<8x16xf32>
    %539 = vector.extract_strided_slice %525 {offsets = [0, 16], sizes = [8, 16], strides = [1, 1]} : vector<8x64xf32> to vector<8x16xf32>
    %cst_159 = arith.constant 0.000000e+00 : f32
    %540 = vector.broadcast %cst_159 : f32 to vector<8x16xf32>
    %541 = arith.subf %540, %539 : vector<8x16xf32>
    %542 = math.exp %541 : vector<8x16xf32>
    %cst_160 = arith.constant 1.000000e+00 : f32
    %543 = vector.broadcast %cst_160 : f32 to vector<8x16xf32>
    %544 = arith.addf %543, %542 : vector<8x16xf32>
    %545 = tpu.reciprocal %544 {approx = true} : vector<8x16xf32> -> vector<8x16xf32>
    %546 = vector.extract_strided_slice %525 {offsets = [0, 32], sizes = [8, 16], strides = [1, 1]} : vector<8x64xf32> to vector<8x16xf32>
    %547 = math.tanh %546 : vector<8x16xf32>
    %548 = vector.extract_strided_slice %525 {offsets = [0, 48], sizes = [8, 16], strides = [1, 1]} : vector<8x64xf32> to vector<8x16xf32>
    %cst_161 = arith.constant 0.000000e+00 : f32
    %549 = vector.broadcast %cst_161 : f32 to vector<8x16xf32>
    %550 = arith.subf %549, %548 : vector<8x16xf32>
    %551 = math.exp %550 : vector<8x16xf32>
    %cst_162 = arith.constant 1.000000e+00 : f32
    %552 = vector.broadcast %cst_162 : f32 to vector<8x16xf32>
    %553 = arith.addf %552, %551 : vector<8x16xf32>
    %554 = tpu.reciprocal %553 {approx = true} : vector<8x16xf32> -> vector<8x16xf32>
    %555 = arith.mulf %545, %474 : vector<8x16xf32>
    %556 = arith.mulf %538, %547 : vector<8x16xf32>
    %557 = arith.addf %555, %556 : vector<8x16xf32>
    %558 = math.tanh %557 : vector<8x16xf32>
    %559 = arith.mulf %554, %558 : vector<8x16xf32>
    %560 = vector.extract_strided_slice %531 {offsets = [0, 0], sizes = [8, 16], strides = [1, 1]} : vector<8x64xf32> to vector<8x16xf32>
    %cst_163 = arith.constant 0.000000e+00 : f32
    %561 = vector.broadcast %cst_163 : f32 to vector<8x16xf32>
    %562 = arith.subf %561, %560 : vector<8x16xf32>
    %563 = math.exp %562 : vector<8x16xf32>
    %cst_164 = arith.constant 1.000000e+00 : f32
    %564 = vector.broadcast %cst_164 : f32 to vector<8x16xf32>
    %565 = arith.addf %564, %563 : vector<8x16xf32>
    %566 = tpu.reciprocal %565 {approx = true} : vector<8x16xf32> -> vector<8x16xf32>
    %567 = vector.extract_strided_slice %531 {offsets = [0, 16], sizes = [8, 16], strides = [1, 1]} : vector<8x64xf32> to vector<8x16xf32>
    %cst_165 = arith.constant 0.000000e+00 : f32
    %568 = vector.broadcast %cst_165 : f32 to vector<8x16xf32>
    %569 = arith.subf %568, %567 : vector<8x16xf32>
    %570 = math.exp %569 : vector<8x16xf32>
    %cst_166 = arith.constant 1.000000e+00 : f32
    %571 = vector.broadcast %cst_166 : f32 to vector<8x16xf32>
    %572 = arith.addf %571, %570 : vector<8x16xf32>
    %573 = tpu.reciprocal %572 {approx = true} : vector<8x16xf32> -> vector<8x16xf32>
    %574 = vector.extract_strided_slice %531 {offsets = [0, 32], sizes = [8, 16], strides = [1, 1]} : vector<8x64xf32> to vector<8x16xf32>
    %575 = math.tanh %574 : vector<8x16xf32>
    %576 = vector.extract_strided_slice %531 {offsets = [0, 48], sizes = [8, 16], strides = [1, 1]} : vector<8x64xf32> to vector<8x16xf32>
    %cst_167 = arith.constant 0.000000e+00 : f32
    %577 = vector.broadcast %cst_167 : f32 to vector<8x16xf32>
    %578 = arith.subf %577, %576 : vector<8x16xf32>
    %579 = math.exp %578 : vector<8x16xf32>
    %cst_168 = arith.constant 1.000000e+00 : f32
    %580 = vector.broadcast %cst_168 : f32 to vector<8x16xf32>
    %581 = arith.addf %580, %579 : vector<8x16xf32>
    %582 = tpu.reciprocal %581 {approx = true} : vector<8x16xf32> -> vector<8x16xf32>
    %583 = arith.mulf %573, %502 : vector<8x16xf32>
    %584 = arith.mulf %566, %575 : vector<8x16xf32>
    %585 = arith.addf %583, %584 : vector<8x16xf32>
    %586 = math.tanh %585 : vector<8x16xf32>
    %587 = arith.mulf %582, %586 : vector<8x16xf32>
    %588 = arith.truncf %559 : vector<8x16xf32> to vector<8x16xbf16>
    %589 = arith.index_cast %c6_i32 : i32 to index
    %c0_169 = arith.constant 0 : index
    %c0_170 = arith.constant 0 : index
    %590 = vector.load %arg6[%589, %c0_169, %c0_170] : memref<8x8x32xbf16, #tpu.memory_space<vmem>>, vector<1x8x16xbf16>
    %591 = vector.shape_cast %590 : vector<1x8x16xbf16> to vector<8x16xbf16>
    %592 = vector.shape_cast %588 : vector<8x16xbf16> to vector<1x8x16xbf16>
    tpu.vector_store %arg6[%589, %c0_169, %c0_170], %592 {strides = array<i32>} : memref<8x8x32xbf16, #tpu.memory_space<vmem>>, vector<1x8x16xbf16>,
    %593 = arith.truncf %587 : vector<8x16xf32> to vector<8x16xbf16>
    %594 = arith.index_cast %515 : i32 to index
    %c0_171 = arith.constant 0 : index
    %c16_172 = arith.constant 16 : index
    %595 = vector.load %arg6[%594, %c0_171, %c16_172] : memref<8x8x32xbf16, #tpu.memory_space<vmem>>, vector<1x8x16xbf16>
    %596 = vector.shape_cast %595 : vector<1x8x16xbf16> to vector<8x16xbf16>
    %597 = vector.shape_cast %593 : vector<8x16xbf16> to vector<1x8x16xbf16>
    tpu.vector_store %arg6[%594, %c0_171, %c16_172], %597 {strides = array<i32>} : memref<8x8x32xbf16, #tpu.memory_space<vmem>>, vector<1x8x16xbf16>,
    %c7_i32_173 = arith.constant 7 : i32
    %c7_i32_174 = arith.constant 7 : i32
    %598 = arith.subi %c7_i32_174, %c7_i32_173 : i32
    %c8_i32_175 = arith.constant 8 : i32
    %599 = arith.muli %c7_i32_173, %c8_i32_175 : i32
    %600 = tpu.assume_multiple %599, 8 : i32
    %c8_i32_176 = arith.constant 8 : i32
    %601 = arith.muli %598, %c8_i32_176 : i32
    %602 = tpu.assume_multiple %601, 8 : i32
    %603 = arith.index_cast %600 : i32 to index
    %c0_177 = arith.constant 0 : index
    %604 = vector.load %arg9[%603, %c0_177] : memref<64x64xbf16, #tpu.memory_space<vmem>>, vector<8x64xbf16>
    %605 = arith.extf %604 : vector<8x64xbf16> to vector<8x64xf32>
    %606 = arith.truncf %559 : vector<8x16xf32> to vector<8x16xbf16>
    %cst_178 = arith.constant dense<0.000000e+00> : vector<8x64xf32>
    %607 = tpu.matmul %606, %14, %cst_178 {dimension_numbers = #tpu.dot_dimension_numbers<[1], [0], [0], [1], [0, 0, 1, 1], [], []>} : vector<8x16xbf16>, vector<16x64xbf16>, vector<8x64xf32> -> vector<8x64xf32>
    %608 = arith.addf %605, %607 : vector<8x64xf32>
    %609 = arith.index_cast %602 : i32 to index
    %c0_179 = arith.constant 0 : index
    %610 = vector.load %arg10[%609, %c0_179] : memref<64x64xbf16, #tpu.memory_space<vmem>>, vector<8x64xbf16>
    %611 = arith.extf %610 : vector<8x64xbf16> to vector<8x64xf32>
    %612 = arith.truncf %587 : vector<8x16xf32> to vector<8x16xbf16>
    %cst_180 = arith.constant dense<0.000000e+00> : vector<8x64xf32>
    %613 = tpu.matmul %612, %15, %cst_180 {dimension_numbers = #tpu.dot_dimension_numbers<[1], [0], [0], [1], [0, 0, 1, 1], [], []>} : vector<8x16xbf16>, vector<16x64xbf16>, vector<8x64xf32> -> vector<8x64xf32>
    %614 = arith.addf %611, %613 : vector<8x64xf32>
    %615 = vector.extract_strided_slice %608 {offsets = [0, 0], sizes = [8, 16], strides = [1, 1]} : vector<8x64xf32> to vector<8x16xf32>
    %cst_181 = arith.constant 0.000000e+00 : f32
    %616 = vector.broadcast %cst_181 : f32 to vector<8x16xf32>
    %617 = arith.subf %616, %615 : vector<8x16xf32>
    %618 = math.exp %617 : vector<8x16xf32>
    %cst_182 = arith.constant 1.000000e+00 : f32
    %619 = vector.broadcast %cst_182 : f32 to vector<8x16xf32>
    %620 = arith.addf %619, %618 : vector<8x16xf32>
    %621 = tpu.reciprocal %620 {approx = true} : vector<8x16xf32> -> vector<8x16xf32>
    %622 = vector.extract_strided_slice %608 {offsets = [0, 16], sizes = [8, 16], strides = [1, 1]} : vector<8x64xf32> to vector<8x16xf32>
    %cst_183 = arith.constant 0.000000e+00 : f32
    %623 = vector.broadcast %cst_183 : f32 to vector<8x16xf32>
    %624 = arith.subf %623, %622 : vector<8x16xf32>
    %625 = math.exp %624 : vector<8x16xf32>
    %cst_184 = arith.constant 1.000000e+00 : f32
    %626 = vector.broadcast %cst_184 : f32 to vector<8x16xf32>
    %627 = arith.addf %626, %625 : vector<8x16xf32>
    %628 = tpu.reciprocal %627 {approx = true} : vector<8x16xf32> -> vector<8x16xf32>
    %629 = vector.extract_strided_slice %608 {offsets = [0, 32], sizes = [8, 16], strides = [1, 1]} : vector<8x64xf32> to vector<8x16xf32>
    %630 = math.tanh %629 : vector<8x16xf32>
    %631 = vector.extract_strided_slice %608 {offsets = [0, 48], sizes = [8, 16], strides = [1, 1]} : vector<8x64xf32> to vector<8x16xf32>
    %cst_185 = arith.constant 0.000000e+00 : f32
    %632 = vector.broadcast %cst_185 : f32 to vector<8x16xf32>
    %633 = arith.subf %632, %631 : vector<8x16xf32>
    %634 = math.exp %633 : vector<8x16xf32>
    %cst_186 = arith.constant 1.000000e+00 : f32
    %635 = vector.broadcast %cst_186 : f32 to vector<8x16xf32>
    %636 = arith.addf %635, %634 : vector<8x16xf32>
    %637 = tpu.reciprocal %636 {approx = true} : vector<8x16xf32> -> vector<8x16xf32>
    %638 = arith.mulf %628, %557 : vector<8x16xf32>
    %639 = arith.mulf %621, %630 : vector<8x16xf32>
    %640 = arith.addf %638, %639 : vector<8x16xf32>
    %641 = math.tanh %640 : vector<8x16xf32>
    %642 = arith.mulf %637, %641 : vector<8x16xf32>
    %643 = vector.extract_strided_slice %614 {offsets = [0, 0], sizes = [8, 16], strides = [1, 1]} : vector<8x64xf32> to vector<8x16xf32>
    %cst_187 = arith.constant 0.000000e+00 : f32
    %644 = vector.broadcast %cst_187 : f32 to vector<8x16xf32>
    %645 = arith.subf %644, %643 : vector<8x16xf32>
    %646 = math.exp %645 : vector<8x16xf32>
    %cst_188 = arith.constant 1.000000e+00 : f32
    %647 = vector.broadcast %cst_188 : f32 to vector<8x16xf32>
    %648 = arith.addf %647, %646 : vector<8x16xf32>
    %649 = tpu.reciprocal %648 {approx = true} : vector<8x16xf32> -> vector<8x16xf32>
    %650 = vector.extract_strided_slice %614 {offsets = [0, 16], sizes = [8, 16], strides = [1, 1]} : vector<8x64xf32> to vector<8x16xf32>
    %cst_189 = arith.constant 0.000000e+00 : f32
    %651 = vector.broadcast %cst_189 : f32 to vector<8x16xf32>
    %652 = arith.subf %651, %650 : vector<8x16xf32>
    %653 = math.exp %652 : vector<8x16xf32>
    %cst_190 = arith.constant 1.000000e+00 : f32
    %654 = vector.broadcast %cst_190 : f32 to vector<8x16xf32>
    %655 = arith.addf %654, %653 : vector<8x16xf32>
    %656 = tpu.reciprocal %655 {approx = true} : vector<8x16xf32> -> vector<8x16xf32>
    %657 = vector.extract_strided_slice %614 {offsets = [0, 32], sizes = [8, 16], strides = [1, 1]} : vector<8x64xf32> to vector<8x16xf32>
    %658 = math.tanh %657 : vector<8x16xf32>
    %659 = vector.extract_strided_slice %614 {offsets = [0, 48], sizes = [8, 16], strides = [1, 1]} : vector<8x64xf32> to vector<8x16xf32>
    %cst_191 = arith.constant 0.000000e+00 : f32
    %660 = vector.broadcast %cst_191 : f32 to vector<8x16xf32>
    %661 = arith.subf %660, %659 : vector<8x16xf32>
    %662 = math.exp %661 : vector<8x16xf32>
    %cst_192 = arith.constant 1.000000e+00 : f32
    %663 = vector.broadcast %cst_192 : f32 to vector<8x16xf32>
    %664 = arith.addf %663, %662 : vector<8x16xf32>
    %665 = tpu.reciprocal %664 {approx = true} : vector<8x16xf32> -> vector<8x16xf32>
    %666 = arith.mulf %656, %585 : vector<8x16xf32>
    %667 = arith.mulf %649, %658 : vector<8x16xf32>
    %668 = arith.addf %666, %667 : vector<8x16xf32>
    %669 = math.tanh %668 : vector<8x16xf32>
    %670 = arith.mulf %665, %669 : vector<8x16xf32>
    %671 = arith.truncf %642 : vector<8x16xf32> to vector<8x16xbf16>
    %672 = arith.index_cast %c7_i32_173 : i32 to index
    %c0_193 = arith.constant 0 : index
    %c0_194 = arith.constant 0 : index
    %673 = vector.load %arg6[%672, %c0_193, %c0_194] : memref<8x8x32xbf16, #tpu.memory_space<vmem>>, vector<1x8x16xbf16>
    %674 = vector.shape_cast %673 : vector<1x8x16xbf16> to vector<8x16xbf16>
    %675 = vector.shape_cast %671 : vector<8x16xbf16> to vector<1x8x16xbf16>
    tpu.vector_store %arg6[%672, %c0_193, %c0_194], %675 {strides = array<i32>} : memref<8x8x32xbf16, #tpu.memory_space<vmem>>, vector<1x8x16xbf16>,
    %676 = arith.truncf %670 : vector<8x16xf32> to vector<8x16xbf16>
    %677 = arith.index_cast %598 : i32 to index
    %c0_195 = arith.constant 0 : index
    %c16_196 = arith.constant 16 : index
    %678 = vector.load %arg6[%677, %c0_195, %c16_196] : memref<8x8x32xbf16, #tpu.memory_space<vmem>>, vector<1x8x16xbf16>
    %679 = vector.shape_cast %678 : vector<1x8x16xbf16> to vector<8x16xbf16>
    %680 = vector.shape_cast %676 : vector<8x16xbf16> to vector<1x8x16xbf16>
    tpu.vector_store %arg6[%677, %c0_195, %c16_196], %680 {strides = array<i32>} : memref<8x8x32xbf16, #tpu.memory_space<vmem>>, vector<1x8x16xbf16>,
    %c8_i32_197 = arith.constant 8 : i32
    %c0_198 = arith.constant 0 : index
    %c0_199 = arith.constant 0 : index
    %681 = vector.load %arg7[%c0_198, %c0_199] : memref<8x32xf32, #tpu.memory_space<vmem>>, vector<8x16xf32>
    tpu.vector_store %arg7[%c0_198, %c0_199], %642 {strides = array<i32>} : memref<8x32xf32, #tpu.memory_space<vmem>>, vector<8x16xf32>,
    %c0_200 = arith.constant 0 : index
    %c16_201 = arith.constant 16 : index
    %682 = vector.load %arg7[%c0_200, %c16_201] : memref<8x32xf32, #tpu.memory_space<vmem>>, vector<8x16xf32>
    tpu.vector_store %arg7[%c0_200, %c16_201], %670 {strides = array<i32>} : memref<8x32xf32, #tpu.memory_space<vmem>>, vector<8x16xf32>,
    %c0_202 = arith.constant 0 : index
    %c0_203 = arith.constant 0 : index
    %683 = vector.load %arg8[%c0_202, %c0_203] : memref<8x32xf32, #tpu.memory_space<vmem>>, vector<8x16xf32>
    tpu.vector_store %arg8[%c0_202, %c0_203], %640 {strides = array<i32>} : memref<8x32xf32, #tpu.memory_space<vmem>>, vector<8x16xf32>,
    %c0_204 = arith.constant 0 : index
    %c16_205 = arith.constant 16 : index
    %684 = vector.load %arg8[%c0_204, %c16_205] : memref<8x32xf32, #tpu.memory_space<vmem>>, vector<8x16xf32>
    tpu.vector_store %arg8[%c0_204, %c16_205], %668 {strides = array<i32>} : memref<8x32xf32, #tpu.memory_space<vmem>>, vector<8x16xf32>,
    return
  }
  func.func @transform_0(%arg0: i32) -> (i32, i32, i32) {
    %c0_i32 = arith.constant 0 : i32
    %c0_i32_0 = arith.constant 0 : i32
    %c0_i32_1 = arith.constant 0 : i32
    return %c0_i32, %arg0, %c0_i32_0 : i32, i32, i32
  }
  func.func @transform_1(%arg0: i32) -> (i32, i32) {
    %c0_i32 = arith.constant 0 : i32
    %c0_i32_0 = arith.constant 0 : i32
    %c0_i32_1 = arith.constant 0 : i32
    return %c0_i32, %c0_i32_0 : i32, i32
  }
  func.func @transform_2(%arg0: i32) -> (i32, i32) {
    %c0_i32 = arith.constant 0 : i32
    %c0_i32_0 = arith.constant 0 : i32
    %c0_i32_1 = arith.constant 0 : i32
    return %c0_i32, %c0_i32_0 : i32, i32
  }
  func.func @transform_3(%arg0: i32) -> (i32, i32) {
    %c0_i32 = arith.constant 0 : i32
    %c0_i32_0 = arith.constant 0 : i32
    %c0_i32_1 = arith.constant 0 : i32
    return %c0_i32, %c0_i32_0 : i32, i32
  }
  func.func @transform_4(%arg0: i32) -> (i32, i32) {
    %c0_i32 = arith.constant 0 : i32
    %c0_i32_0 = arith.constant 0 : i32
    %c0_i32_1 = arith.constant 0 : i32
    return %c0_i32, %c0_i32_0 : i32, i32
  }
  func.func @transform_5(%arg0: i32) -> (i32, i32, i32) {
    %c0_i32 = arith.constant 0 : i32
    %c0_i32_0 = arith.constant 0 : i32
    %c0_i32_1 = arith.constant 0 : i32
    return %c0_i32, %arg0, %c0_i32_0 : i32, i32, i32
  }
  func.func @transform_6(%arg0: i32) -> (i32, i32) {
    %c0_i32 = arith.constant 0 : i32
    %c0_i32_0 = arith.constant 0 : i32
    return %arg0, %c0_i32 : i32, i32
  }
  func.func @transform_7(%arg0: i32) -> (i32, i32) {
    %c0_i32 = arith.constant 0 : i32
    %c0_i32_0 = arith.constant 0 : i32
    return %arg0, %c0_i32 : i32, i32
  }
}

module attributes {stable_mosaic.version = 11 : i64} {
  func.func @_bilstm_kernel(%arg0: i32, %arg1: memref<8x8x32xbf16, #tpu.memory_space<vmem>>, %arg2: memref<32x128xbf16, #tpu.memory_space<vmem>>, %arg3: memref<16x64xbf16, #tpu.memory_space<vmem>>, %arg4: memref<16x64xbf16, #tpu.memory_space<vmem>>, %arg5: memref<1x128xf32, #tpu.memory_space<vmem>>, %arg6: memref<8x8x32xbf16, #tpu.memory_space<vmem>>, %arg7: memref<8x32xf32, #tpu.memory_space<vmem>>, %arg8: memref<8x32xf32, #tpu.memory_space<vmem>>, %arg9: memref<64x64xbf16, #tpu.memory_space<vmem>>, %arg10: memref<64x64xbf16, #tpu.memory_space<vmem>>) attributes {dimension_semantics = [#tpu.dimension_semantics<parallel>], iteration_bounds = array<i64: 1>, scalar_prefetch = 0 : i64, scratch_operands = 2 : i64, tpu.core_type = #tpu.core_type<tc>, window_params = [{transform_indices = @transform_0, window_bounds = array<i64: 8, 8, 32>}, {pipeline_mode = #tpu.pipeline_mode<synchronous>, transform_indices = @transform_1, window_bounds = array<i64: 32, 128>}, {pipeline_mode = #tpu.pipeline_mode<synchronous>, transform_indices = @transform_2, window_bounds = array<i64: 16, 64>}, {pipeline_mode = #tpu.pipeline_mode<synchronous>, transform_indices = @transform_3, window_bounds = array<i64: 16, 64>}, {pipeline_mode = #tpu.pipeline_mode<synchronous>, transform_indices = @transform_4, window_bounds = array<i64: 1, 128>}, {transform_indices = @transform_5, window_bounds = array<i64: 8, 8, 32>}, {transform_indices = @transform_6, window_bounds = array<i64: 8, 32>}, {transform_indices = @transform_7, window_bounds = array<i64: 8, 32>}]} {
    %c0 = arith.constant 0 : index
    %c0_0 = arith.constant 0 : index
    %c0_1 = arith.constant 0 : index
    %0 = vector.load %arg1[%c0, %c0_0, %c0_1] : memref<8x8x32xbf16, #tpu.memory_space<vmem>>, vector<8x8x32xbf16>
    %1 = vector.shape_cast %0 : vector<8x8x32xbf16> to vector<64x32xbf16>
    %c0_2 = arith.constant 0 : index
    %c0_3 = arith.constant 0 : index
    %2 = vector.load %arg2[%c0_2, %c0_3] : memref<32x128xbf16, #tpu.memory_space<vmem>>, vector<32x128xbf16>
    %cst = arith.constant dense<0.000000e+00> : vector<64x128xf32>
    %3 = tpu.matmul %1, %2, %cst {dimension_numbers = #tpu.dot_dimension_numbers<[1], [0], [0], [1], [0, 0, 1, 1], [], []>} : vector<64x32xbf16>, vector<32x128xbf16>, vector<64x128xf32> -> vector<64x128xf32>
    %c0_4 = arith.constant 0 : index
    %c0_5 = arith.constant 0 : index
    %4 = vector.load %arg5[%c0_4, %c0_5] : memref<1x128xf32, #tpu.memory_space<vmem>>, vector<1x128xf32>
    %5 = vector.broadcast %4 : vector<1x128xf32> to vector<64x128xf32>
    %6 = arith.addf %3, %5 : vector<64x128xf32>
    %7 = vector.extract_strided_slice %6 {offsets = [0, 0], sizes = [64, 64], strides = [1, 1]} : vector<64x128xf32> to vector<64x64xf32>
    %8 = arith.truncf %7 : vector<64x64xf32> to vector<64x64xbf16>
    %c0_6 = arith.constant 0 : index
    %c0_7 = arith.constant 0 : index
    %9 = vector.load %arg9[%c0_6, %c0_7] : memref<64x64xbf16, #tpu.memory_space<vmem>>, vector<64x64xbf16>
    tpu.vector_store %arg9[%c0_6, %c0_7], %8 {strides = array<i32>} : memref<64x64xbf16, #tpu.memory_space<vmem>>, vector<64x64xbf16>,
    %10 = vector.extract_strided_slice %6 {offsets = [0, 64], sizes = [64, 64], strides = [1, 1]} : vector<64x128xf32> to vector<64x64xf32>
    %11 = arith.truncf %10 : vector<64x64xf32> to vector<64x64xbf16>
    %c0_8 = arith.constant 0 : index
    %c0_9 = arith.constant 0 : index
    %12 = vector.load %arg10[%c0_8, %c0_9] : memref<64x64xbf16, #tpu.memory_space<vmem>>, vector<64x64xbf16>
    tpu.vector_store %arg10[%c0_8, %c0_9], %11 {strides = array<i32>} : memref<64x64xbf16, #tpu.memory_space<vmem>>, vector<64x64xbf16>,
    %c0_10 = arith.constant 0 : index
    %c0_11 = arith.constant 0 : index
    %13 = vector.load %arg3[%c0_10, %c0_11] : memref<16x64xbf16, #tpu.memory_space<vmem>>, vector<16x64xbf16>
    %c0_12 = arith.constant 0 : index
    %c0_13 = arith.constant 0 : index
    %14 = vector.load %arg4[%c0_12, %c0_13] : memref<16x64xbf16, #tpu.memory_space<vmem>>, vector<16x64xbf16>
    %cst_14 = arith.constant 0.000000e+00 : f32
    %15 = vector.broadcast %cst_14 : f32 to vector<8x16xf32>
    %c0_i32 = arith.constant 0 : i32
    %c7_i32 = arith.constant 7 : i32
    %16 = arith.subi %c7_i32, %c0_i32 : i32
    %c8_i32 = arith.constant 8 : i32
    %17 = arith.muli %c0_i32, %c8_i32 : i32
    %18 = tpu.assume_multiple %17, 8 : i32
    %c8_i32_15 = arith.constant 8 : i32
    %19 = arith.muli %16, %c8_i32_15 : i32
    %20 = tpu.assume_multiple %19, 8 : i32
    %21 = arith.index_cast %18 : i32 to index
    %c0_16 = arith.constant 0 : index
    %22 = vector.load %arg9[%21, %c0_16] : memref<64x64xbf16, #tpu.memory_space<vmem>>, vector<8x64xbf16>
    %23 = arith.extf %22 : vector<8x64xbf16> to vector<8x64xf32>
    %24 = arith.truncf %15 : vector<8x16xf32> to vector<8x16xbf16>
    %cst_17 = arith.constant dense<0.000000e+00> : vector<8x64xf32>
    %25 = tpu.matmul %24, %13, %cst_17 {dimension_numbers = #tpu.dot_dimension_numbers<[1], [0], [0], [1], [0, 0, 1, 1], [], []>} : vector<8x16xbf16>, vector<16x64xbf16>, vector<8x64xf32> -> vector<8x64xf32>
    %26 = arith.addf %23, %25 : vector<8x64xf32>
    %27 = arith.index_cast %20 : i32 to index
    %c0_18 = arith.constant 0 : index
    %28 = vector.load %arg10[%27, %c0_18] : memref<64x64xbf16, #tpu.memory_space<vmem>>, vector<8x64xbf16>
    %29 = arith.extf %28 : vector<8x64xbf16> to vector<8x64xf32>
    %30 = arith.truncf %15 : vector<8x16xf32> to vector<8x16xbf16>
    %cst_19 = arith.constant dense<0.000000e+00> : vector<8x64xf32>
    %31 = tpu.matmul %30, %14, %cst_19 {dimension_numbers = #tpu.dot_dimension_numbers<[1], [0], [0], [1], [0, 0, 1, 1], [], []>} : vector<8x16xbf16>, vector<16x64xbf16>, vector<8x64xf32> -> vector<8x64xf32>
    %32 = arith.addf %29, %31 : vector<8x64xf32>
    %33 = vector.extract_strided_slice %26 {offsets = [0, 0], sizes = [8, 16], strides = [1, 1]} : vector<8x64xf32> to vector<8x16xf32>
    %cst_20 = arith.constant 0.000000e+00 : f32
    %34 = vector.broadcast %cst_20 : f32 to vector<8x16xf32>
    %35 = arith.subf %34, %33 : vector<8x16xf32>
    %36 = math.exp %35 : vector<8x16xf32>
    %cst_21 = arith.constant 1.000000e+00 : f32
    %37 = vector.broadcast %cst_21 : f32 to vector<8x16xf32>
    %38 = arith.addf %37, %36 : vector<8x16xf32>
    %39 = tpu.reciprocal %38 {approx = true} : vector<8x16xf32> -> vector<8x16xf32>
    %40 = vector.extract_strided_slice %26 {offsets = [0, 16], sizes = [8, 16], strides = [1, 1]} : vector<8x64xf32> to vector<8x16xf32>
    %cst_22 = arith.constant 0.000000e+00 : f32
    %41 = vector.broadcast %cst_22 : f32 to vector<8x16xf32>
    %42 = arith.subf %41, %40 : vector<8x16xf32>
    %43 = math.exp %42 : vector<8x16xf32>
    %cst_23 = arith.constant 1.000000e+00 : f32
    %44 = vector.broadcast %cst_23 : f32 to vector<8x16xf32>
    %45 = arith.addf %44, %43 : vector<8x16xf32>
    %46 = tpu.reciprocal %45 {approx = true} : vector<8x16xf32> -> vector<8x16xf32>
    %47 = vector.extract_strided_slice %26 {offsets = [0, 32], sizes = [8, 16], strides = [1, 1]} : vector<8x64xf32> to vector<8x16xf32>
    %48 = math.tanh %47 : vector<8x16xf32>
    %49 = vector.extract_strided_slice %26 {offsets = [0, 48], sizes = [8, 16], strides = [1, 1]} : vector<8x64xf32> to vector<8x16xf32>
    %cst_24 = arith.constant 0.000000e+00 : f32
    %50 = vector.broadcast %cst_24 : f32 to vector<8x16xf32>
    %51 = arith.subf %50, %49 : vector<8x16xf32>
    %52 = math.exp %51 : vector<8x16xf32>
    %cst_25 = arith.constant 1.000000e+00 : f32
    %53 = vector.broadcast %cst_25 : f32 to vector<8x16xf32>
    %54 = arith.addf %53, %52 : vector<8x16xf32>
    %55 = tpu.reciprocal %54 {approx = true} : vector<8x16xf32> -> vector<8x16xf32>
    %56 = arith.mulf %46, %15 : vector<8x16xf32>
    %57 = arith.mulf %39, %48 : vector<8x16xf32>
    %58 = arith.addf %56, %57 : vector<8x16xf32>
    %59 = math.tanh %58 : vector<8x16xf32>
    %60 = arith.mulf %55, %59 : vector<8x16xf32>
    %61 = vector.extract_strided_slice %32 {offsets = [0, 0], sizes = [8, 16], strides = [1, 1]} : vector<8x64xf32> to vector<8x16xf32>
    %cst_26 = arith.constant 0.000000e+00 : f32
    %62 = vector.broadcast %cst_26 : f32 to vector<8x16xf32>
    %63 = arith.subf %62, %61 : vector<8x16xf32>
    %64 = math.exp %63 : vector<8x16xf32>
    %cst_27 = arith.constant 1.000000e+00 : f32
    %65 = vector.broadcast %cst_27 : f32 to vector<8x16xf32>
    %66 = arith.addf %65, %64 : vector<8x16xf32>
    %67 = tpu.reciprocal %66 {approx = true} : vector<8x16xf32> -> vector<8x16xf32>
    %68 = vector.extract_strided_slice %32 {offsets = [0, 16], sizes = [8, 16], strides = [1, 1]} : vector<8x64xf32> to vector<8x16xf32>
    %cst_28 = arith.constant 0.000000e+00 : f32
    %69 = vector.broadcast %cst_28 : f32 to vector<8x16xf32>
    %70 = arith.subf %69, %68 : vector<8x16xf32>
    %71 = math.exp %70 : vector<8x16xf32>
    %cst_29 = arith.constant 1.000000e+00 : f32
    %72 = vector.broadcast %cst_29 : f32 to vector<8x16xf32>
    %73 = arith.addf %72, %71 : vector<8x16xf32>
    %74 = tpu.reciprocal %73 {approx = true} : vector<8x16xf32> -> vector<8x16xf32>
    %75 = vector.extract_strided_slice %32 {offsets = [0, 32], sizes = [8, 16], strides = [1, 1]} : vector<8x64xf32> to vector<8x16xf32>
    %76 = math.tanh %75 : vector<8x16xf32>
    %77 = vector.extract_strided_slice %32 {offsets = [0, 48], sizes = [8, 16], strides = [1, 1]} : vector<8x64xf32> to vector<8x16xf32>
    %cst_30 = arith.constant 0.000000e+00 : f32
    %78 = vector.broadcast %cst_30 : f32 to vector<8x16xf32>
    %79 = arith.subf %78, %77 : vector<8x16xf32>
    %80 = math.exp %79 : vector<8x16xf32>
    %cst_31 = arith.constant 1.000000e+00 : f32
    %81 = vector.broadcast %cst_31 : f32 to vector<8x16xf32>
    %82 = arith.addf %81, %80 : vector<8x16xf32>
    %83 = tpu.reciprocal %82 {approx = true} : vector<8x16xf32> -> vector<8x16xf32>
    %84 = arith.mulf %74, %15 : vector<8x16xf32>
    %85 = arith.mulf %67, %76 : vector<8x16xf32>
    %86 = arith.addf %84, %85 : vector<8x16xf32>
    %87 = math.tanh %86 : vector<8x16xf32>
    %88 = arith.mulf %83, %87 : vector<8x16xf32>
    %89 = arith.truncf %60 : vector<8x16xf32> to vector<8x16xbf16>
    %90 = arith.index_cast %c0_i32 : i32 to index
    %c0_32 = arith.constant 0 : index
    %c0_33 = arith.constant 0 : index
    %91 = vector.load %arg6[%90, %c0_32, %c0_33] : memref<8x8x32xbf16, #tpu.memory_space<vmem>>, vector<1x8x16xbf16>
    %92 = vector.shape_cast %91 : vector<1x8x16xbf16> to vector<8x16xbf16>
    %93 = vector.shape_cast %89 : vector<8x16xbf16> to vector<1x8x16xbf16>
    tpu.vector_store %arg6[%90, %c0_32, %c0_33], %93 {strides = array<i32>} : memref<8x8x32xbf16, #tpu.memory_space<vmem>>, vector<1x8x16xbf16>,
    %94 = arith.truncf %88 : vector<8x16xf32> to vector<8x16xbf16>
    %95 = arith.index_cast %16 : i32 to index
    %c0_34 = arith.constant 0 : index
    %c16 = arith.constant 16 : index
    %96 = vector.load %arg6[%95, %c0_34, %c16] : memref<8x8x32xbf16, #tpu.memory_space<vmem>>, vector<1x8x16xbf16>
    %97 = vector.shape_cast %96 : vector<1x8x16xbf16> to vector<8x16xbf16>
    %98 = vector.shape_cast %94 : vector<8x16xbf16> to vector<1x8x16xbf16>
    tpu.vector_store %arg6[%95, %c0_34, %c16], %98 {strides = array<i32>} : memref<8x8x32xbf16, #tpu.memory_space<vmem>>, vector<1x8x16xbf16>,
    %c1_i32 = arith.constant 1 : i32
    %c7_i32_35 = arith.constant 7 : i32
    %99 = arith.subi %c7_i32_35, %c1_i32 : i32
    %c8_i32_36 = arith.constant 8 : i32
    %100 = arith.muli %c1_i32, %c8_i32_36 : i32
    %101 = tpu.assume_multiple %100, 8 : i32
    %c8_i32_37 = arith.constant 8 : i32
    %102 = arith.muli %99, %c8_i32_37 : i32
    %103 = tpu.assume_multiple %102, 8 : i32
    %104 = arith.index_cast %101 : i32 to index
    %c0_38 = arith.constant 0 : index
    %105 = vector.load %arg9[%104, %c0_38] : memref<64x64xbf16, #tpu.memory_space<vmem>>, vector<8x64xbf16>
    %106 = arith.extf %105 : vector<8x64xbf16> to vector<8x64xf32>
    %107 = arith.truncf %60 : vector<8x16xf32> to vector<8x16xbf16>
    %cst_39 = arith.constant dense<0.000000e+00> : vector<8x64xf32>
    %108 = tpu.matmul %107, %13, %cst_39 {dimension_numbers = #tpu.dot_dimension_numbers<[1], [0], [0], [1], [0, 0, 1, 1], [], []>} : vector<8x16xbf16>, vector<16x64xbf16>, vector<8x64xf32> -> vector<8x64xf32>
    %109 = arith.addf %106, %108 : vector<8x64xf32>
    %110 = arith.index_cast %103 : i32 to index
    %c0_40 = arith.constant 0 : index
    %111 = vector.load %arg10[%110, %c0_40] : memref<64x64xbf16, #tpu.memory_space<vmem>>, vector<8x64xbf16>
    %112 = arith.extf %111 : vector<8x64xbf16> to vector<8x64xf32>
    %113 = arith.truncf %88 : vector<8x16xf32> to vector<8x16xbf16>
    %cst_41 = arith.constant dense<0.000000e+00> : vector<8x64xf32>
    %114 = tpu.matmul %113, %14, %cst_41 {dimension_numbers = #tpu.dot_dimension_numbers<[1], [0], [0], [1], [0, 0, 1, 1], [], []>} : vector<8x16xbf16>, vector<16x64xbf16>, vector<8x64xf32> -> vector<8x64xf32>
    %115 = arith.addf %112, %114 : vector<8x64xf32>
    %116 = vector.extract_strided_slice %109 {offsets = [0, 0], sizes = [8, 16], strides = [1, 1]} : vector<8x64xf32> to vector<8x16xf32>
    %cst_42 = arith.constant 0.000000e+00 : f32
    %117 = vector.broadcast %cst_42 : f32 to vector<8x16xf32>
    %118 = arith.subf %117, %116 : vector<8x16xf32>
    %119 = math.exp %118 : vector<8x16xf32>
    %cst_43 = arith.constant 1.000000e+00 : f32
    %120 = vector.broadcast %cst_43 : f32 to vector<8x16xf32>
    %121 = arith.addf %120, %119 : vector<8x16xf32>
    %122 = tpu.reciprocal %121 {approx = true} : vector<8x16xf32> -> vector<8x16xf32>
    %123 = vector.extract_strided_slice %109 {offsets = [0, 16], sizes = [8, 16], strides = [1, 1]} : vector<8x64xf32> to vector<8x16xf32>
    %cst_44 = arith.constant 0.000000e+00 : f32
    %124 = vector.broadcast %cst_44 : f32 to vector<8x16xf32>
    %125 = arith.subf %124, %123 : vector<8x16xf32>
    %126 = math.exp %125 : vector<8x16xf32>
    %cst_45 = arith.constant 1.000000e+00 : f32
    %127 = vector.broadcast %cst_45 : f32 to vector<8x16xf32>
    %128 = arith.addf %127, %126 : vector<8x16xf32>
    %129 = tpu.reciprocal %128 {approx = true} : vector<8x16xf32> -> vector<8x16xf32>
    %130 = vector.extract_strided_slice %109 {offsets = [0, 32], sizes = [8, 16], strides = [1, 1]} : vector<8x64xf32> to vector<8x16xf32>
    %131 = math.tanh %130 : vector<8x16xf32>
    %132 = vector.extract_strided_slice %109 {offsets = [0, 48], sizes = [8, 16], strides = [1, 1]} : vector<8x64xf32> to vector<8x16xf32>
    %cst_46 = arith.constant 0.000000e+00 : f32
    %133 = vector.broadcast %cst_46 : f32 to vector<8x16xf32>
    %134 = arith.subf %133, %132 : vector<8x16xf32>
    %135 = math.exp %134 : vector<8x16xf32>
    %cst_47 = arith.constant 1.000000e+00 : f32
    %136 = vector.broadcast %cst_47 : f32 to vector<8x16xf32>
    %137 = arith.addf %136, %135 : vector<8x16xf32>
    %138 = tpu.reciprocal %137 {approx = true} : vector<8x16xf32> -> vector<8x16xf32>
    %139 = arith.mulf %129, %58 : vector<8x16xf32>
    %140 = arith.mulf %122, %131 : vector<8x16xf32>
    %141 = arith.addf %139, %140 : vector<8x16xf32>
    %142 = math.tanh %141 : vector<8x16xf32>
    %143 = arith.mulf %138, %142 : vector<8x16xf32>
    %144 = vector.extract_strided_slice %115 {offsets = [0, 0], sizes = [8, 16], strides = [1, 1]} : vector<8x64xf32> to vector<8x16xf32>
    %cst_48 = arith.constant 0.000000e+00 : f32
    %145 = vector.broadcast %cst_48 : f32 to vector<8x16xf32>
    %146 = arith.subf %145, %144 : vector<8x16xf32>
    %147 = math.exp %146 : vector<8x16xf32>
    %cst_49 = arith.constant 1.000000e+00 : f32
    %148 = vector.broadcast %cst_49 : f32 to vector<8x16xf32>
    %149 = arith.addf %148, %147 : vector<8x16xf32>
    %150 = tpu.reciprocal %149 {approx = true} : vector<8x16xf32> -> vector<8x16xf32>
    %151 = vector.extract_strided_slice %115 {offsets = [0, 16], sizes = [8, 16], strides = [1, 1]} : vector<8x64xf32> to vector<8x16xf32>
    %cst_50 = arith.constant 0.000000e+00 : f32
    %152 = vector.broadcast %cst_50 : f32 to vector<8x16xf32>
    %153 = arith.subf %152, %151 : vector<8x16xf32>
    %154 = math.exp %153 : vector<8x16xf32>
    %cst_51 = arith.constant 1.000000e+00 : f32
    %155 = vector.broadcast %cst_51 : f32 to vector<8x16xf32>
    %156 = arith.addf %155, %154 : vector<8x16xf32>
    %157 = tpu.reciprocal %156 {approx = true} : vector<8x16xf32> -> vector<8x16xf32>
    %158 = vector.extract_strided_slice %115 {offsets = [0, 32], sizes = [8, 16], strides = [1, 1]} : vector<8x64xf32> to vector<8x16xf32>
    %159 = math.tanh %158 : vector<8x16xf32>
    %160 = vector.extract_strided_slice %115 {offsets = [0, 48], sizes = [8, 16], strides = [1, 1]} : vector<8x64xf32> to vector<8x16xf32>
    %cst_52 = arith.constant 0.000000e+00 : f32
    %161 = vector.broadcast %cst_52 : f32 to vector<8x16xf32>
    %162 = arith.subf %161, %160 : vector<8x16xf32>
    %163 = math.exp %162 : vector<8x16xf32>
    %cst_53 = arith.constant 1.000000e+00 : f32
    %164 = vector.broadcast %cst_53 : f32 to vector<8x16xf32>
    %165 = arith.addf %164, %163 : vector<8x16xf32>
    %166 = tpu.reciprocal %165 {approx = true} : vector<8x16xf32> -> vector<8x16xf32>
    %167 = arith.mulf %157, %86 : vector<8x16xf32>
    %168 = arith.mulf %150, %159 : vector<8x16xf32>
    %169 = arith.addf %167, %168 : vector<8x16xf32>
    %170 = math.tanh %169 : vector<8x16xf32>
    %171 = arith.mulf %166, %170 : vector<8x16xf32>
    %172 = arith.truncf %143 : vector<8x16xf32> to vector<8x16xbf16>
    %173 = arith.index_cast %c1_i32 : i32 to index
    %c0_54 = arith.constant 0 : index
    %c0_55 = arith.constant 0 : index
    %174 = vector.load %arg6[%173, %c0_54, %c0_55] : memref<8x8x32xbf16, #tpu.memory_space<vmem>>, vector<1x8x16xbf16>
    %175 = vector.shape_cast %174 : vector<1x8x16xbf16> to vector<8x16xbf16>
    %176 = vector.shape_cast %172 : vector<8x16xbf16> to vector<1x8x16xbf16>
    tpu.vector_store %arg6[%173, %c0_54, %c0_55], %176 {strides = array<i32>} : memref<8x8x32xbf16, #tpu.memory_space<vmem>>, vector<1x8x16xbf16>,
    %177 = arith.truncf %171 : vector<8x16xf32> to vector<8x16xbf16>
    %178 = arith.index_cast %99 : i32 to index
    %c0_56 = arith.constant 0 : index
    %c16_57 = arith.constant 16 : index
    %179 = vector.load %arg6[%178, %c0_56, %c16_57] : memref<8x8x32xbf16, #tpu.memory_space<vmem>>, vector<1x8x16xbf16>
    %180 = vector.shape_cast %179 : vector<1x8x16xbf16> to vector<8x16xbf16>
    %181 = vector.shape_cast %177 : vector<8x16xbf16> to vector<1x8x16xbf16>
    tpu.vector_store %arg6[%178, %c0_56, %c16_57], %181 {strides = array<i32>} : memref<8x8x32xbf16, #tpu.memory_space<vmem>>, vector<1x8x16xbf16>,
    %c2_i32 = arith.constant 2 : i32
    %c7_i32_58 = arith.constant 7 : i32
    %182 = arith.subi %c7_i32_58, %c2_i32 : i32
    %c8_i32_59 = arith.constant 8 : i32
    %183 = arith.muli %c2_i32, %c8_i32_59 : i32
    %184 = tpu.assume_multiple %183, 8 : i32
    %c8_i32_60 = arith.constant 8 : i32
    %185 = arith.muli %182, %c8_i32_60 : i32
    %186 = tpu.assume_multiple %185, 8 : i32
    %187 = arith.index_cast %184 : i32 to index
    %c0_61 = arith.constant 0 : index
    %188 = vector.load %arg9[%187, %c0_61] : memref<64x64xbf16, #tpu.memory_space<vmem>>, vector<8x64xbf16>
    %189 = arith.extf %188 : vector<8x64xbf16> to vector<8x64xf32>
    %190 = arith.truncf %143 : vector<8x16xf32> to vector<8x16xbf16>
    %cst_62 = arith.constant dense<0.000000e+00> : vector<8x64xf32>
    %191 = tpu.matmul %190, %13, %cst_62 {dimension_numbers = #tpu.dot_dimension_numbers<[1], [0], [0], [1], [0, 0, 1, 1], [], []>} : vector<8x16xbf16>, vector<16x64xbf16>, vector<8x64xf32> -> vector<8x64xf32>
    %192 = arith.addf %189, %191 : vector<8x64xf32>
    %193 = arith.index_cast %186 : i32 to index
    %c0_63 = arith.constant 0 : index
    %194 = vector.load %arg10[%193, %c0_63] : memref<64x64xbf16, #tpu.memory_space<vmem>>, vector<8x64xbf16>
    %195 = arith.extf %194 : vector<8x64xbf16> to vector<8x64xf32>
    %196 = arith.truncf %171 : vector<8x16xf32> to vector<8x16xbf16>
    %cst_64 = arith.constant dense<0.000000e+00> : vector<8x64xf32>
    %197 = tpu.matmul %196, %14, %cst_64 {dimension_numbers = #tpu.dot_dimension_numbers<[1], [0], [0], [1], [0, 0, 1, 1], [], []>} : vector<8x16xbf16>, vector<16x64xbf16>, vector<8x64xf32> -> vector<8x64xf32>
    %198 = arith.addf %195, %197 : vector<8x64xf32>
    %199 = vector.extract_strided_slice %192 {offsets = [0, 0], sizes = [8, 16], strides = [1, 1]} : vector<8x64xf32> to vector<8x16xf32>
    %cst_65 = arith.constant 0.000000e+00 : f32
    %200 = vector.broadcast %cst_65 : f32 to vector<8x16xf32>
    %201 = arith.subf %200, %199 : vector<8x16xf32>
    %202 = math.exp %201 : vector<8x16xf32>
    %cst_66 = arith.constant 1.000000e+00 : f32
    %203 = vector.broadcast %cst_66 : f32 to vector<8x16xf32>
    %204 = arith.addf %203, %202 : vector<8x16xf32>
    %205 = tpu.reciprocal %204 {approx = true} : vector<8x16xf32> -> vector<8x16xf32>
    %206 = vector.extract_strided_slice %192 {offsets = [0, 16], sizes = [8, 16], strides = [1, 1]} : vector<8x64xf32> to vector<8x16xf32>
    %cst_67 = arith.constant 0.000000e+00 : f32
    %207 = vector.broadcast %cst_67 : f32 to vector<8x16xf32>
    %208 = arith.subf %207, %206 : vector<8x16xf32>
    %209 = math.exp %208 : vector<8x16xf32>
    %cst_68 = arith.constant 1.000000e+00 : f32
    %210 = vector.broadcast %cst_68 : f32 to vector<8x16xf32>
    %211 = arith.addf %210, %209 : vector<8x16xf32>
    %212 = tpu.reciprocal %211 {approx = true} : vector<8x16xf32> -> vector<8x16xf32>
    %213 = vector.extract_strided_slice %192 {offsets = [0, 32], sizes = [8, 16], strides = [1, 1]} : vector<8x64xf32> to vector<8x16xf32>
    %214 = math.tanh %213 : vector<8x16xf32>
    %215 = vector.extract_strided_slice %192 {offsets = [0, 48], sizes = [8, 16], strides = [1, 1]} : vector<8x64xf32> to vector<8x16xf32>
    %cst_69 = arith.constant 0.000000e+00 : f32
    %216 = vector.broadcast %cst_69 : f32 to vector<8x16xf32>
    %217 = arith.subf %216, %215 : vector<8x16xf32>
    %218 = math.exp %217 : vector<8x16xf32>
    %cst_70 = arith.constant 1.000000e+00 : f32
    %219 = vector.broadcast %cst_70 : f32 to vector<8x16xf32>
    %220 = arith.addf %219, %218 : vector<8x16xf32>
    %221 = tpu.reciprocal %220 {approx = true} : vector<8x16xf32> -> vector<8x16xf32>
    %222 = arith.mulf %212, %141 : vector<8x16xf32>
    %223 = arith.mulf %205, %214 : vector<8x16xf32>
    %224 = arith.addf %222, %223 : vector<8x16xf32>
    %225 = math.tanh %224 : vector<8x16xf32>
    %226 = arith.mulf %221, %225 : vector<8x16xf32>
    %227 = vector.extract_strided_slice %198 {offsets = [0, 0], sizes = [8, 16], strides = [1, 1]} : vector<8x64xf32> to vector<8x16xf32>
    %cst_71 = arith.constant 0.000000e+00 : f32
    %228 = vector.broadcast %cst_71 : f32 to vector<8x16xf32>
    %229 = arith.subf %228, %227 : vector<8x16xf32>
    %230 = math.exp %229 : vector<8x16xf32>
    %cst_72 = arith.constant 1.000000e+00 : f32
    %231 = vector.broadcast %cst_72 : f32 to vector<8x16xf32>
    %232 = arith.addf %231, %230 : vector<8x16xf32>
    %233 = tpu.reciprocal %232 {approx = true} : vector<8x16xf32> -> vector<8x16xf32>
    %234 = vector.extract_strided_slice %198 {offsets = [0, 16], sizes = [8, 16], strides = [1, 1]} : vector<8x64xf32> to vector<8x16xf32>
    %cst_73 = arith.constant 0.000000e+00 : f32
    %235 = vector.broadcast %cst_73 : f32 to vector<8x16xf32>
    %236 = arith.subf %235, %234 : vector<8x16xf32>
    %237 = math.exp %236 : vector<8x16xf32>
    %cst_74 = arith.constant 1.000000e+00 : f32
    %238 = vector.broadcast %cst_74 : f32 to vector<8x16xf32>
    %239 = arith.addf %238, %237 : vector<8x16xf32>
    %240 = tpu.reciprocal %239 {approx = true} : vector<8x16xf32> -> vector<8x16xf32>
    %241 = vector.extract_strided_slice %198 {offsets = [0, 32], sizes = [8, 16], strides = [1, 1]} : vector<8x64xf32> to vector<8x16xf32>
    %242 = math.tanh %241 : vector<8x16xf32>
    %243 = vector.extract_strided_slice %198 {offsets = [0, 48], sizes = [8, 16], strides = [1, 1]} : vector<8x64xf32> to vector<8x16xf32>
    %cst_75 = arith.constant 0.000000e+00 : f32
    %244 = vector.broadcast %cst_75 : f32 to vector<8x16xf32>
    %245 = arith.subf %244, %243 : vector<8x16xf32>
    %246 = math.exp %245 : vector<8x16xf32>
    %cst_76 = arith.constant 1.000000e+00 : f32
    %247 = vector.broadcast %cst_76 : f32 to vector<8x16xf32>
    %248 = arith.addf %247, %246 : vector<8x16xf32>
    %249 = tpu.reciprocal %248 {approx = true} : vector<8x16xf32> -> vector<8x16xf32>
    %250 = arith.mulf %240, %169 : vector<8x16xf32>
    %251 = arith.mulf %233, %242 : vector<8x16xf32>
    %252 = arith.addf %250, %251 : vector<8x16xf32>
    %253 = math.tanh %252 : vector<8x16xf32>
    %254 = arith.mulf %249, %253 : vector<8x16xf32>
    %255 = arith.truncf %226 : vector<8x16xf32> to vector<8x16xbf16>
    %256 = arith.index_cast %c2_i32 : i32 to index
    %c0_77 = arith.constant 0 : index
    %c0_78 = arith.constant 0 : index
    %257 = vector.load %arg6[%256, %c0_77, %c0_78] : memref<8x8x32xbf16, #tpu.memory_space<vmem>>, vector<1x8x16xbf16>
    %258 = vector.shape_cast %257 : vector<1x8x16xbf16> to vector<8x16xbf16>
    %259 = vector.shape_cast %255 : vector<8x16xbf16> to vector<1x8x16xbf16>
    tpu.vector_store %arg6[%256, %c0_77, %c0_78], %259 {strides = array<i32>} : memref<8x8x32xbf16, #tpu.memory_space<vmem>>, vector<1x8x16xbf16>,
    %260 = arith.truncf %254 : vector<8x16xf32> to vector<8x16xbf16>
    %261 = arith.index_cast %182 : i32 to index
    %c0_79 = arith.constant 0 : index
    %c16_80 = arith.constant 16 : index
    %262 = vector.load %arg6[%261, %c0_79, %c16_80] : memref<8x8x32xbf16, #tpu.memory_space<vmem>>, vector<1x8x16xbf16>
    %263 = vector.shape_cast %262 : vector<1x8x16xbf16> to vector<8x16xbf16>
    %264 = vector.shape_cast %260 : vector<8x16xbf16> to vector<1x8x16xbf16>
    tpu.vector_store %arg6[%261, %c0_79, %c16_80], %264 {strides = array<i32>} : memref<8x8x32xbf16, #tpu.memory_space<vmem>>, vector<1x8x16xbf16>,
    %c3_i32 = arith.constant 3 : i32
    %c7_i32_81 = arith.constant 7 : i32
    %265 = arith.subi %c7_i32_81, %c3_i32 : i32
    %c8_i32_82 = arith.constant 8 : i32
    %266 = arith.muli %c3_i32, %c8_i32_82 : i32
    %267 = tpu.assume_multiple %266, 8 : i32
    %c8_i32_83 = arith.constant 8 : i32
    %268 = arith.muli %265, %c8_i32_83 : i32
    %269 = tpu.assume_multiple %268, 8 : i32
    %270 = arith.index_cast %267 : i32 to index
    %c0_84 = arith.constant 0 : index
    %271 = vector.load %arg9[%270, %c0_84] : memref<64x64xbf16, #tpu.memory_space<vmem>>, vector<8x64xbf16>
    %272 = arith.extf %271 : vector<8x64xbf16> to vector<8x64xf32>
    %273 = arith.truncf %226 : vector<8x16xf32> to vector<8x16xbf16>
    %cst_85 = arith.constant dense<0.000000e+00> : vector<8x64xf32>
    %274 = tpu.matmul %273, %13, %cst_85 {dimension_numbers = #tpu.dot_dimension_numbers<[1], [0], [0], [1], [0, 0, 1, 1], [], []>} : vector<8x16xbf16>, vector<16x64xbf16>, vector<8x64xf32> -> vector<8x64xf32>
    %275 = arith.addf %272, %274 : vector<8x64xf32>
    %276 = arith.index_cast %269 : i32 to index
    %c0_86 = arith.constant 0 : index
    %277 = vector.load %arg10[%276, %c0_86] : memref<64x64xbf16, #tpu.memory_space<vmem>>, vector<8x64xbf16>
    %278 = arith.extf %277 : vector<8x64xbf16> to vector<8x64xf32>
    %279 = arith.truncf %254 : vector<8x16xf32> to vector<8x16xbf16>
    %cst_87 = arith.constant dense<0.000000e+00> : vector<8x64xf32>
    %280 = tpu.matmul %279, %14, %cst_87 {dimension_numbers = #tpu.dot_dimension_numbers<[1], [0], [0], [1], [0, 0, 1, 1], [], []>} : vector<8x16xbf16>, vector<16x64xbf16>, vector<8x64xf32> -> vector<8x64xf32>
    %281 = arith.addf %278, %280 : vector<8x64xf32>
    %282 = vector.extract_strided_slice %275 {offsets = [0, 0], sizes = [8, 16], strides = [1, 1]} : vector<8x64xf32> to vector<8x16xf32>
    %cst_88 = arith.constant 0.000000e+00 : f32
    %283 = vector.broadcast %cst_88 : f32 to vector<8x16xf32>
    %284 = arith.subf %283, %282 : vector<8x16xf32>
    %285 = math.exp %284 : vector<8x16xf32>
    %cst_89 = arith.constant 1.000000e+00 : f32
    %286 = vector.broadcast %cst_89 : f32 to vector<8x16xf32>
    %287 = arith.addf %286, %285 : vector<8x16xf32>
    %288 = tpu.reciprocal %287 {approx = true} : vector<8x16xf32> -> vector<8x16xf32>
    %289 = vector.extract_strided_slice %275 {offsets = [0, 16], sizes = [8, 16], strides = [1, 1]} : vector<8x64xf32> to vector<8x16xf32>
    %cst_90 = arith.constant 0.000000e+00 : f32
    %290 = vector.broadcast %cst_90 : f32 to vector<8x16xf32>
    %291 = arith.subf %290, %289 : vector<8x16xf32>
    %292 = math.exp %291 : vector<8x16xf32>
    %cst_91 = arith.constant 1.000000e+00 : f32
    %293 = vector.broadcast %cst_91 : f32 to vector<8x16xf32>
    %294 = arith.addf %293, %292 : vector<8x16xf32>
    %295 = tpu.reciprocal %294 {approx = true} : vector<8x16xf32> -> vector<8x16xf32>
    %296 = vector.extract_strided_slice %275 {offsets = [0, 32], sizes = [8, 16], strides = [1, 1]} : vector<8x64xf32> to vector<8x16xf32>
    %297 = math.tanh %296 : vector<8x16xf32>
    %298 = vector.extract_strided_slice %275 {offsets = [0, 48], sizes = [8, 16], strides = [1, 1]} : vector<8x64xf32> to vector<8x16xf32>
    %cst_92 = arith.constant 0.000000e+00 : f32
    %299 = vector.broadcast %cst_92 : f32 to vector<8x16xf32>
    %300 = arith.subf %299, %298 : vector<8x16xf32>
    %301 = math.exp %300 : vector<8x16xf32>
    %cst_93 = arith.constant 1.000000e+00 : f32
    %302 = vector.broadcast %cst_93 : f32 to vector<8x16xf32>
    %303 = arith.addf %302, %301 : vector<8x16xf32>
    %304 = tpu.reciprocal %303 {approx = true} : vector<8x16xf32> -> vector<8x16xf32>
    %305 = arith.mulf %295, %224 : vector<8x16xf32>
    %306 = arith.mulf %288, %297 : vector<8x16xf32>
    %307 = arith.addf %305, %306 : vector<8x16xf32>
    %308 = math.tanh %307 : vector<8x16xf32>
    %309 = arith.mulf %304, %308 : vector<8x16xf32>
    %310 = vector.extract_strided_slice %281 {offsets = [0, 0], sizes = [8, 16], strides = [1, 1]} : vector<8x64xf32> to vector<8x16xf32>
    %cst_94 = arith.constant 0.000000e+00 : f32
    %311 = vector.broadcast %cst_94 : f32 to vector<8x16xf32>
    %312 = arith.subf %311, %310 : vector<8x16xf32>
    %313 = math.exp %312 : vector<8x16xf32>
    %cst_95 = arith.constant 1.000000e+00 : f32
    %314 = vector.broadcast %cst_95 : f32 to vector<8x16xf32>
    %315 = arith.addf %314, %313 : vector<8x16xf32>
    %316 = tpu.reciprocal %315 {approx = true} : vector<8x16xf32> -> vector<8x16xf32>
    %317 = vector.extract_strided_slice %281 {offsets = [0, 16], sizes = [8, 16], strides = [1, 1]} : vector<8x64xf32> to vector<8x16xf32>
    %cst_96 = arith.constant 0.000000e+00 : f32
    %318 = vector.broadcast %cst_96 : f32 to vector<8x16xf32>
    %319 = arith.subf %318, %317 : vector<8x16xf32>
    %320 = math.exp %319 : vector<8x16xf32>
    %cst_97 = arith.constant 1.000000e+00 : f32
    %321 = vector.broadcast %cst_97 : f32 to vector<8x16xf32>
    %322 = arith.addf %321, %320 : vector<8x16xf32>
    %323 = tpu.reciprocal %322 {approx = true} : vector<8x16xf32> -> vector<8x16xf32>
    %324 = vector.extract_strided_slice %281 {offsets = [0, 32], sizes = [8, 16], strides = [1, 1]} : vector<8x64xf32> to vector<8x16xf32>
    %325 = math.tanh %324 : vector<8x16xf32>
    %326 = vector.extract_strided_slice %281 {offsets = [0, 48], sizes = [8, 16], strides = [1, 1]} : vector<8x64xf32> to vector<8x16xf32>
    %cst_98 = arith.constant 0.000000e+00 : f32
    %327 = vector.broadcast %cst_98 : f32 to vector<8x16xf32>
    %328 = arith.subf %327, %326 : vector<8x16xf32>
    %329 = math.exp %328 : vector<8x16xf32>
    %cst_99 = arith.constant 1.000000e+00 : f32
    %330 = vector.broadcast %cst_99 : f32 to vector<8x16xf32>
    %331 = arith.addf %330, %329 : vector<8x16xf32>
    %332 = tpu.reciprocal %331 {approx = true} : vector<8x16xf32> -> vector<8x16xf32>
    %333 = arith.mulf %323, %252 : vector<8x16xf32>
    %334 = arith.mulf %316, %325 : vector<8x16xf32>
    %335 = arith.addf %333, %334 : vector<8x16xf32>
    %336 = math.tanh %335 : vector<8x16xf32>
    %337 = arith.mulf %332, %336 : vector<8x16xf32>
    %338 = arith.truncf %309 : vector<8x16xf32> to vector<8x16xbf16>
    %339 = arith.index_cast %c3_i32 : i32 to index
    %c0_100 = arith.constant 0 : index
    %c0_101 = arith.constant 0 : index
    %340 = vector.load %arg6[%339, %c0_100, %c0_101] : memref<8x8x32xbf16, #tpu.memory_space<vmem>>, vector<1x8x16xbf16>
    %341 = vector.shape_cast %340 : vector<1x8x16xbf16> to vector<8x16xbf16>
    %342 = vector.shape_cast %338 : vector<8x16xbf16> to vector<1x8x16xbf16>
    tpu.vector_store %arg6[%339, %c0_100, %c0_101], %342 {strides = array<i32>} : memref<8x8x32xbf16, #tpu.memory_space<vmem>>, vector<1x8x16xbf16>,
    %343 = arith.truncf %337 : vector<8x16xf32> to vector<8x16xbf16>
    %344 = arith.index_cast %265 : i32 to index
    %c0_102 = arith.constant 0 : index
    %c16_103 = arith.constant 16 : index
    %345 = vector.load %arg6[%344, %c0_102, %c16_103] : memref<8x8x32xbf16, #tpu.memory_space<vmem>>, vector<1x8x16xbf16>
    %346 = vector.shape_cast %345 : vector<1x8x16xbf16> to vector<8x16xbf16>
    %347 = vector.shape_cast %343 : vector<8x16xbf16> to vector<1x8x16xbf16>
    tpu.vector_store %arg6[%344, %c0_102, %c16_103], %347 {strides = array<i32>} : memref<8x8x32xbf16, #tpu.memory_space<vmem>>, vector<1x8x16xbf16>,
    %c4_i32 = arith.constant 4 : i32
    %c7_i32_104 = arith.constant 7 : i32
    %348 = arith.subi %c7_i32_104, %c4_i32 : i32
    %c8_i32_105 = arith.constant 8 : i32
    %349 = arith.muli %c4_i32, %c8_i32_105 : i32
    %350 = tpu.assume_multiple %349, 8 : i32
    %c8_i32_106 = arith.constant 8 : i32
    %351 = arith.muli %348, %c8_i32_106 : i32
    %352 = tpu.assume_multiple %351, 8 : i32
    %353 = arith.index_cast %350 : i32 to index
    %c0_107 = arith.constant 0 : index
    %354 = vector.load %arg9[%353, %c0_107] : memref<64x64xbf16, #tpu.memory_space<vmem>>, vector<8x64xbf16>
    %355 = arith.extf %354 : vector<8x64xbf16> to vector<8x64xf32>
    %356 = arith.truncf %309 : vector<8x16xf32> to vector<8x16xbf16>
    %cst_108 = arith.constant dense<0.000000e+00> : vector<8x64xf32>
    %357 = tpu.matmul %356, %13, %cst_108 {dimension_numbers = #tpu.dot_dimension_numbers<[1], [0], [0], [1], [0, 0, 1, 1], [], []>} : vector<8x16xbf16>, vector<16x64xbf16>, vector<8x64xf32> -> vector<8x64xf32>
    %358 = arith.addf %355, %357 : vector<8x64xf32>
    %359 = arith.index_cast %352 : i32 to index
    %c0_109 = arith.constant 0 : index
    %360 = vector.load %arg10[%359, %c0_109] : memref<64x64xbf16, #tpu.memory_space<vmem>>, vector<8x64xbf16>
    %361 = arith.extf %360 : vector<8x64xbf16> to vector<8x64xf32>
    %362 = arith.truncf %337 : vector<8x16xf32> to vector<8x16xbf16>
    %cst_110 = arith.constant dense<0.000000e+00> : vector<8x64xf32>
    %363 = tpu.matmul %362, %14, %cst_110 {dimension_numbers = #tpu.dot_dimension_numbers<[1], [0], [0], [1], [0, 0, 1, 1], [], []>} : vector<8x16xbf16>, vector<16x64xbf16>, vector<8x64xf32> -> vector<8x64xf32>
    %364 = arith.addf %361, %363 : vector<8x64xf32>
    %365 = vector.extract_strided_slice %358 {offsets = [0, 0], sizes = [8, 16], strides = [1, 1]} : vector<8x64xf32> to vector<8x16xf32>
    %cst_111 = arith.constant 0.000000e+00 : f32
    %366 = vector.broadcast %cst_111 : f32 to vector<8x16xf32>
    %367 = arith.subf %366, %365 : vector<8x16xf32>
    %368 = math.exp %367 : vector<8x16xf32>
    %cst_112 = arith.constant 1.000000e+00 : f32
    %369 = vector.broadcast %cst_112 : f32 to vector<8x16xf32>
    %370 = arith.addf %369, %368 : vector<8x16xf32>
    %371 = tpu.reciprocal %370 {approx = true} : vector<8x16xf32> -> vector<8x16xf32>
    %372 = vector.extract_strided_slice %358 {offsets = [0, 16], sizes = [8, 16], strides = [1, 1]} : vector<8x64xf32> to vector<8x16xf32>
    %cst_113 = arith.constant 0.000000e+00 : f32
    %373 = vector.broadcast %cst_113 : f32 to vector<8x16xf32>
    %374 = arith.subf %373, %372 : vector<8x16xf32>
    %375 = math.exp %374 : vector<8x16xf32>
    %cst_114 = arith.constant 1.000000e+00 : f32
    %376 = vector.broadcast %cst_114 : f32 to vector<8x16xf32>
    %377 = arith.addf %376, %375 : vector<8x16xf32>
    %378 = tpu.reciprocal %377 {approx = true} : vector<8x16xf32> -> vector<8x16xf32>
    %379 = vector.extract_strided_slice %358 {offsets = [0, 32], sizes = [8, 16], strides = [1, 1]} : vector<8x64xf32> to vector<8x16xf32>
    %380 = math.tanh %379 : vector<8x16xf32>
    %381 = vector.extract_strided_slice %358 {offsets = [0, 48], sizes = [8, 16], strides = [1, 1]} : vector<8x64xf32> to vector<8x16xf32>
    %cst_115 = arith.constant 0.000000e+00 : f32
    %382 = vector.broadcast %cst_115 : f32 to vector<8x16xf32>
    %383 = arith.subf %382, %381 : vector<8x16xf32>
    %384 = math.exp %383 : vector<8x16xf32>
    %cst_116 = arith.constant 1.000000e+00 : f32
    %385 = vector.broadcast %cst_116 : f32 to vector<8x16xf32>
    %386 = arith.addf %385, %384 : vector<8x16xf32>
    %387 = tpu.reciprocal %386 {approx = true} : vector<8x16xf32> -> vector<8x16xf32>
    %388 = arith.mulf %378, %307 : vector<8x16xf32>
    %389 = arith.mulf %371, %380 : vector<8x16xf32>
    %390 = arith.addf %388, %389 : vector<8x16xf32>
    %391 = math.tanh %390 : vector<8x16xf32>
    %392 = arith.mulf %387, %391 : vector<8x16xf32>
    %393 = vector.extract_strided_slice %364 {offsets = [0, 0], sizes = [8, 16], strides = [1, 1]} : vector<8x64xf32> to vector<8x16xf32>
    %cst_117 = arith.constant 0.000000e+00 : f32
    %394 = vector.broadcast %cst_117 : f32 to vector<8x16xf32>
    %395 = arith.subf %394, %393 : vector<8x16xf32>
    %396 = math.exp %395 : vector<8x16xf32>
    %cst_118 = arith.constant 1.000000e+00 : f32
    %397 = vector.broadcast %cst_118 : f32 to vector<8x16xf32>
    %398 = arith.addf %397, %396 : vector<8x16xf32>
    %399 = tpu.reciprocal %398 {approx = true} : vector<8x16xf32> -> vector<8x16xf32>
    %400 = vector.extract_strided_slice %364 {offsets = [0, 16], sizes = [8, 16], strides = [1, 1]} : vector<8x64xf32> to vector<8x16xf32>
    %cst_119 = arith.constant 0.000000e+00 : f32
    %401 = vector.broadcast %cst_119 : f32 to vector<8x16xf32>
    %402 = arith.subf %401, %400 : vector<8x16xf32>
    %403 = math.exp %402 : vector<8x16xf32>
    %cst_120 = arith.constant 1.000000e+00 : f32
    %404 = vector.broadcast %cst_120 : f32 to vector<8x16xf32>
    %405 = arith.addf %404, %403 : vector<8x16xf32>
    %406 = tpu.reciprocal %405 {approx = true} : vector<8x16xf32> -> vector<8x16xf32>
    %407 = vector.extract_strided_slice %364 {offsets = [0, 32], sizes = [8, 16], strides = [1, 1]} : vector<8x64xf32> to vector<8x16xf32>
    %408 = math.tanh %407 : vector<8x16xf32>
    %409 = vector.extract_strided_slice %364 {offsets = [0, 48], sizes = [8, 16], strides = [1, 1]} : vector<8x64xf32> to vector<8x16xf32>
    %cst_121 = arith.constant 0.000000e+00 : f32
    %410 = vector.broadcast %cst_121 : f32 to vector<8x16xf32>
    %411 = arith.subf %410, %409 : vector<8x16xf32>
    %412 = math.exp %411 : vector<8x16xf32>
    %cst_122 = arith.constant 1.000000e+00 : f32
    %413 = vector.broadcast %cst_122 : f32 to vector<8x16xf32>
    %414 = arith.addf %413, %412 : vector<8x16xf32>
    %415 = tpu.reciprocal %414 {approx = true} : vector<8x16xf32> -> vector<8x16xf32>
    %416 = arith.mulf %406, %335 : vector<8x16xf32>
    %417 = arith.mulf %399, %408 : vector<8x16xf32>
    %418 = arith.addf %416, %417 : vector<8x16xf32>
    %419 = math.tanh %418 : vector<8x16xf32>
    %420 = arith.mulf %415, %419 : vector<8x16xf32>
    %421 = arith.truncf %392 : vector<8x16xf32> to vector<8x16xbf16>
    %422 = arith.index_cast %c4_i32 : i32 to index
    %c0_123 = arith.constant 0 : index
    %c0_124 = arith.constant 0 : index
    %423 = vector.load %arg6[%422, %c0_123, %c0_124] : memref<8x8x32xbf16, #tpu.memory_space<vmem>>, vector<1x8x16xbf16>
    %424 = vector.shape_cast %423 : vector<1x8x16xbf16> to vector<8x16xbf16>
    %425 = vector.shape_cast %421 : vector<8x16xbf16> to vector<1x8x16xbf16>
    tpu.vector_store %arg6[%422, %c0_123, %c0_124], %425 {strides = array<i32>} : memref<8x8x32xbf16, #tpu.memory_space<vmem>>, vector<1x8x16xbf16>,
    %426 = arith.truncf %420 : vector<8x16xf32> to vector<8x16xbf16>
    %427 = arith.index_cast %348 : i32 to index
    %c0_125 = arith.constant 0 : index
    %c16_126 = arith.constant 16 : index
    %428 = vector.load %arg6[%427, %c0_125, %c16_126] : memref<8x8x32xbf16, #tpu.memory_space<vmem>>, vector<1x8x16xbf16>
    %429 = vector.shape_cast %428 : vector<1x8x16xbf16> to vector<8x16xbf16>
    %430 = vector.shape_cast %426 : vector<8x16xbf16> to vector<1x8x16xbf16>
    tpu.vector_store %arg6[%427, %c0_125, %c16_126], %430 {strides = array<i32>} : memref<8x8x32xbf16, #tpu.memory_space<vmem>>, vector<1x8x16xbf16>,
    %c5_i32 = arith.constant 5 : i32
    %c7_i32_127 = arith.constant 7 : i32
    %431 = arith.subi %c7_i32_127, %c5_i32 : i32
    %c8_i32_128 = arith.constant 8 : i32
    %432 = arith.muli %c5_i32, %c8_i32_128 : i32
    %433 = tpu.assume_multiple %432, 8 : i32
    %c8_i32_129 = arith.constant 8 : i32
    %434 = arith.muli %431, %c8_i32_129 : i32
    %435 = tpu.assume_multiple %434, 8 : i32
    %436 = arith.index_cast %433 : i32 to index
    %c0_130 = arith.constant 0 : index
    %437 = vector.load %arg9[%436, %c0_130] : memref<64x64xbf16, #tpu.memory_space<vmem>>, vector<8x64xbf16>
    %438 = arith.extf %437 : vector<8x64xbf16> to vector<8x64xf32>
    %439 = arith.truncf %392 : vector<8x16xf32> to vector<8x16xbf16>
    %cst_131 = arith.constant dense<0.000000e+00> : vector<8x64xf32>
    %440 = tpu.matmul %439, %13, %cst_131 {dimension_numbers = #tpu.dot_dimension_numbers<[1], [0], [0], [1], [0, 0, 1, 1], [], []>} : vector<8x16xbf16>, vector<16x64xbf16>, vector<8x64xf32> -> vector<8x64xf32>
    %441 = arith.addf %438, %440 : vector<8x64xf32>
    %442 = arith.index_cast %435 : i32 to index
    %c0_132 = arith.constant 0 : index
    %443 = vector.load %arg10[%442, %c0_132] : memref<64x64xbf16, #tpu.memory_space<vmem>>, vector<8x64xbf16>
    %444 = arith.extf %443 : vector<8x64xbf16> to vector<8x64xf32>
    %445 = arith.truncf %420 : vector<8x16xf32> to vector<8x16xbf16>
    %cst_133 = arith.constant dense<0.000000e+00> : vector<8x64xf32>
    %446 = tpu.matmul %445, %14, %cst_133 {dimension_numbers = #tpu.dot_dimension_numbers<[1], [0], [0], [1], [0, 0, 1, 1], [], []>} : vector<8x16xbf16>, vector<16x64xbf16>, vector<8x64xf32> -> vector<8x64xf32>
    %447 = arith.addf %444, %446 : vector<8x64xf32>
    %448 = vector.extract_strided_slice %441 {offsets = [0, 0], sizes = [8, 16], strides = [1, 1]} : vector<8x64xf32> to vector<8x16xf32>
    %cst_134 = arith.constant 0.000000e+00 : f32
    %449 = vector.broadcast %cst_134 : f32 to vector<8x16xf32>
    %450 = arith.subf %449, %448 : vector<8x16xf32>
    %451 = math.exp %450 : vector<8x16xf32>
    %cst_135 = arith.constant 1.000000e+00 : f32
    %452 = vector.broadcast %cst_135 : f32 to vector<8x16xf32>
    %453 = arith.addf %452, %451 : vector<8x16xf32>
    %454 = tpu.reciprocal %453 {approx = true} : vector<8x16xf32> -> vector<8x16xf32>
    %455 = vector.extract_strided_slice %441 {offsets = [0, 16], sizes = [8, 16], strides = [1, 1]} : vector<8x64xf32> to vector<8x16xf32>
    %cst_136 = arith.constant 0.000000e+00 : f32
    %456 = vector.broadcast %cst_136 : f32 to vector<8x16xf32>
    %457 = arith.subf %456, %455 : vector<8x16xf32>
    %458 = math.exp %457 : vector<8x16xf32>
    %cst_137 = arith.constant 1.000000e+00 : f32
    %459 = vector.broadcast %cst_137 : f32 to vector<8x16xf32>
    %460 = arith.addf %459, %458 : vector<8x16xf32>
    %461 = tpu.reciprocal %460 {approx = true} : vector<8x16xf32> -> vector<8x16xf32>
    %462 = vector.extract_strided_slice %441 {offsets = [0, 32], sizes = [8, 16], strides = [1, 1]} : vector<8x64xf32> to vector<8x16xf32>
    %463 = math.tanh %462 : vector<8x16xf32>
    %464 = vector.extract_strided_slice %441 {offsets = [0, 48], sizes = [8, 16], strides = [1, 1]} : vector<8x64xf32> to vector<8x16xf32>
    %cst_138 = arith.constant 0.000000e+00 : f32
    %465 = vector.broadcast %cst_138 : f32 to vector<8x16xf32>
    %466 = arith.subf %465, %464 : vector<8x16xf32>
    %467 = math.exp %466 : vector<8x16xf32>
    %cst_139 = arith.constant 1.000000e+00 : f32
    %468 = vector.broadcast %cst_139 : f32 to vector<8x16xf32>
    %469 = arith.addf %468, %467 : vector<8x16xf32>
    %470 = tpu.reciprocal %469 {approx = true} : vector<8x16xf32> -> vector<8x16xf32>
    %471 = arith.mulf %461, %390 : vector<8x16xf32>
    %472 = arith.mulf %454, %463 : vector<8x16xf32>
    %473 = arith.addf %471, %472 : vector<8x16xf32>
    %474 = math.tanh %473 : vector<8x16xf32>
    %475 = arith.mulf %470, %474 : vector<8x16xf32>
    %476 = vector.extract_strided_slice %447 {offsets = [0, 0], sizes = [8, 16], strides = [1, 1]} : vector<8x64xf32> to vector<8x16xf32>
    %cst_140 = arith.constant 0.000000e+00 : f32
    %477 = vector.broadcast %cst_140 : f32 to vector<8x16xf32>
    %478 = arith.subf %477, %476 : vector<8x16xf32>
    %479 = math.exp %478 : vector<8x16xf32>
    %cst_141 = arith.constant 1.000000e+00 : f32
    %480 = vector.broadcast %cst_141 : f32 to vector<8x16xf32>
    %481 = arith.addf %480, %479 : vector<8x16xf32>
    %482 = tpu.reciprocal %481 {approx = true} : vector<8x16xf32> -> vector<8x16xf32>
    %483 = vector.extract_strided_slice %447 {offsets = [0, 16], sizes = [8, 16], strides = [1, 1]} : vector<8x64xf32> to vector<8x16xf32>
    %cst_142 = arith.constant 0.000000e+00 : f32
    %484 = vector.broadcast %cst_142 : f32 to vector<8x16xf32>
    %485 = arith.subf %484, %483 : vector<8x16xf32>
    %486 = math.exp %485 : vector<8x16xf32>
    %cst_143 = arith.constant 1.000000e+00 : f32
    %487 = vector.broadcast %cst_143 : f32 to vector<8x16xf32>
    %488 = arith.addf %487, %486 : vector<8x16xf32>
    %489 = tpu.reciprocal %488 {approx = true} : vector<8x16xf32> -> vector<8x16xf32>
    %490 = vector.extract_strided_slice %447 {offsets = [0, 32], sizes = [8, 16], strides = [1, 1]} : vector<8x64xf32> to vector<8x16xf32>
    %491 = math.tanh %490 : vector<8x16xf32>
    %492 = vector.extract_strided_slice %447 {offsets = [0, 48], sizes = [8, 16], strides = [1, 1]} : vector<8x64xf32> to vector<8x16xf32>
    %cst_144 = arith.constant 0.000000e+00 : f32
    %493 = vector.broadcast %cst_144 : f32 to vector<8x16xf32>
    %494 = arith.subf %493, %492 : vector<8x16xf32>
    %495 = math.exp %494 : vector<8x16xf32>
    %cst_145 = arith.constant 1.000000e+00 : f32
    %496 = vector.broadcast %cst_145 : f32 to vector<8x16xf32>
    %497 = arith.addf %496, %495 : vector<8x16xf32>
    %498 = tpu.reciprocal %497 {approx = true} : vector<8x16xf32> -> vector<8x16xf32>
    %499 = arith.mulf %489, %418 : vector<8x16xf32>
    %500 = arith.mulf %482, %491 : vector<8x16xf32>
    %501 = arith.addf %499, %500 : vector<8x16xf32>
    %502 = math.tanh %501 : vector<8x16xf32>
    %503 = arith.mulf %498, %502 : vector<8x16xf32>
    %504 = arith.truncf %475 : vector<8x16xf32> to vector<8x16xbf16>
    %505 = arith.index_cast %c5_i32 : i32 to index
    %c0_146 = arith.constant 0 : index
    %c0_147 = arith.constant 0 : index
    %506 = vector.load %arg6[%505, %c0_146, %c0_147] : memref<8x8x32xbf16, #tpu.memory_space<vmem>>, vector<1x8x16xbf16>
    %507 = vector.shape_cast %506 : vector<1x8x16xbf16> to vector<8x16xbf16>
    %508 = vector.shape_cast %504 : vector<8x16xbf16> to vector<1x8x16xbf16>
    tpu.vector_store %arg6[%505, %c0_146, %c0_147], %508 {strides = array<i32>} : memref<8x8x32xbf16, #tpu.memory_space<vmem>>, vector<1x8x16xbf16>,
    %509 = arith.truncf %503 : vector<8x16xf32> to vector<8x16xbf16>
    %510 = arith.index_cast %431 : i32 to index
    %c0_148 = arith.constant 0 : index
    %c16_149 = arith.constant 16 : index
    %511 = vector.load %arg6[%510, %c0_148, %c16_149] : memref<8x8x32xbf16, #tpu.memory_space<vmem>>, vector<1x8x16xbf16>
    %512 = vector.shape_cast %511 : vector<1x8x16xbf16> to vector<8x16xbf16>
    %513 = vector.shape_cast %509 : vector<8x16xbf16> to vector<1x8x16xbf16>
    tpu.vector_store %arg6[%510, %c0_148, %c16_149], %513 {strides = array<i32>} : memref<8x8x32xbf16, #tpu.memory_space<vmem>>, vector<1x8x16xbf16>,
    %c6_i32 = arith.constant 6 : i32
    %c7_i32_150 = arith.constant 7 : i32
    %514 = arith.subi %c7_i32_150, %c6_i32 : i32
    %c8_i32_151 = arith.constant 8 : i32
    %515 = arith.muli %c6_i32, %c8_i32_151 : i32
    %516 = tpu.assume_multiple %515, 8 : i32
    %c8_i32_152 = arith.constant 8 : i32
    %517 = arith.muli %514, %c8_i32_152 : i32
    %518 = tpu.assume_multiple %517, 8 : i32
    %519 = arith.index_cast %516 : i32 to index
    %c0_153 = arith.constant 0 : index
    %520 = vector.load %arg9[%519, %c0_153] : memref<64x64xbf16, #tpu.memory_space<vmem>>, vector<8x64xbf16>
    %521 = arith.extf %520 : vector<8x64xbf16> to vector<8x64xf32>
    %522 = arith.truncf %475 : vector<8x16xf32> to vector<8x16xbf16>
    %cst_154 = arith.constant dense<0.000000e+00> : vector<8x64xf32>
    %523 = tpu.matmul %522, %13, %cst_154 {dimension_numbers = #tpu.dot_dimension_numbers<[1], [0], [0], [1], [0, 0, 1, 1], [], []>} : vector<8x16xbf16>, vector<16x64xbf16>, vector<8x64xf32> -> vector<8x64xf32>
    %524 = arith.addf %521, %523 : vector<8x64xf32>
    %525 = arith.index_cast %518 : i32 to index
    %c0_155 = arith.constant 0 : index
    %526 = vector.load %arg10[%525, %c0_155] : memref<64x64xbf16, #tpu.memory_space<vmem>>, vector<8x64xbf16>
    %527 = arith.extf %526 : vector<8x64xbf16> to vector<8x64xf32>
    %528 = arith.truncf %503 : vector<8x16xf32> to vector<8x16xbf16>
    %cst_156 = arith.constant dense<0.000000e+00> : vector<8x64xf32>
    %529 = tpu.matmul %528, %14, %cst_156 {dimension_numbers = #tpu.dot_dimension_numbers<[1], [0], [0], [1], [0, 0, 1, 1], [], []>} : vector<8x16xbf16>, vector<16x64xbf16>, vector<8x64xf32> -> vector<8x64xf32>
    %530 = arith.addf %527, %529 : vector<8x64xf32>
    %531 = vector.extract_strided_slice %524 {offsets = [0, 0], sizes = [8, 16], strides = [1, 1]} : vector<8x64xf32> to vector<8x16xf32>
    %cst_157 = arith.constant 0.000000e+00 : f32
    %532 = vector.broadcast %cst_157 : f32 to vector<8x16xf32>
    %533 = arith.subf %532, %531 : vector<8x16xf32>
    %534 = math.exp %533 : vector<8x16xf32>
    %cst_158 = arith.constant 1.000000e+00 : f32
    %535 = vector.broadcast %cst_158 : f32 to vector<8x16xf32>
    %536 = arith.addf %535, %534 : vector<8x16xf32>
    %537 = tpu.reciprocal %536 {approx = true} : vector<8x16xf32> -> vector<8x16xf32>
    %538 = vector.extract_strided_slice %524 {offsets = [0, 16], sizes = [8, 16], strides = [1, 1]} : vector<8x64xf32> to vector<8x16xf32>
    %cst_159 = arith.constant 0.000000e+00 : f32
    %539 = vector.broadcast %cst_159 : f32 to vector<8x16xf32>
    %540 = arith.subf %539, %538 : vector<8x16xf32>
    %541 = math.exp %540 : vector<8x16xf32>
    %cst_160 = arith.constant 1.000000e+00 : f32
    %542 = vector.broadcast %cst_160 : f32 to vector<8x16xf32>
    %543 = arith.addf %542, %541 : vector<8x16xf32>
    %544 = tpu.reciprocal %543 {approx = true} : vector<8x16xf32> -> vector<8x16xf32>
    %545 = vector.extract_strided_slice %524 {offsets = [0, 32], sizes = [8, 16], strides = [1, 1]} : vector<8x64xf32> to vector<8x16xf32>
    %546 = math.tanh %545 : vector<8x16xf32>
    %547 = vector.extract_strided_slice %524 {offsets = [0, 48], sizes = [8, 16], strides = [1, 1]} : vector<8x64xf32> to vector<8x16xf32>
    %cst_161 = arith.constant 0.000000e+00 : f32
    %548 = vector.broadcast %cst_161 : f32 to vector<8x16xf32>
    %549 = arith.subf %548, %547 : vector<8x16xf32>
    %550 = math.exp %549 : vector<8x16xf32>
    %cst_162 = arith.constant 1.000000e+00 : f32
    %551 = vector.broadcast %cst_162 : f32 to vector<8x16xf32>
    %552 = arith.addf %551, %550 : vector<8x16xf32>
    %553 = tpu.reciprocal %552 {approx = true} : vector<8x16xf32> -> vector<8x16xf32>
    %554 = arith.mulf %544, %473 : vector<8x16xf32>
    %555 = arith.mulf %537, %546 : vector<8x16xf32>
    %556 = arith.addf %554, %555 : vector<8x16xf32>
    %557 = math.tanh %556 : vector<8x16xf32>
    %558 = arith.mulf %553, %557 : vector<8x16xf32>
    %559 = vector.extract_strided_slice %530 {offsets = [0, 0], sizes = [8, 16], strides = [1, 1]} : vector<8x64xf32> to vector<8x16xf32>
    %cst_163 = arith.constant 0.000000e+00 : f32
    %560 = vector.broadcast %cst_163 : f32 to vector<8x16xf32>
    %561 = arith.subf %560, %559 : vector<8x16xf32>
    %562 = math.exp %561 : vector<8x16xf32>
    %cst_164 = arith.constant 1.000000e+00 : f32
    %563 = vector.broadcast %cst_164 : f32 to vector<8x16xf32>
    %564 = arith.addf %563, %562 : vector<8x16xf32>
    %565 = tpu.reciprocal %564 {approx = true} : vector<8x16xf32> -> vector<8x16xf32>
    %566 = vector.extract_strided_slice %530 {offsets = [0, 16], sizes = [8, 16], strides = [1, 1]} : vector<8x64xf32> to vector<8x16xf32>
    %cst_165 = arith.constant 0.000000e+00 : f32
    %567 = vector.broadcast %cst_165 : f32 to vector<8x16xf32>
    %568 = arith.subf %567, %566 : vector<8x16xf32>
    %569 = math.exp %568 : vector<8x16xf32>
    %cst_166 = arith.constant 1.000000e+00 : f32
    %570 = vector.broadcast %cst_166 : f32 to vector<8x16xf32>
    %571 = arith.addf %570, %569 : vector<8x16xf32>
    %572 = tpu.reciprocal %571 {approx = true} : vector<8x16xf32> -> vector<8x16xf32>
    %573 = vector.extract_strided_slice %530 {offsets = [0, 32], sizes = [8, 16], strides = [1, 1]} : vector<8x64xf32> to vector<8x16xf32>
    %574 = math.tanh %573 : vector<8x16xf32>
    %575 = vector.extract_strided_slice %530 {offsets = [0, 48], sizes = [8, 16], strides = [1, 1]} : vector<8x64xf32> to vector<8x16xf32>
    %cst_167 = arith.constant 0.000000e+00 : f32
    %576 = vector.broadcast %cst_167 : f32 to vector<8x16xf32>
    %577 = arith.subf %576, %575 : vector<8x16xf32>
    %578 = math.exp %577 : vector<8x16xf32>
    %cst_168 = arith.constant 1.000000e+00 : f32
    %579 = vector.broadcast %cst_168 : f32 to vector<8x16xf32>
    %580 = arith.addf %579, %578 : vector<8x16xf32>
    %581 = tpu.reciprocal %580 {approx = true} : vector<8x16xf32> -> vector<8x16xf32>
    %582 = arith.mulf %572, %501 : vector<8x16xf32>
    %583 = arith.mulf %565, %574 : vector<8x16xf32>
    %584 = arith.addf %582, %583 : vector<8x16xf32>
    %585 = math.tanh %584 : vector<8x16xf32>
    %586 = arith.mulf %581, %585 : vector<8x16xf32>
    %587 = arith.truncf %558 : vector<8x16xf32> to vector<8x16xbf16>
    %588 = arith.index_cast %c6_i32 : i32 to index
    %c0_169 = arith.constant 0 : index
    %c0_170 = arith.constant 0 : index
    %589 = vector.load %arg6[%588, %c0_169, %c0_170] : memref<8x8x32xbf16, #tpu.memory_space<vmem>>, vector<1x8x16xbf16>
    %590 = vector.shape_cast %589 : vector<1x8x16xbf16> to vector<8x16xbf16>
    %591 = vector.shape_cast %587 : vector<8x16xbf16> to vector<1x8x16xbf16>
    tpu.vector_store %arg6[%588, %c0_169, %c0_170], %591 {strides = array<i32>} : memref<8x8x32xbf16, #tpu.memory_space<vmem>>, vector<1x8x16xbf16>,
    %592 = arith.truncf %586 : vector<8x16xf32> to vector<8x16xbf16>
    %593 = arith.index_cast %514 : i32 to index
    %c0_171 = arith.constant 0 : index
    %c16_172 = arith.constant 16 : index
    %594 = vector.load %arg6[%593, %c0_171, %c16_172] : memref<8x8x32xbf16, #tpu.memory_space<vmem>>, vector<1x8x16xbf16>
    %595 = vector.shape_cast %594 : vector<1x8x16xbf16> to vector<8x16xbf16>
    %596 = vector.shape_cast %592 : vector<8x16xbf16> to vector<1x8x16xbf16>
    tpu.vector_store %arg6[%593, %c0_171, %c16_172], %596 {strides = array<i32>} : memref<8x8x32xbf16, #tpu.memory_space<vmem>>, vector<1x8x16xbf16>,
    %c7_i32_173 = arith.constant 7 : i32
    %c7_i32_174 = arith.constant 7 : i32
    %597 = arith.subi %c7_i32_174, %c7_i32_173 : i32
    %c8_i32_175 = arith.constant 8 : i32
    %598 = arith.muli %c7_i32_173, %c8_i32_175 : i32
    %599 = tpu.assume_multiple %598, 8 : i32
    %c8_i32_176 = arith.constant 8 : i32
    %600 = arith.muli %597, %c8_i32_176 : i32
    %601 = tpu.assume_multiple %600, 8 : i32
    %602 = arith.index_cast %599 : i32 to index
    %c0_177 = arith.constant 0 : index
    %603 = vector.load %arg9[%602, %c0_177] : memref<64x64xbf16, #tpu.memory_space<vmem>>, vector<8x64xbf16>
    %604 = arith.extf %603 : vector<8x64xbf16> to vector<8x64xf32>
    %605 = arith.truncf %558 : vector<8x16xf32> to vector<8x16xbf16>
    %cst_178 = arith.constant dense<0.000000e+00> : vector<8x64xf32>
    %606 = tpu.matmul %605, %13, %cst_178 {dimension_numbers = #tpu.dot_dimension_numbers<[1], [0], [0], [1], [0, 0, 1, 1], [], []>} : vector<8x16xbf16>, vector<16x64xbf16>, vector<8x64xf32> -> vector<8x64xf32>
    %607 = arith.addf %604, %606 : vector<8x64xf32>
    %608 = arith.index_cast %601 : i32 to index
    %c0_179 = arith.constant 0 : index
    %609 = vector.load %arg10[%608, %c0_179] : memref<64x64xbf16, #tpu.memory_space<vmem>>, vector<8x64xbf16>
    %610 = arith.extf %609 : vector<8x64xbf16> to vector<8x64xf32>
    %611 = arith.truncf %586 : vector<8x16xf32> to vector<8x16xbf16>
    %cst_180 = arith.constant dense<0.000000e+00> : vector<8x64xf32>
    %612 = tpu.matmul %611, %14, %cst_180 {dimension_numbers = #tpu.dot_dimension_numbers<[1], [0], [0], [1], [0, 0, 1, 1], [], []>} : vector<8x16xbf16>, vector<16x64xbf16>, vector<8x64xf32> -> vector<8x64xf32>
    %613 = arith.addf %610, %612 : vector<8x64xf32>
    %614 = vector.extract_strided_slice %607 {offsets = [0, 0], sizes = [8, 16], strides = [1, 1]} : vector<8x64xf32> to vector<8x16xf32>
    %cst_181 = arith.constant 0.000000e+00 : f32
    %615 = vector.broadcast %cst_181 : f32 to vector<8x16xf32>
    %616 = arith.subf %615, %614 : vector<8x16xf32>
    %617 = math.exp %616 : vector<8x16xf32>
    %cst_182 = arith.constant 1.000000e+00 : f32
    %618 = vector.broadcast %cst_182 : f32 to vector<8x16xf32>
    %619 = arith.addf %618, %617 : vector<8x16xf32>
    %620 = tpu.reciprocal %619 {approx = true} : vector<8x16xf32> -> vector<8x16xf32>
    %621 = vector.extract_strided_slice %607 {offsets = [0, 16], sizes = [8, 16], strides = [1, 1]} : vector<8x64xf32> to vector<8x16xf32>
    %cst_183 = arith.constant 0.000000e+00 : f32
    %622 = vector.broadcast %cst_183 : f32 to vector<8x16xf32>
    %623 = arith.subf %622, %621 : vector<8x16xf32>
    %624 = math.exp %623 : vector<8x16xf32>
    %cst_184 = arith.constant 1.000000e+00 : f32
    %625 = vector.broadcast %cst_184 : f32 to vector<8x16xf32>
    %626 = arith.addf %625, %624 : vector<8x16xf32>
    %627 = tpu.reciprocal %626 {approx = true} : vector<8x16xf32> -> vector<8x16xf32>
    %628 = vector.extract_strided_slice %607 {offsets = [0, 32], sizes = [8, 16], strides = [1, 1]} : vector<8x64xf32> to vector<8x16xf32>
    %629 = math.tanh %628 : vector<8x16xf32>
    %630 = vector.extract_strided_slice %607 {offsets = [0, 48], sizes = [8, 16], strides = [1, 1]} : vector<8x64xf32> to vector<8x16xf32>
    %cst_185 = arith.constant 0.000000e+00 : f32
    %631 = vector.broadcast %cst_185 : f32 to vector<8x16xf32>
    %632 = arith.subf %631, %630 : vector<8x16xf32>
    %633 = math.exp %632 : vector<8x16xf32>
    %cst_186 = arith.constant 1.000000e+00 : f32
    %634 = vector.broadcast %cst_186 : f32 to vector<8x16xf32>
    %635 = arith.addf %634, %633 : vector<8x16xf32>
    %636 = tpu.reciprocal %635 {approx = true} : vector<8x16xf32> -> vector<8x16xf32>
    %637 = arith.mulf %627, %556 : vector<8x16xf32>
    %638 = arith.mulf %620, %629 : vector<8x16xf32>
    %639 = arith.addf %637, %638 : vector<8x16xf32>
    %640 = math.tanh %639 : vector<8x16xf32>
    %641 = arith.mulf %636, %640 : vector<8x16xf32>
    %642 = vector.extract_strided_slice %613 {offsets = [0, 0], sizes = [8, 16], strides = [1, 1]} : vector<8x64xf32> to vector<8x16xf32>
    %cst_187 = arith.constant 0.000000e+00 : f32
    %643 = vector.broadcast %cst_187 : f32 to vector<8x16xf32>
    %644 = arith.subf %643, %642 : vector<8x16xf32>
    %645 = math.exp %644 : vector<8x16xf32>
    %cst_188 = arith.constant 1.000000e+00 : f32
    %646 = vector.broadcast %cst_188 : f32 to vector<8x16xf32>
    %647 = arith.addf %646, %645 : vector<8x16xf32>
    %648 = tpu.reciprocal %647 {approx = true} : vector<8x16xf32> -> vector<8x16xf32>
    %649 = vector.extract_strided_slice %613 {offsets = [0, 16], sizes = [8, 16], strides = [1, 1]} : vector<8x64xf32> to vector<8x16xf32>
    %cst_189 = arith.constant 0.000000e+00 : f32
    %650 = vector.broadcast %cst_189 : f32 to vector<8x16xf32>
    %651 = arith.subf %650, %649 : vector<8x16xf32>
    %652 = math.exp %651 : vector<8x16xf32>
    %cst_190 = arith.constant 1.000000e+00 : f32
    %653 = vector.broadcast %cst_190 : f32 to vector<8x16xf32>
    %654 = arith.addf %653, %652 : vector<8x16xf32>
    %655 = tpu.reciprocal %654 {approx = true} : vector<8x16xf32> -> vector<8x16xf32>
    %656 = vector.extract_strided_slice %613 {offsets = [0, 32], sizes = [8, 16], strides = [1, 1]} : vector<8x64xf32> to vector<8x16xf32>
    %657 = math.tanh %656 : vector<8x16xf32>
    %658 = vector.extract_strided_slice %613 {offsets = [0, 48], sizes = [8, 16], strides = [1, 1]} : vector<8x64xf32> to vector<8x16xf32>
    %cst_191 = arith.constant 0.000000e+00 : f32
    %659 = vector.broadcast %cst_191 : f32 to vector<8x16xf32>
    %660 = arith.subf %659, %658 : vector<8x16xf32>
    %661 = math.exp %660 : vector<8x16xf32>
    %cst_192 = arith.constant 1.000000e+00 : f32
    %662 = vector.broadcast %cst_192 : f32 to vector<8x16xf32>
    %663 = arith.addf %662, %661 : vector<8x16xf32>
    %664 = tpu.reciprocal %663 {approx = true} : vector<8x16xf32> -> vector<8x16xf32>
    %665 = arith.mulf %655, %584 : vector<8x16xf32>
    %666 = arith.mulf %648, %657 : vector<8x16xf32>
    %667 = arith.addf %665, %666 : vector<8x16xf32>
    %668 = math.tanh %667 : vector<8x16xf32>
    %669 = arith.mulf %664, %668 : vector<8x16xf32>
    %670 = arith.truncf %641 : vector<8x16xf32> to vector<8x16xbf16>
    %671 = arith.index_cast %c7_i32_173 : i32 to index
    %c0_193 = arith.constant 0 : index
    %c0_194 = arith.constant 0 : index
    %672 = vector.load %arg6[%671, %c0_193, %c0_194] : memref<8x8x32xbf16, #tpu.memory_space<vmem>>, vector<1x8x16xbf16>
    %673 = vector.shape_cast %672 : vector<1x8x16xbf16> to vector<8x16xbf16>
    %674 = vector.shape_cast %670 : vector<8x16xbf16> to vector<1x8x16xbf16>
    tpu.vector_store %arg6[%671, %c0_193, %c0_194], %674 {strides = array<i32>} : memref<8x8x32xbf16, #tpu.memory_space<vmem>>, vector<1x8x16xbf16>,
    %675 = arith.truncf %669 : vector<8x16xf32> to vector<8x16xbf16>
    %676 = arith.index_cast %597 : i32 to index
    %c0_195 = arith.constant 0 : index
    %c16_196 = arith.constant 16 : index
    %677 = vector.load %arg6[%676, %c0_195, %c16_196] : memref<8x8x32xbf16, #tpu.memory_space<vmem>>, vector<1x8x16xbf16>
    %678 = vector.shape_cast %677 : vector<1x8x16xbf16> to vector<8x16xbf16>
    %679 = vector.shape_cast %675 : vector<8x16xbf16> to vector<1x8x16xbf16>
    tpu.vector_store %arg6[%676, %c0_195, %c16_196], %679 {strides = array<i32>} : memref<8x8x32xbf16, #tpu.memory_space<vmem>>, vector<1x8x16xbf16>,
    %c8_i32_197 = arith.constant 8 : i32
    %c0_198 = arith.constant 0 : index
    %c0_199 = arith.constant 0 : index
    %680 = vector.load %arg7[%c0_198, %c0_199] : memref<8x32xf32, #tpu.memory_space<vmem>>, vector<8x16xf32>
    tpu.vector_store %arg7[%c0_198, %c0_199], %641 {strides = array<i32>} : memref<8x32xf32, #tpu.memory_space<vmem>>, vector<8x16xf32>,
    %c0_200 = arith.constant 0 : index
    %c16_201 = arith.constant 16 : index
    %681 = vector.load %arg7[%c0_200, %c16_201] : memref<8x32xf32, #tpu.memory_space<vmem>>, vector<8x16xf32>
    tpu.vector_store %arg7[%c0_200, %c16_201], %669 {strides = array<i32>} : memref<8x32xf32, #tpu.memory_space<vmem>>, vector<8x16xf32>,
    %c0_202 = arith.constant 0 : index
    %c0_203 = arith.constant 0 : index
    %682 = vector.load %arg8[%c0_202, %c0_203] : memref<8x32xf32, #tpu.memory_space<vmem>>, vector<8x16xf32>
    tpu.vector_store %arg8[%c0_202, %c0_203], %639 {strides = array<i32>} : memref<8x32xf32, #tpu.memory_space<vmem>>, vector<8x16xf32>,
    %c0_204 = arith.constant 0 : index
    %c16_205 = arith.constant 16 : index
    %683 = vector.load %arg8[%c0_204, %c16_205] : memref<8x32xf32, #tpu.memory_space<vmem>>, vector<8x16xf32>
    tpu.vector_store %arg8[%c0_204, %c16_205], %667 {strides = array<i32>} : memref<8x32xf32, #tpu.memory_space<vmem>>, vector<8x16xf32>,
    return
  }
  func.func @transform_0(%arg0: i32) -> (i32, i32, i32) {
    %c0_i32 = arith.constant 0 : i32
    %c0_i32_0 = arith.constant 0 : i32
    %c0_i32_1 = arith.constant 0 : i32
    return %c0_i32, %arg0, %c0_i32_0 : i32, i32, i32
  }
  func.func @transform_1(%arg0: i32) -> (i32, i32) {
    %c0_i32 = arith.constant 0 : i32
    %c0_i32_0 = arith.constant 0 : i32
    %c0_i32_1 = arith.constant 0 : i32
    return %c0_i32, %c0_i32_0 : i32, i32
  }
  func.func @transform_2(%arg0: i32) -> (i32, i32) {
    %c0_i32 = arith.constant 0 : i32
    %c0_i32_0 = arith.constant 0 : i32
    %c0_i32_1 = arith.constant 0 : i32
    return %c0_i32, %c0_i32_0 : i32, i32
  }
  func.func @transform_3(%arg0: i32) -> (i32, i32) {
    %c0_i32 = arith.constant 0 : i32
    %c0_i32_0 = arith.constant 0 : i32
    %c0_i32_1 = arith.constant 0 : i32
    return %c0_i32, %c0_i32_0 : i32, i32
  }
  func.func @transform_4(%arg0: i32) -> (i32, i32) {
    %c0_i32 = arith.constant 0 : i32
    %c0_i32_0 = arith.constant 0 : i32
    %c0_i32_1 = arith.constant 0 : i32
    return %c0_i32, %c0_i32_0 : i32, i32
  }
  func.func @transform_5(%arg0: i32) -> (i32, i32, i32) {
    %c0_i32 = arith.constant 0 : i32
    %c0_i32_0 = arith.constant 0 : i32
    %c0_i32_1 = arith.constant 0 : i32
    return %c0_i32, %arg0, %c0_i32_0 : i32, i32, i32
  }
  func.func @transform_6(%arg0: i32) -> (i32, i32) {
    %c0_i32 = arith.constant 0 : i32
    %c0_i32_0 = arith.constant 0 : i32
    return %arg0, %c0_i32 : i32, i32
  }
  func.func @transform_7(%arg0: i32) -> (i32, i32) {
    %c0_i32 = arith.constant 0 : i32
    %c0_i32_0 = arith.constant 0 : i32
    return %arg0, %c0_i32 : i32, i32
  }
}

</mosaic_0001>

<bundles_post_ra>
// kernel: lstm_crf_forward.5
= control target key start
LH: loop header
LB: loop body
LE: loop exit
PB: predicated region body
PF: predicated region fallthrough
CT: control target
= control target key end

     0   :  { %vm63_vm0 = vcmask 261120   ;;  %s223_s1 = inlined_call_operand.vmem [shape: bf16[32,128], index: 1, kind: input, shape index: {}]   ;;  %s224_s2 = inlined_call_operand.vmem [shape: f32[1,128], index: 2, kind: input, shape index: {}]   ;;  %s225_s0 = inlined_call_operand.vmem [shape: bf16[64,32], index: 0, kind: input, shape index: {}]   ;;  %s226_s3 = inlined_call_operand.vmem [shape: f32[64,128], index: 3, kind: output, shape index: {}]  }
   0x1   :  { %v150_v0 = vld [vmem:[%s223_s1 + $0x8] sm:$0xff]  ;;  %v149_v1 = vld [vmem:[%s223_s1] sm:$0xff]  ;;  %v147_v4 = vld [vmem:[%s225_s0 + $0x10] sm:$0xff] }
   0x2   :  { %82 = vmatpush.bf16.msra.mxu0 %v150_v0  ;;  %151 = vmatpush.bf16.msra.mxu1 %v150_v0  ;;  %v145_v2 = vld [vmem:[%s225_s0] sm:$0xff]  ;;  %v146_v3 = vld [vmem:[%s225_s0 + $0x8] sm:$0xff]  ;;  %v148_v5 = vld [vmem:[%s225_s0 + $0x18] sm:$0xff] }
   0x3   :  { %152 = vmatpush.bf16.msra.mxu2 %v150_v0  ;;  %153 = vmatpush.bf16.msra.mxu3 %v150_v0  ;;  %v157_v6 = vld [vmem:[%s224_s2] ss:$0 sm:$0xff] }
   0x6   :  { %83 = vmatpush.bf16.msra.mxu0 %v149_v1  ;;  %154 = vmatpush.bf16.msra.mxu1 %v149_v1 }
   0x7   :  { %155 = vmatpush.bf16.msra.mxu2 %v149_v1  ;;  %156 = vmatpush.bf16.msra.mxu3 %v149_v1 }
   0x9   :  { %141 = vmatmul.msk.bf16.vlgmr.msra.gmra.mxu0 %vm63_vm0, %v145_v2  ;;  %142 = vmatmul.msk.bf16.vlgmr.msra.gmra.mxu1 %vm63_vm0, %v146_v3 }
   0xa   :  { %143 = vmatmul.msk.bf16.vlgmr.msra.gmra.mxu2 %vm63_vm0, %v147_v4  ;;  %144 = vmatmul.msk.bf16.vlgmr.msra.gmra.mxu3 %vm63_vm0, %v148_v5 }
  0x86   :  { %v85_v7 = vpop.f32.mrf.mxu0  ;;  %v90_v8 = vpop.f32.mrf.mxu1 }
  0x87   :  { %v86_v9 = vadd.f32 %v157_v6, %v85_v7  ;;  %v91_v10 = vadd.f32 %v157_v6, %v90_v8 }
  0x89   :  { %105 = vst [vmem:[%s226_s3] sm:$0xff] %v86_v9 }
  0x8a   :  { %107 = vst [vmem:[%s226_s3 + $0x10] sm:$0xff] %v91_v10 }
  0x8d   :  { %v95_v11 = vpop.f32.mrf.mxu2  ;;  %v100_v12 = vpop.f32.mrf.mxu3 }
  0x8e   :  { %v96_v13 = vadd.f32 %v157_v6, %v95_v11  ;;  %v101_v14 = vadd.f32 %v157_v6, %v100_v12  ;;  %v87_v15 = vpop.f32.mrf.mxu0  ;;  %v92_v16 = vpop.f32.mrf.mxu1 }
  0x8f   :  { %v88_v17 = vadd.f32 %v157_v6, %v87_v15  ;;  %v93_v18 = vadd.f32 %v157_v6, %v92_v16 }
  0x90   :  { %109 = vst [vmem:[%s226_s3 + $0x20] sm:$0xff] %v96_v13 }
  0x91   :  { %111 = vst [vmem:[%s226_s3 + $0x30] sm:$0xff] %v101_v14 }
  0x92   :  { %106 = vst [vmem:[%s226_s3 + $0x8] sm:$0xff] %v88_v17 }
  0x93   :  { %108 = vst [vmem:[%s226_s3 + $0x18] sm:$0xff] %v93_v18 }
  0x95   :  { %v97_v19 = vpop.f32.mrf.mxu2  ;;  %v102_v20 = vpop.f32.mrf.mxu3 }
  0x96   :  { %v98_v21 = vadd.f32 %v157_v6, %v97_v19  ;;  %v103_v22 = vadd.f32 %v157_v6, %v102_v20 }
  0x98   :  { %110 = vst [vmem:[%s226_s3 + $0x28] sm:$0xff] %v98_v21 }
  0x99   :  { %112 = vst [vmem:[%s226_s3 + $0x38] sm:$0xff] %v103_v22 }

// kernel: lstm_crf_forward.4
= control target key start
LH: loop header
LB: loop body
LE: loop exit
PB: predicated region body
PF: predicated region fallthrough
CT: control target
= control target key end

     0   :  { %vm72_vm0 = vcmask 261120   ;;  %v1269_v4 = vmov 0   ;;  %vm122_vm1 = vcmask 519168   ;;  %s1273_s17 = smov 32   ;;  %s1274_s18 = smov 80   ;;  %vm183_vm2 = vcmask 130048   ;;  %s1705_s1 = inlined_call_operand.vmem [shape: bf16[32,128], index: 1, kind: input, shape index: {}]   ;;  %s1706_s2 = inlined_call_operand.vmem [shape: bf16[16,64], index: 2, kind: input, shape index: {}]   ;;  %s1707_s4 = inlined_call_operand.vmem [shape: f32[1,128], index: 4, kind: input, shape index: {}]   ;;  %s1708_s0 = inlined_call_operand.vmem [shape: bf16[8,8,32], index: 0, kind: input, shape index: {}]   ;;  %s1709_s3 = inlined_call_operand.vmem [shape: bf16[16,64], index: 3, kind: input, shape index: {}]   ;;  %s1710_s5 = inlined_call_operand.vmem [shape: bf16[8,8,32], index: 5, kind: output, shape index: {0}]   ;;  %s1711_s7 = inlined_call_operand.vmem [shape: f32[8,32], index: 7, kind: output, shape index: {2}]   ;;  %s1712_s6 = inlined_call_operand.vmem [shape: f32[8,32], index: 6, kind: output, shape index: {1}]  }
   0x1   :  { %v1130_v0 = vld [vmem:[%s1705_s1 + $0x8] sm:$0xff]  ;;  %v1322_v1 = vld [vmem:[%s1706_s2] sm:$0xff]  ;;  %v1127_v6 = vld [vmem:[%s1708_s0 + $0x10] sm:$0xff]  ;;  %vm275_vm3 = vcmask 125952   ;;  %vm283_vm4 = vcmask 257152   ;;  %s1275_s25 = smov 112  }
   0x2   :  { %91 = vmatpush.bf16.msra.mxu0 %v1130_v0  ;;  %v1129_v2 = vld [vmem:[%s1705_s1] sm:$0xff]  ;;  %194 = vmatpush.bf16.msra.mxu1 %v1322_v1  ;;  %v1126_v5 = vld [vmem:[%s1708_s0 + $0x8] sm:$0xff]  ;;  %v1128_v7 = vld [vmem:[%s1708_s0 + $0x18] sm:$0xff]  ;;  %vm1041_vm5 = vcmask 261248  }
   0x3   :  { %302 = vmatpush.bf16.msra.mxu3 %v1322_v1  ;;  %v1125_v3 = vld [vmem:[%s1708_s0] sm:$0xff]  ;;  %s1270_s0 = smov 64  }
   0x4   :  { %v1140_v8 = vld [vmem:[%s1707_s4] ss:$0 sm:$0xff]  ;;  %s1272_s4 = smov 16  }
   0x5   :  { %195 = vmatmul.bf16.vlgmr.msra.gmra.mxu1 %v1269_v4  ;;  %v1351_v16 = vld [vmem:[%s1709_s3] sm:$0xff]  ;;  %s1271_s3 = smov 96  }
   0x6   :  { %92 = vmatpush.bf16.msra.mxu0 %v1129_v2  ;;  %217 = vmatpush.bf16.msra.mxu2 %v1351_v16 }
   0x7   :  { %326 = vmatpush.bf16.msrb.mxu1 %v1351_v16  ;;  %434 = vmatpush.bf16.msrb.mxu3 %v1351_v16 }
   0x9   :  { %1085 = vmatmul.msk.bf16.vlgmr.msra.gmra.mxu0 %vm72_vm0, %v1125_v3  ;;  %218 = vmatmul.bf16.vlgmr.msra.gmra.mxu2 %v1269_v4 }
   0xa   :  { %410 = vmatpush.bf16.msrb.mxu2 %v1322_v1  ;;  %967 = vmatpush.bf16.msrb.mxu0 %v1351_v16 }
   0xb   :  { %518 = vmatpush.bf16.msra.mxu1 %v1322_v1 }
   0xe   :  { %542 = vmatpush.bf16.msra.mxu2 %v1351_v16 }
  0x19   :  { %1086 = vmatmul.msk.bf16.gmra.mxu0 %vm72_vm0, %v1126_v5 }
  0x29   :  { %1087 = vmatmul.msk.bf16.gmra.mxu0 %vm72_vm0, %v1127_v6 }
  0x39   :  { %1088 = vmatmul.msk.bf16.gmra.mxu0 %vm72_vm0, %v1128_v7 }
  0x82   :  { %v196_v9 = vpop.f32.mrf.mxu1 }
  0x86   :  { %v94_v10 = vpop.f32.mrf.mxu0 }
  0x87   :  { %v95_v11 = vadd.f32 %v1140_v8, %v94_v10 }
  0x89   :  { %v1344_v12 = vpack.c.bf16 %v95_v11, %v95_v11 }
  0x8a   :  { %v198_v13 = vpop.f32.mrf.mxu1 }
  0x8b   :  { %123 = vst.msk [vmem:[#allocation2] sm:$0xf] %vm122_vm1, %v1344_v12 }
  0x8c   :  { %v219_v40 = vpop.f32.mrf.mxu2 }
  0x8e   :  { %v96_v14 = vpop.f32.mrf.mxu0 }
  0x8f   :  { %v97_v15 = vadd.f32 %v1140_v8, %v96_v14 }
  0x91   :  { %v1353_v17 = vpack.c.bf16 %v97_v15, %v97_v15 }
  0x92   :  { %v175_v32 = vld [vmem:[#allocation2] sm:$0xf] }
  0x93   :  { %124 = vst.msk [vmem:[#allocation2 + $0x4] sm:$0xf] %vm122_vm1, %v1353_v17  ;;  %v176_v34 = vunpack.c.l.bf16 %v175_v32 }
  0x94   :  { %v221_v41 = vpop.f32.mrf.mxu2 }
  0x95   :  { %v200_v37 = vadd.f32 %v196_v9, %v176_v34 }
  0x96   :  { %v99_v18 = vpop.f32.mrf.mxu0 }
  0x97   :  { %v100_v19 = vadd.f32 %v1140_v8, %v99_v18  ;;  %1141 = vtanh.f32 %v200_v37  ;;  %v224_v42 = vsub.f32 0.0, %v200_v37 }
  0x99   :  { %v1364_v20 = vpack.c.bf16 %v100_v19, %v100_v19  ;;  %v225_v44 = vmul.f32 1.442695, %v224_v42 }
  0x9b   :  { %125 = vst.msk [vmem:[#allocation2 + $0x8] sm:$0xf] %vm122_vm1, %v1364_v20  ;;  %1143 = vpow2.f32 %v225_v44 }
  0x9d   :  { %v1142_v39 = vpop.eup %1141 }
  0x9e   :  { %v101_v21 = vpop.f32.mrf.mxu0 }
  0x9f   :  { %v102_v22 = vadd.f32 %v1140_v8, %v101_v21 }
  0xa1   :  { %v1368_v23 = vpack.c.bf16 %v102_v22, %v102_v22  ;;  %v1144_v48 = vpop.eup %1143 }
  0xa2   :  { %v227_v49 = vadd.f32 1.0, %v1144_v48 }
  0xa3   :  { %126 = vst.msk [vmem:[#allocation2 + $0xc] sm:$0xf] %vm122_vm1, %v1368_v23 }
  0xa6   :  { %v104_v24 = vpop.f32.mrf.mxu0 }
  0xa7   :  { %v105_v25 = vadd.f32 %v1140_v8, %v104_v24  ;;  %v1410_v24 = vld [vmem:[#allocation2 + $0x4] sm:$0xff]  }
  0xa9   :  { %v1372_v26 = vpack.c.bf16 %v105_v25, %v105_v25  ;;  %v287_v25 = vunpack.c.l.bf16 %v1410_v24 }
  0xab   :  { %127 = vst.msk [vmem:[#allocation2 + $0x10] sm:$0xf] %vm122_vm1, %v1372_v26 }
  0xae   :  { %v106_v27 = vpop.f32.mrf.mxu0 }
  0xaf   :  { %v107_v28 = vadd.f32 %v1140_v8, %v106_v27 }
  0xb1   :  { %v1376_v29 = vpack.c.bf16 %v107_v28, %v107_v28 }
  0xb3   :  { %128 = vst.msk [vmem:[#allocation2 + $0x14] sm:$0xf] %vm122_vm1, %v1376_v29 }
  0xb6   :  { %v109_v30 = vpop.f32.mrf.mxu0 }
  0xb7   :  { %v110_v31 = vadd.f32 %v1140_v8, %v109_v30 }
  0xb9   :  { %v120_v33 = vpack.c.bf16 %v110_v31, %v110_v31 }
  0xbb   :  { %129 = vst.msk [vmem:[#allocation2 + $0x18] sm:$0xf] %vm122_vm1, %v120_v33 }
  0xbe   :  { %v111_v35 = vpop.f32.mrf.mxu0 }
  0xbf   :  { %v112_v36 = vadd.f32 %v1140_v8, %v111_v35 }
  0xc1   :  { %v121_v38 = vpack.c.bf16 %v112_v36, %v112_v36 }
  0xc3   :  { %130 = vst.msk [vmem:[#allocation2 + $0x1c] sm:$0xf] %vm122_vm1, %v121_v38  ;;  %153 = vrot.lane.b32.xlu0 %v121_v38, %s1270_s0 }
  0xcb   :  { %232 = vrot.lane.b32.xlu0 %v1142_v39, %s1271_s3 }
 0x135   :  { %v154_v43 = vpop.permute.xlu0 %153 }
 0x136   :  { %170 = vst.msk [vmem:[#allocation3 + $0x1c] sm:$0xf] %vm122_vm1, %v154_v43 }
 0x13d   :  { %v202_v45 = vld [vmem:[#allocation3 + $0x1c] sm:$0xf]  ;;  %v233_v51 = vpop.permute.xlu0 %232 }
 0x13e   :  { %v203_v46 = vunpack.c.l.bf16 %v202_v45 }
 0x140   :  { %v223_v47 = vadd.f32 %v219_v40, %v203_v46 }
 0x142   :  { %1145 = vtanh.f32 %v223_v47  ;;  %v247_v54 = vsub.f32 0.0, %v223_v47 }
 0x143   :  { %1147 = vrcp.f32 %v227_v49 }
 0x144   :  { %v248_v55 = vmul.f32 1.442695, %v247_v54 }
 0x146   :  { %1149 = vpow2.f32 %v248_v55 }
 0x148   :  { %v1146_v50 = vpop.eup %1145 }
 0x149   :  { %255 = vrot.lane.b32.xlu1 %v1146_v50, %s1271_s3  ;;  %v1148_v52 = vpop.eup %1147 }
 0x14a   :  { %v235_v53 = vmul.f32 %v1148_v52, %v233_v51  ;;  %v230_v61 = vmul.f32 0.0, %v1148_v52 }
 0x14c   :  { %v1150_v56 = vpop.eup %1149 }
 0x14d   :  { %v250_v57 = vadd.f32 1.0, %v1150_v56 }
 0x14f   :  { %1151 = vrcp.f32 %v250_v57 }
 0x151   :  { %237 = vrot.lane.b32.xlu1 %v235_v53, %s1272_s4 }
 0x155   :  { %v1152_v58 = vpop.eup %1151 }
 0x156   :  { %v253_v2 = vmul.f32 0.0, %v1152_v58 }
 0x1bb   :  { %v256_v59 = vpop.permute.xlu1 %255 }
 0x1bc   :  { %v258_v60 = vmul.f32 %v1152_v58, %v256_v59 }
 0x1be   :  { %260 = vrot.lane.b32.xlu2 %v258_v60, %s1272_s4 }
 0x1c3   :  { %v238_v62 = vpop.permute.xlu1 %237 }
 0x1c4   :  { %v1388_v63 = vadd.f32 %v238_v62, %v230_v61 }
 0x1c6   :  { %1153 = vtanh.f32 %v1388_v63 }
 0x1cc   :  { %v1154_v0 = vpop.eup %1153 }
 0x1cd   :  { %243 = vrot.lane.b32.xlu2 %v1154_v0, %s1273_s17 }
 0x218   :  { %v261_v3 = vpop.permute.xlu2 %260 }
 0x219   :  { %v1392_v4 = vadd.f32 %v261_v3, %v253_v2 }
 0x21b   :  { %1155 = vtanh.f32 %v1392_v4 }
 0x221   :  { %v1156_v5 = vpop.eup %1155 }
 0x222   :  { %266 = vrot.lane.b32.xlu0 %v1156_v5, %s1273_s17 }
 0x227   :  { %v244_v6 = vpop.permute.xlu2 %243 }
 0x228   :  { %v246_v7 = vmul.f32 %v1148_v52, %v244_v6 }
 0x22a   :  { %v1396_v8 = vpack.c.bf16 %v246_v7, %v246_v7  ;;  %151 = vrot.lane.b32.xlu0 %v120_v33, %s1270_s0 }
 0x22c   :  { %v288_v9 = vunpack.c.l.b16 %v1396_v8 }
 0x22e   :  { %v289_v10 = vpack.c.b16 %v288_v9, %v288_v9 }
 0x230   :  { %290 = vrot.lane.b32.xlu1 %v289_v10, %s1274_s18  ;;  %v395_v10 = vunpack.c.h.bf16 %v1410_v24 }
 0x294   :  { %v267_v11 = vpop.permute.xlu0 %266 }
 0x295   :  { %v269_v13 = vmul.f32 %v1152_v58, %v267_v11 }
 0x297   :  { %v1401_v14 = vpack.c.bf16 %v269_v13, %v269_v13 }
 0x299   :  { %v312_v15 = vunpack.c.l.b16 %v1401_v14 }
 0x29b   :  { %v313_v18 = vpack.c.b16 %v312_v15, %v312_v15 }
 0x29c   :  { %v152_v19 = vpop.permute.xlu0 %151 }
 0x29d   :  { %169 = vst.msk [vmem:[#allocation3 + $0x18] sm:$0xf] %vm122_vm1, %v152_v19  ;;  %314 = vrot.lane.b32.xlu2 %v313_v18, %s1274_s18 }
 0x2a2   :  { %v291_v21 = vpop.permute.xlu1 %290 }
 0x2a3   :  { %1098 = vmatmul.msk.bf16.vlgmr.msra.gmra.mxu3 %vm183_vm2, %v291_v21 }
 0x2a4   :  { %626 = vmatpush.bf16.msra.mxu3 %v1322_v1  ;;  %v310_v32 = vld [vmem:[#allocation3 + $0x18] sm:$0xf] }
 0x2a5   :  { %v311_v33 = vunpack.c.l.bf16 %v310_v32 }
 0x2f7   :  { %v315_v22 = vpop.permute.xlu2 %314 }
 0x2f8   :  { %1099 = vmatmul.msk.bf16.vlgmr.msrb.gmra.mxu1 %vm183_vm2, %v315_v22 }
 0x2f9   :  { %650 = vmatpush.bf16.msrb.mxu1 %v1351_v16 }
 0x326   :  { %v304_v27 = vpop.f32.mrf.mxu3 }
 0x327   :  { %v308_v28 = vadd.f32 %v304_v27, %v287_v25 }
 0x329   :  { %1157 = vtanh.f32 %v308_v28  ;;  %v333_v38 = vsub.f32 0.0, %v308_v28 }
 0x32b   :  { %v334_v39 = vmul.f32 1.442695, %v333_v38 }
 0x32e   :  { %v306_v30 = vpop.f32.mrf.mxu3 }
 0x32f   :  { %v1158_v31 = vpop.eup %1157 }
 0x330   :  { %341 = vrot.lane.b32.xlu1 %v1158_v31, %s1271_s3 }
 0x375   :  { %v328_v34 = vpop.f32.mrf.mxu1 }
 0x376   :  { %v332_v35 = vadd.f32 %v328_v34, %v311_v33 }
 0x378   :  { %1159 = vtanh.f32 %v332_v35  ;;  %v356_v45 = vsub.f32 0.0, %v332_v35 }
 0x379   :  { %1161 = vpow2.f32 %v334_v39 }
 0x37a   :  { %v357_v46 = vmul.f32 1.442695, %v356_v45 }
 0x37d   :  { %v330_v36 = vpop.f32.mrf.mxu1 }
 0x37e   :  { %v1160_v37 = vpop.eup %1159 }
 0x37f   :  { %364 = vrot.lane.b32.xlu2 %v1160_v37, %s1271_s3  ;;  %v1162_v40 = vpop.eup %1161 }
 0x380   :  { %v336_v41 = vadd.f32 1.0, %v1162_v40 }
 0x382   :  { %1163 = vrcp.f32 %v336_v41 }
 0x383   :  { %1165 = vpow2.f32 %v357_v46 }
 0x388   :  { %v1164_v42 = vpop.eup %1163 }
 0x389   :  { %v1166_v47 = vpop.eup %1165  ;;  %v339_v52 = vmul.f32 %v1164_v42, %v1388_v63 }
 0x38a   :  { %v359_v48 = vadd.f32 1.0, %v1166_v47 }
 0x38c   :  { %1167 = vrcp.f32 %v359_v48 }
 0x392   :  { %v1168_v49 = vpop.eup %1167 }
 0x393   :  { %v362_v56 = vmul.f32 %v1168_v49, %v1392_v4 }
 0x3a2   :  { %v342_v43 = vpop.permute.xlu1 %341 }
 0x3a3   :  { %v344_v44 = vmul.f32 %v1164_v42, %v342_v43 }
 0x3a5   :  { %346 = vrot.lane.b32.xlu0 %v344_v44, %s1272_s4 }
 0x3d9   :  { %v365_v50 = vpop.permute.xlu2 %364 }
 0x3da   :  { %v367_v51 = vmul.f32 %v1168_v49, %v365_v50 }
 0x3dc   :  { %369 = vrot.lane.b32.xlu1 %v367_v51, %s1272_s4 }
 0x417   :  { %v347_v53 = vpop.permute.xlu0 %346 }
 0x418   :  { %v1418_v54 = vadd.f32 %v347_v53, %v339_v52 }
 0x41a   :  { %1169 = vtanh.f32 %v1418_v54 }
 0x420   :  { %v1170_v55 = vpop.eup %1169 }
 0x421   :  { %352 = vrot.lane.b32.xlu2 %v1170_v55, %s1273_s17 }
 0x44e   :  { %v370_v57 = vpop.permute.xlu1 %369 }
 0x44f   :  { %v1423_v58 = vadd.f32 %v370_v57, %v362_v56 }
 0x451   :  { %1171 = vtanh.f32 %v1423_v58 }
 0x457   :  { %v1172_v59 = vpop.eup %1171 }
 0x458   :  { %375 = vrot.lane.b32.xlu0 %v1172_v59, %s1273_s17 }
 0x460   :  { %149 = vrot.lane.b32.xlu0 %v1376_v29, %s1270_s0 }
 0x47b   :  { %v353_v60 = vpop.permute.xlu2 %352 }
 0x47c   :  { %v355_v61 = vmul.f32 %v1164_v42, %v353_v60 }
 0x47e   :  { %v1429_v62 = vpack.c.bf16 %v355_v61, %v355_v61 }
 0x480   :  { %v396_v63 = vunpack.c.l.b16 %v1429_v62 }
 0x482   :  { %v397_v0 = vpack.c.b16 %v396_v63, %v396_v63 }
 0x484   :  { %398 = vrot.lane.b32.xlu1 %v397_v0, %s1274_s18  ;;  %v1472_v0 = vld [vmem:[#allocation2 + $0xc] sm:$0xff]  }
 0x4ca   :  { %v376_v2 = vpop.permute.xlu0 %375 }
 0x4cb   :  { %v378_v3 = vmul.f32 %v1168_v49, %v376_v2  ;;  %v503_v2 = vunpack.c.l.bf16 %v1472_v0 }
 0x4cd   :  { %v1433_v4 = vpack.c.bf16 %v378_v3, %v378_v3 }
 0x4cf   :  { %v420_v5 = vunpack.c.l.b16 %v1433_v4 }
 0x4d1   :  { %v421_v6 = vpack.c.b16 %v420_v5, %v420_v5 }
 0x4d2   :  { %v150_v7 = vpop.permute.xlu0 %149 }
 0x4d3   :  { %168 = vst.msk [vmem:[#allocation3 + $0x14] sm:$0xf] %vm122_vm1, %v150_v7  ;;  %422 = vrot.lane.b32.xlu2 %v421_v6, %s1274_s18 }
 0x4da   :  { %v418_v19 = vld [vmem:[#allocation3 + $0x14] sm:$0xf] }
 0x4db   :  { %v419_v21 = vunpack.c.l.bf16 %v418_v19 }
 0x4f6   :  { %v399_v29 = vpop.permute.xlu1 %398 }
 0x4f7   :  { %1102 = vmatmul.msk.bf16.vlgmr.msrb.gmra.mxu2 %vm183_vm2, %v399_v29 }
 0x4f8   :  { %732 = vmatpush.bf16.msrb.mxu2 %v1322_v1 }
 0x52d   :  { %v423_v9 = vpop.permute.xlu2 %422 }
 0x52e   :  { %1103 = vmatmul.msk.bf16.vlgmr.msrb.gmra.mxu3 %vm183_vm2, %v423_v9 }
 0x52f   :  { %756 = vmatpush.bf16.msrb.mxu3 %v1351_v16 }
 0x57a   :  { %v412_v11 = vpop.f32.mrf.mxu2 }
 0x57b   :  { %v416_v13 = vadd.f32 %v412_v11, %v395_v10 }
 0x57d   :  { %1173 = vtanh.f32 %v416_v13  ;;  %v441_v30 = vsub.f32 0.0, %v416_v13 }
 0x57f   :  { %v442_v31 = vmul.f32 1.442695, %v441_v30 }
 0x582   :  { %v414_v15 = vpop.f32.mrf.mxu2 }
 0x583   :  { %v1174_v18 = vpop.eup %1173 }
 0x584   :  { %449 = vrot.lane.b32.xlu1 %v1174_v18, %s1271_s3 }
 0x5b1   :  { %v436_v22 = vpop.f32.mrf.mxu3 }
 0x5b2   :  { %v440_v25 = vadd.f32 %v436_v22, %v419_v21 }
 0x5b4   :  { %1175 = vtanh.f32 %v440_v25  ;;  %v464_v36 = vsub.f32 0.0, %v440_v25 }
 0x5b5   :  { %1177 = vpow2.f32 %v442_v31 }
 0x5b6   :  { %v465_v37 = vmul.f32 1.442695, %v464_v36 }
 0x5b9   :  { %v438_v27 = vpop.f32.mrf.mxu3 }
 0x5ba   :  { %v1176_v28 = vpop.eup %1175 }
 0x5bb   :  { %472 = vrot.lane.b32.xlu2 %v1176_v28, %s1271_s3  ;;  %v1178_v24 = vpop.eup %1177 }
 0x5bc   :  { %v444_v32 = vadd.f32 1.0, %v1178_v24 }
 0x5be   :  { %1179 = vrcp.f32 %v444_v32 }
 0x5bf   :  { %1181 = vpow2.f32 %v465_v37 }
 0x5c4   :  { %v1180_v33 = vpop.eup %1179 }
 0x5c5   :  { %v1182_v38 = vpop.eup %1181  ;;  %v447_v43 = vmul.f32 %v1180_v33, %v1418_v54 }
 0x5c6   :  { %v467_v39 = vadd.f32 1.0, %v1182_v38 }
 0x5c8   :  { %1183 = vrcp.f32 %v467_v39 }
 0x5ce   :  { %v1184_v40 = vpop.eup %1183 }
 0x5cf   :  { %v470_v47 = vmul.f32 %v1184_v40, %v1423_v58 }
 0x5f6   :  { %v450_v34 = vpop.permute.xlu1 %449 }
 0x5f7   :  { %v452_v35 = vmul.f32 %v1180_v33, %v450_v34 }
 0x5f9   :  { %454 = vrot.lane.b32.xlu0 %v452_v35, %s1272_s4 }
 0x615   :  { %v473_v41 = vpop.permute.xlu2 %472 }
 0x616   :  { %v475_v42 = vmul.f32 %v1184_v40, %v473_v41 }
 0x618   :  { %477 = vrot.lane.b32.xlu1 %v475_v42, %s1272_s4 }
 0x66b   :  { %v455_v44 = vpop.permute.xlu0 %454 }
 0x66c   :  { %v1448_v45 = vadd.f32 %v455_v44, %v447_v43 }
 0x66e   :  { %1185 = vtanh.f32 %v1448_v45 }
 0x674   :  { %v1186_v46 = vpop.eup %1185 }
 0x675   :  { %460 = vrot.lane.b32.xlu2 %v1186_v46, %s1273_s17 }
 0x68a   :  { %v478_v48 = vpop.permute.xlu1 %477 }
 0x68b   :  { %v1453_v49 = vadd.f32 %v478_v48, %v470_v47 }
 0x68d   :  { %1187 = vtanh.f32 %v1453_v49 }
 0x693   :  { %v1188_v50 = vpop.eup %1187 }
 0x694   :  { %483 = vrot.lane.b32.xlu0 %v1188_v50, %s1273_s17 }
 0x69c   :  { %147 = vrot.lane.b32.xlu0 %v1372_v26, %s1270_s0 }
 0x6cf   :  { %v461_v51 = vpop.permute.xlu2 %460 }
 0x6d0   :  { %v463_v52 = vmul.f32 %v1180_v33, %v461_v51 }
 0x6d2   :  { %v1459_v53 = vpack.c.bf16 %v463_v52, %v463_v52 }
 0x6d4   :  { %v504_v54 = vunpack.c.l.b16 %v1459_v53 }
 0x6d6   :  { %v505_v55 = vpack.c.b16 %v504_v54, %v504_v54 }
 0x6d8   :  { %506 = vrot.lane.b32.xlu1 %v505_v55, %s1274_s18 }
 0x706   :  { %v484_v56 = vpop.permute.xlu0 %483 }
 0x707   :  { %v486_v57 = vmul.f32 %v1184_v40, %v484_v56  ;;  %v611_v56 = vunpack.c.h.bf16 %v1472_v0 }
 0x709   :  { %v1463_v58 = vpack.c.bf16 %v486_v57, %v486_v57 }
 0x70b   :  { %v528_v59 = vunpack.c.l.b16 %v1463_v58 }
 0x70d   :  { %v529_v60 = vpack.c.b16 %v528_v59, %v528_v59 }
 0x70e   :  { %v148_v61 = vpop.permute.xlu0 %147 }
 0x70f   :  { %167 = vst.msk [vmem:[#allocation3 + $0x10] sm:$0xf] %vm122_vm1, %v148_v61  ;;  %530 = vrot.lane.b32.xlu2 %v529_v60, %s1274_s18 }
 0x716   :  { %v526_v29 = vld [vmem:[#allocation3 + $0x10] sm:$0xf] }
 0x717   :  { %v527_v9 = vunpack.c.l.bf16 %v526_v29 }
 0x74a   :  { %v507_v26 = vpop.permute.xlu1 %506 }
 0x74b   :  { %1106 = vmatmul.msk.bf16.vlgmr.msra.gmra.mxu1 %vm183_vm2, %v507_v26 }
 0x74c   :  { %838 = vmatpush.bf16.msra.mxu1 %v1322_v1 }
 0x769   :  { %v531_v63 = vpop.permute.xlu2 %530 }
 0x76a   :  { %1107 = vmatmul.msk.bf16.vlgmr.msra.gmra.mxu2 %vm183_vm2, %v531_v63 }
 0x76b   :  { %862 = vmatpush.bf16.msra.mxu2 %v1351_v16 }
 0x7c8   :  { %v520_v3 = vpop.f32.mrf.mxu1 }
 0x7c9   :  { %v524_v5 = vadd.f32 %v520_v3, %v503_v2 }
 0x7cb   :  { %1189 = vtanh.f32 %v524_v5  ;;  %v549_v16 = vsub.f32 0.0, %v524_v5 }
 0x7cd   :  { %v550_v18 = vmul.f32 1.442695, %v549_v16 }
 0x7d0   :  { %v522_v6 = vpop.f32.mrf.mxu1 }
 0x7d1   :  { %v1190_v7 = vpop.eup %1189 }
 0x7d2   :  { %557 = vrot.lane.b32.xlu1 %v1190_v7, %s1271_s3 }
 0x7ed   :  { %v544_v10 = vpop.f32.mrf.mxu2 }
 0x7ee   :  { %v548_v11 = vadd.f32 %v544_v10, %v527_v9 }
 0x7f0   :  { %1191 = vtanh.f32 %v548_v11  ;;  %v572_v21 = vsub.f32 0.0, %v548_v11 }
 0x7f1   :  { %1193 = vpow2.f32 %v550_v18 }
 0x7f2   :  { %v573_v25 = vmul.f32 1.442695, %v572_v21 }
 0x7f5   :  { %v546_v13 = vpop.f32.mrf.mxu2 }
 0x7f6   :  { %v1192_v15 = vpop.eup %1191 }
 0x7f7   :  { %580 = vrot.lane.b32.xlu2 %v1192_v15, %s1271_s3  ;;  %v1194_v19 = vpop.eup %1193 }
 0x7f8   :  { %v552_v22 = vadd.f32 1.0, %v1194_v19 }
 0x7fa   :  { %1195 = vrcp.f32 %v552_v22 }
 0x7fb   :  { %1197 = vpow2.f32 %v573_v25 }
 0x800   :  { %v1196_v27 = vpop.eup %1195 }
 0x801   :  { %v1198_v28 = vpop.eup %1197  ;;  %v555_v35 = vmul.f32 %v1196_v27, %v1448_v45 }
 0x802   :  { %v575_v24 = vadd.f32 1.0, %v1198_v28 }
 0x804   :  { %1199 = vrcp.f32 %v575_v24 }
 0x80a   :  { %v1200_v32 = vpop.eup %1199 }
 0x80b   :  { %v578_v39 = vmul.f32 %v1200_v32, %v1453_v49 }
 0x844   :  { %v558_v30 = vpop.permute.xlu1 %557 }
 0x845   :  { %v560_v31 = vmul.f32 %v1196_v27, %v558_v30 }
 0x847   :  { %562 = vrot.lane.b32.xlu0 %v560_v31, %s1272_s4 }
 0x851   :  { %v581_v33 = vpop.permute.xlu2 %580 }
 0x852   :  { %v583_v34 = vmul.f32 %v1200_v32, %v581_v33 }
 0x854   :  { %585 = vrot.lane.b32.xlu1 %v583_v34, %s1272_s4 }
 0x8b9   :  { %v563_v36 = vpop.permute.xlu0 %562 }
 0x8ba   :  { %v1480_v37 = vadd.f32 %v563_v36, %v555_v35 }
 0x8bc   :  { %1201 = vtanh.f32 %v1480_v37 }
 0x8c2   :  { %v1202_v38 = vpop.eup %1201 }
 0x8c3   :  { %568 = vrot.lane.b32.xlu2 %v1202_v38, %s1273_s17 }
 0x8c6   :  { %v586_v40 = vpop.permute.xlu1 %585 }
 0x8c7   :  { %v588_v41 = vadd.f32 %v586_v40, %v578_v39 }
 0x8c9   :  { %1203 = vtanh.f32 %v588_v41 }
 0x8cf   :  { %v1204_v42 = vpop.eup %1203 }
 0x8d0   :  { %591 = vrot.lane.b32.xlu0 %v1204_v42, %s1273_s17 }
 0x8d8   :  { %145 = vrot.lane.b32.xlu0 %v1368_v23, %s1270_s0 }
 0x91d   :  { %v569_v43 = vpop.permute.xlu2 %568 }
 0x91e   :  { %v571_v44 = vmul.f32 %v1196_v27, %v569_v43 }
 0x920   :  { %v1488_v45 = vpack.c.bf16 %v571_v44, %v571_v44 }
 0x922   :  { %v612_v46 = vunpack.c.l.b16 %v1488_v45 }
 0x924   :  { %v613_v47 = vpack.c.b16 %v612_v46, %v612_v46 }
 0x926   :  { %614 = vrot.lane.b32.xlu1 %v613_v47, %s1274_s18 }
 0x942   :  { %v592_v48 = vpop.permute.xlu0 %591 }
 0x943   :  { %v594_v49 = vmul.f32 %v1200_v32, %v592_v48 }
 0x945   :  { %v1492_v50 = vpack.c.bf16 %v594_v49, %v594_v49 }
 0x947   :  { %v636_v51 = vunpack.c.l.b16 %v1492_v50 }
 0x949   :  { %v637_v52 = vpack.c.b16 %v636_v51, %v636_v51 }
 0x94a   :  { %v146_v54 = vpop.permute.xlu0 %145 }
 0x94b   :  { %166 = vst.msk [vmem:[#allocation3 + $0xc] sm:$0xf] %vm122_vm1, %v146_v54  ;;  %638 = vrot.lane.b32.xlu2 %v637_v52, %s1274_s18 }
 0x952   :  { %v634_v60 = vld [vmem:[#allocation3 + $0xc] sm:$0xf] }
 0x953   :  { %v635_v61 = vunpack.c.l.bf16 %v634_v60 }
 0x998   :  { %v615_v23 = vpop.permute.xlu1 %614 }
 0x999   :  { %1110 = vmatmul.msk.bf16.vlgmr.msra.gmra.mxu3 %vm183_vm2, %v615_v23  ;;  %v1528_v23 = vld [vmem:[#allocation2 + $0x14] sm:$0xff]  }
 0x99a   :  { %944 = vmatpush.bf16.msra.mxu3 %v1322_v1 }
 0x9a5   :  { %v639_v55 = vpop.permute.xlu2 %638 }
 0x9a6   :  { %1111 = vmatmul.msk.bf16.vlgmr.msrb.gmra.mxu1 %vm183_vm2, %v639_v55  ;;  %v717_v55 = vunpack.c.l.bf16 %v1528_v23 }
 0xa1c   :  { %v628_v57 = vpop.f32.mrf.mxu3 }
 0xa1d   :  { %v632_v59 = vadd.f32 %v628_v57, %v611_v56 }
 0xa1f   :  { %1205 = vtanh.f32 %v632_v59  ;;  %v657_v29 = vsub.f32 0.0, %v632_v59 }
 0xa21   :  { %v658_v10 = vmul.f32 1.442695, %v657_v29 }
 0xa23   :  { %v652_v26 = vpop.f32.mrf.mxu1 }
 0xa24   :  { %v656_v63 = vadd.f32 %v652_v26, %v635_v61  ;;  %v630_v2 = vpop.f32.mrf.mxu3 }
 0xa25   :  { %v1206_v3 = vpop.eup %1205 }
 0xa26   :  { %1207 = vtanh.f32 %v656_v63  ;;  %665 = vrot.lane.b32.xlu1 %v1206_v3, %s1271_s3  ;;  %v680_v1 = vsub.f32 0.0, %v656_v63 }
 0xa28   :  { %v681_v7 = vmul.f32 1.442695, %v680_v1 }
 0xa2a   :  { %1209 = vpow2.f32 %v681_v7 }
 0xa2b   :  { %v654_v5 = vpop.f32.mrf.mxu1 }
 0xa2c   :  { %v1208_v6 = vpop.eup %1207 }
 0xa2d   :  { %688 = vrot.lane.b32.xlu2 %v1208_v6, %s1271_s3 }
 0xa30   :  { %v1210_v0 = vpop.eup %1209 }
 0xa31   :  { %v683_v9 = vadd.f32 1.0, %v1210_v0 }
 0xa33   :  { %1211 = vrcp.f32 %v683_v9 }
 0xa34   :  { %1213 = vpow2.f32 %v658_v10 }
 0xa39   :  { %v1212_v11 = vpop.eup %1211 }
 0xa3a   :  { %v1214_v16 = vpop.eup %1213  ;;  %v686_v25 = vmul.f32 %v1212_v11, %v588_v41 }
 0xa3b   :  { %v660_v18 = vadd.f32 1.0, %v1214_v16 }
 0xa3d   :  { %1215 = vrcp.f32 %v660_v18 }
 0xa43   :  { %v1216_v19 = vpop.eup %1215 }
 0xa44   :  { %v663_v31 = vmul.f32 %v1216_v19, %v1480_v37 }
 0xa87   :  { %v689_v13 = vpop.permute.xlu2 %688 }
 0xa88   :  { %v691_v15 = vmul.f32 %v1212_v11, %v689_v13 }
 0xa8a   :  { %693 = vrot.lane.b32.xlu1 %v691_v15, %s1272_s4 }
 0xa98   :  { %v666_v21 = vpop.permute.xlu1 %665 }
 0xa99   :  { %v668_v22 = vmul.f32 %v1216_v19, %v666_v21 }
 0xa9b   :  { %670 = vrot.lane.b32.xlu0 %v668_v22, %s1272_s4 }
 0xafc   :  { %v694_v27 = vpop.permute.xlu1 %693 }
 0xafd   :  { %v1505_v28 = vadd.f32 %v694_v27, %v686_v25 }
 0xaff   :  { %1217 = vtanh.f32 %v1505_v28 }
 0xb05   :  { %v1218_v30 = vpop.eup %1217 }
 0xb06   :  { %699 = vrot.lane.b32.xlu0 %v1218_v30, %s1273_s17 }
 0xb0d   :  { %v671_v24 = vpop.permute.xlu0 %670 }
 0xb0e   :  { %v1510_v32 = vadd.f32 %v671_v24, %v663_v31  ;;  %143 = vrot.lane.b32.xlu0 %v1364_v20, %s1270_s0 }
 0xb10   :  { %1219 = vtanh.f32 %v1510_v32 }
 0xb16   :  { %v1220_v33 = vpop.eup %1219 }
 0xb17   :  { %676 = vrot.lane.b32.xlu2 %v1220_v33, %s1273_s17 }
 0xb71   :  { %v677_v34 = vpop.permute.xlu2 %676 }
 0xb72   :  { %v679_v35 = vmul.f32 %v1216_v19, %v677_v34 }
 0xb74   :  { %v1516_v36 = vpack.c.bf16 %v679_v35, %v679_v35 }
 0xb76   :  { %v718_v38 = vunpack.c.l.b16 %v1516_v36 }
 0xb78   :  { %v719_v39 = vpack.c.b16 %v718_v38, %v718_v38  ;;  %v700_v40 = vpop.permute.xlu0 %699 }
 0xb79   :  { %v702_v37 = vmul.f32 %v1212_v11, %v700_v40 }
 0xb7a   :  { %720 = vrot.lane.b32.xlu1 %v719_v39, %s1274_s18 }
 0xb7b   :  { %v1520_v41 = vpack.c.bf16 %v702_v37, %v702_v37 }
 0xb7d   :  { %v742_v20 = vunpack.c.l.b16 %v1520_v41 }
 0xb7f   :  { %v743_v42 = vpack.c.b16 %v742_v20, %v742_v20 }
 0xb80   :  { %v144_v43 = vpop.permute.xlu0 %143 }
 0xb81   :  { %165 = vst.msk [vmem:[#allocation3 + $0x8] sm:$0xf] %vm122_vm1, %v144_v43  ;;  %744 = vrot.lane.b32.xlu2 %v743_v42, %s1274_s18 }
 0xb88   :  { %v740_v47 = vld [vmem:[#allocation3 + $0x8] sm:$0xf] }
 0xb89   :  { %v741_v48 = vunpack.c.l.bf16 %v740_v47  ;;  %v823_v47 = vunpack.c.h.bf16 %v1528_v23 }
 0xbdb   :  { %v745_v44 = vpop.permute.xlu2 %744 }
 0xbdc   :  { %1115 = vmatmul.msk.bf16.vlgmr.msrb.gmra.mxu3 %vm183_vm2, %v745_v44 }
 0xbec   :  { %v721_v46 = vpop.permute.xlu1 %720 }
 0xbed   :  { %1114 = vmatmul.msk.bf16.vlgmr.msrb.gmra.mxu2 %vm183_vm2, %v721_v46 }
 0xc5f   :  { %v758_v49 = vpop.f32.mrf.mxu3 }
 0xc60   :  { %v762_v51 = vadd.f32 %v758_v49, %v741_v48 }
 0xc62   :  { %1221 = vtanh.f32 %v762_v51  ;;  %v786_v61 = vsub.f32 0.0, %v762_v51 }
 0xc64   :  { %v787_v26 = vmul.f32 1.442695, %v786_v61 }
 0xc67   :  { %v760_v52 = vpop.f32.mrf.mxu3 }
 0xc68   :  { %v1222_v54 = vpop.eup %1221 }
 0xc69   :  { %794 = vrot.lane.b32.xlu2 %v1222_v54, %s1271_s3 }
 0xc70   :  { %v734_v56 = vpop.f32.mrf.mxu2 }
 0xc71   :  { %v738_v57 = vadd.f32 %v734_v56, %v717_v55 }
 0xc73   :  { %1223 = vtanh.f32 %v738_v57  ;;  %v763_v1 = vsub.f32 0.0, %v738_v57 }
 0xc74   :  { %1225 = vpow2.f32 %v787_v26 }
 0xc75   :  { %v764_v7 = vmul.f32 1.442695, %v763_v1 }
 0xc78   :  { %v736_v59 = vpop.f32.mrf.mxu2 }
 0xc79   :  { %v1224_v60 = vpop.eup %1223 }
 0xc7a   :  { %771 = vrot.lane.b32.xlu1 %v1224_v60, %s1271_s3  ;;  %v1226_v63 = vpop.eup %1225 }
 0xc7b   :  { %v789_v2 = vadd.f32 1.0, %v1226_v63 }
 0xc7d   :  { %1227 = vrcp.f32 %v789_v2 }
 0xc7e   :  { %1229 = vpow2.f32 %v764_v7 }
 0xc83   :  { %v1228_v3 = vpop.eup %1227 }
 0xc84   :  { %v1230_v0 = vpop.eup %1229  ;;  %v792_v13 = vmul.f32 %v1228_v3, %v1505_v28 }
 0xc85   :  { %v766_v29 = vadd.f32 1.0, %v1230_v0 }
 0xc87   :  { %1231 = vrcp.f32 %v766_v29 }
 0xc8d   :  { %v1232_v9 = vpop.eup %1231 }
 0xc8e   :  { %v769_v19 = vmul.f32 %v1232_v9, %v1510_v32 }
 0xcc3   :  { %v795_v5 = vpop.permute.xlu2 %794 }
 0xcc4   :  { %v797_v6 = vmul.f32 %v1228_v3, %v795_v5 }
 0xcc6   :  { %799 = vrot.lane.b32.xlu1 %v797_v6, %s1272_s4 }
 0xcec   :  { %v772_v10 = vpop.permute.xlu1 %771 }
 0xced   :  { %v774_v11 = vmul.f32 %v1232_v9, %v772_v10 }
 0xcef   :  { %776 = vrot.lane.b32.xlu0 %v774_v11, %s1272_s4 }
 0xd38   :  { %v800_v15 = vpop.permute.xlu1 %799 }
 0xd39   :  { %v1535_v16 = vadd.f32 %v800_v15, %v792_v13 }
 0xd3b   :  { %1233 = vtanh.f32 %v1535_v16 }
 0xd41   :  { %v1234_v18 = vpop.eup %1233 }
 0xd42   :  { %805 = vrot.lane.b32.xlu0 %v1234_v18, %s1273_s17 }
 0xd4a   :  { %141 = vrot.lane.b32.xlu0 %v1353_v17, %s1270_s0 }
 0xd61   :  { %v777_v21 = vpop.permute.xlu0 %776 }
 0xd62   :  { %v1542_v22 = vadd.f32 %v777_v21, %v769_v19 }
 0xd64   :  { %1235 = vtanh.f32 %v1542_v22 }
 0xd6a   :  { %v1236_v25 = vpop.eup %1235 }
 0xd6b   :  { %782 = vrot.lane.b32.xlu2 %v1236_v25, %s1273_s17 }
 0xdb4   :  { %v806_v27 = vpop.permute.xlu0 %805 }
 0xdb5   :  { %v808_v28 = vmul.f32 %v1228_v3, %v806_v27 }
 0xdb7   :  { %v1546_v30 = vpack.c.bf16 %v808_v28, %v808_v28 }
 0xdb9   :  { %v848_v31 = vunpack.c.l.b16 %v1546_v30 }
 0xdbb   :  { %v849_v24 = vpack.c.b16 %v848_v31, %v848_v31 }
 0xdbc   :  { %v142_v33 = vpop.permute.xlu0 %141 }
 0xdbd   :  { %164 = vst.msk [vmem:[#allocation3 + $0x4] sm:$0xf] %vm122_vm1, %v142_v33  ;;  %850 = vrot.lane.b32.xlu2 %v849_v24, %s1274_s18 }
 0xdc4   :  { %v846_v37 = vld [vmem:[#allocation3 + $0x4] sm:$0xf] }
 0xdc5   :  { %v783_v17 = vpop.permute.xlu2 %782  ;;  %v847_v20 = vunpack.c.l.bf16 %v846_v37  ;;  %v928_v37 = vld [vmem:[#allocation2 + $0x1c] sm:$0xf] }
 0xdc6   :  { %v785_v32 = vmul.f32 %v1232_v9, %v783_v17 }
 0xdc8   :  { %v1551_v34 = vpack.c.bf16 %v785_v32, %v785_v32 }
 0xdca   :  { %v824_v35 = vunpack.c.l.b16 %v1551_v34 }
 0xdcc   :  { %v825_v38 = vpack.c.b16 %v824_v35, %v824_v35 }
 0xdce   :  { %826 = vrot.lane.b32.xlu1 %v825_v38, %s1274_s18 }
 0xe17   :  { %v851_v39 = vpop.permute.xlu2 %850 }
 0xe18   :  { %1119 = vmatmul.msk.bf16.vlgmr.msra.gmra.mxu2 %vm183_vm2, %v851_v39 }
 0xe40   :  { %v827_v40 = vpop.permute.xlu1 %826 }
 0xe41   :  { %1118 = vmatmul.msk.bf16.vlgmr.msra.gmra.mxu1 %vm183_vm2, %v827_v40 }
 0xe9b   :  { %v864_v42 = vpop.f32.mrf.mxu2 }
 0xe9c   :  { %v868_v43 = vadd.f32 %v864_v42, %v847_v20  ;;  %v929_v20 = vunpack.c.l.bf16 %v928_v37 }
 0xe9e   :  { %1237 = vtanh.f32 %v868_v43  ;;  %v892_v54 = vsub.f32 0.0, %v868_v43 }
 0xea0   :  { %v893_v55 = vmul.f32 1.442695, %v892_v54 }
 0xea3   :  { %v866_v44 = vpop.f32.mrf.mxu2 }
 0xea4   :  { %v1238_v46 = vpop.eup %1237 }
 0xea5   :  { %900 = vrot.lane.b32.xlu2 %v1238_v46, %s1271_s3 }
 0xebe   :  { %v840_v48 = vpop.f32.mrf.mxu1 }
 0xebf   :  { %v844_v49 = vadd.f32 %v840_v48, %v823_v47 }
 0xec1   :  { %1239 = vtanh.f32 %v844_v49  ;;  %v869_v26 = vsub.f32 0.0, %v844_v49 }
 0xec2   :  { %1241 = vpow2.f32 %v893_v55 }
 0xec3   :  { %v870_v23 = vmul.f32 1.442695, %v869_v26 }
 0xec6   :  { %v842_v51 = vpop.f32.mrf.mxu1 }
 0xec7   :  { %v1240_v52 = vpop.eup %1239 }
 0xec8   :  { %877 = vrot.lane.b32.xlu1 %v1240_v52, %s1271_s3  ;;  %v1242_v56 = vpop.eup %1241 }
 0xec9   :  { %v895_v57 = vadd.f32 1.0, %v1242_v56 }
 0xecb   :  { %1243 = vrcp.f32 %v895_v57 }
 0xecc   :  { %1245 = vpow2.f32 %v870_v23 }
 0xed1   :  { %v1244_v59 = vpop.eup %1243 }
 0xed2   :  { %v1246_v63 = vpop.eup %1245  ;;  %v898_v1 = vmul.f32 %v1244_v59, %v1535_v16 }
 0xed3   :  { %v872_v2 = vadd.f32 1.0, %v1246_v63 }
 0xed5   :  { %1247 = vrcp.f32 %v872_v2 }
 0xedb   :  { %v1248_v3 = vpop.eup %1247 }
 0xedc   :  { %v875_v9 = vmul.f32 %v1248_v3, %v1542_v22 }
 0xeff   :  { %v901_v60 = vpop.permute.xlu2 %900 }
 0xf00   :  { %v903_v61 = vmul.f32 %v1244_v59, %v901_v60 }
 0xf02   :  { %905 = vrot.lane.b32.xlu1 %v903_v61, %s1272_s4 }
 0xf3a   :  { %v878_v5 = vpop.permute.xlu1 %877 }
 0xf3b   :  { %v880_v6 = vmul.f32 %v1248_v3, %v878_v5 }
 0xf3d   :  { %882 = vrot.lane.b32.xlu0 %v880_v6, %s1272_s4 }
 0xf74   :  { %v906_v7 = vpop.permute.xlu1 %905 }
 0xf75   :  { %v1563_v0 = vadd.f32 %v906_v7, %v898_v1 }
 0xf77   :  { %1249 = vtanh.f32 %v1563_v0 }
 0xf7d   :  { %v1250_v29 = vpop.eup %1249 }
 0xf7e   :  { %911 = vrot.lane.b32.xlu0 %v1250_v29, %s1273_s17 }
 0xf86   :  { %139 = vrot.lane.b32.xlu0 %v1344_v12, %s1270_s0 }
 0xfaf   :  { %v883_v10 = vpop.permute.xlu0 %882 }
 0xfb0   :  { %v1570_v11 = vadd.f32 %v883_v10, %v875_v9 }
 0xfb2   :  { %1251 = vtanh.f32 %v1570_v11 }
 0xfb8   :  { %v1252_v13 = vpop.eup %1251 }
 0xfb9   :  { %888 = vrot.lane.b32.xlu2 %v1252_v13, %s1273_s17 }
 0xff0   :  { %v912_v15 = vpop.permute.xlu0 %911 }
 0xff1   :  { %v914_v16 = vmul.f32 %v1244_v59, %v912_v15 }
 0xff3   :  { %v1574_v18 = vpack.c.bf16 %v914_v16, %v914_v16 }
 0xff5   :  { %v953_v19 = vunpack.c.l.b16 %v1574_v18 }
 0xff7   :  { %v954_v21 = vpack.c.b16 %v953_v19, %v953_v19 }
 0xff8   :  { %v140_v25 = vpop.permute.xlu0 %139 }
 0xff9   :  { %163 = vst.msk [vmem:[#allocation3] sm:$0xf] %vm122_vm1, %v140_v25  ;;  %955 = vrot.lane.b32.xlu2 %v954_v21, %s1274_s18 }
0x1000   :  { %v951_v17 = vld [vmem:[#allocation3] sm:$0xf] }
0x1001   :  { %v952_v32 = vunpack.c.l.bf16 %v951_v17 }
0x1013   :  { %v889_v12 = vpop.permute.xlu2 %888 }
0x1014   :  { %v891_v22 = vmul.f32 %v1248_v3, %v889_v12 }
0x1016   :  { %v1579_v27 = vpack.c.bf16 %v891_v22, %v891_v22 }
0x1018   :  { %v930_v28 = vunpack.c.l.b16 %v1579_v27 }
0x101a   :  { %v931_v31 = vpack.c.b16 %v930_v28, %v930_v28 }
0x101c   :  { %932 = vrot.lane.b32.xlu1 %v931_v31, %s1274_s18 }
0x1053   :  { %v956_v24 = vpop.permute.xlu2 %955 }
0x1054   :  { %1123 = vmatmul.msk.bf16.vlgmr.msrb.gmra.mxu0 %vm183_vm2, %v956_v24 }
0x108e   :  { %v933_v33 = vpop.permute.xlu1 %932 }
0x108f   :  { %1122 = vmatmul.msk.bf16.vlgmr.msra.gmra.mxu3 %vm183_vm2, %v933_v33 }
0x10d1   :  { %v969_v35 = vpop.f32.mrf.mxu0 }
0x10d2   :  { %v973_v38 = vadd.f32 %v969_v35, %v952_v32 }
0x10d4   :  { %1253 = vtanh.f32 %v973_v38  ;;  %v997_v44 = vsub.f32 0.0, %v973_v38 }
0x10d6   :  { %v998_v48 = vmul.f32 1.442695, %v997_v44 }
0x10d9   :  { %v971_v39 = vpop.f32.mrf.mxu0 }
0x10da   :  { %v1254_v40 = vpop.eup %1253 }
0x10db   :  { %1005 = vrot.lane.b32.xlu2 %v1254_v40, %s1271_s3 }
0x1112   :  { %v946_v42 = vpop.f32.mrf.mxu3 }
0x1113   :  { %v950_v43 = vadd.f32 %v946_v42, %v929_v20 }
0x1115   :  { %1255 = vtanh.f32 %v950_v43  ;;  %v974_v56 = vsub.f32 0.0, %v950_v43 }
0x1116   :  { %1257 = vpow2.f32 %v998_v48 }
0x1117   :  { %v975_v57 = vmul.f32 1.442695, %v974_v56 }
0x111a   :  { %v948_v46 = vpop.f32.mrf.mxu3 }
0x111b   :  { %v1256_v47 = vpop.eup %1255 }
0x111c   :  { %982 = vrot.lane.b32.xlu1 %v1256_v47, %s1271_s3  ;;  %v1258_v49 = vpop.eup %1257 }
0x111d   :  { %v1000_v51 = vadd.f32 1.0, %v1258_v49 }
0x111f   :  { %1259 = vrcp.f32 %v1000_v51 }
0x1120   :  { %1261 = vpow2.f32 %v975_v57 }
0x1125   :  { %v1260_v52 = vpop.eup %1259 }
0x1126   :  { %v1262_v59 = vpop.eup %1261  ;;  %v1003_v63 = vmul.f32 %v1260_v52, %v1563_v0 }
0x1127   :  { %v977_v60 = vadd.f32 1.0, %v1262_v59 }
0x1129   :  { %1263 = vrcp.f32 %v977_v60 }
0x112f   :  { %v1264_v61 = vpop.eup %1263 }
0x1130   :  { %v980_v6 = vmul.f32 %v1264_v61, %v1570_v11 }
0x1135   :  { %v1006_v54 = vpop.permute.xlu2 %1005 }
0x1136   :  { %v1008_v55 = vmul.f32 %v1260_v52, %v1006_v54 }
0x1138   :  { %1010 = vrot.lane.b32.xlu1 %v1008_v55, %s1272_s4 }
0x1140   :  { %272 = vrot.lane.b32.xlu1 %v1396_v8, %s1274_s18 }
0x1148   :  { %388 = vrot.lane.b32.xlu1 %v1433_v4, %s1271_s3 }
0x1150   :  { %597 = vrot.lane.b32.xlu1 %v1488_v45, %s1274_s18 }
0x118e   :  { %v983_v26 = vpop.permute.xlu1 %982 }
0x118f   :  { %v985_v23 = vmul.f32 %v1264_v61, %v983_v26 }
0x1191   :  { %987 = vrot.lane.b32.xlu0 %v985_v23, %s1272_s4 }
0x11aa   :  { %v1011_v8 = vpop.permute.xlu1 %1010 }
0x11ab   :  { %v1013_v2 = vadd.f32 %v1011_v8, %v1003_v63 }
0x11ad   :  { %1265 = vtanh.f32 %v1013_v2 }
0x11b2   :  { %v273_v4 = vpop.permute.xlu1 %272 }
0x11b3   :  { %v1266_v3 = vpop.eup %1265  ;;  %276 = vst.msk [vmem:[%s1710_s5] sm:$0xf] %vm275_vm3, %v273_v4 }
0x11b4   :  { %1016 = vrot.lane.b32.xlu0 %v1266_v3, %s1273_s17 }
0x11ba   :  { %v389_v45 = vpop.permute.xlu1 %388 }
0x11bb   :  { %1101 = vst.msk [vmem:[%s1710_s5 + $0x18] sm:$0xf] %vm283_vm4, %v389_v45 }
0x11bc   :  { %381 = vrot.lane.b32.xlu0 %v1429_v62, %s1274_s18 }
0x11c2   :  { %v598_v5 = vpop.permute.xlu1 %597 }
0x11c3   :  { %1108 = vst.msk [vmem:[%s1710_s5 + $0xc] sm:$0xf] %vm275_vm3, %v598_v5 }
0x11c4   :  { %496 = vrot.lane.b32.xlu0 %v1463_v58, %s1271_s3 }
0x1203   :  { %v988_v1 = vpop.permute.xlu0 %987 }
0x1204   :  { %v990_v7 = vadd.f32 %v988_v1, %v980_v6 }
0x1206   :  { %1267 = vtanh.f32 %v990_v7  ;;  %1044 = vrot.lane.b32.xlu1 %v990_v7, %s1275_s25 }
0x120c   :  { %v1268_v0 = vpop.eup %1267 }
0x120d   :  { %993 = vrot.lane.b32.xlu2 %v1268_v0, %s1273_s17 }
0x120e   :  { %811 = vrot.lane.b32.xlu1 %v1551_v34, %s1274_s18 }
0x1215   :  { %279 = vrot.lane.b32.xlu2 %v1401_v14, %s1271_s3 }
0x1216   :  { %923 = vrot.lane.b32.xlu1 %v1574_v18, %s1271_s3 }
0x121d   :  { %489 = vrot.lane.b32.xlu2 %v1459_v53, %s1274_s18 }
0x1225   :  { %604 = vrot.lane.b32.xlu2 %v1492_v50, %s1271_s3 }
0x1226   :  { %v1017_v62 = vpop.permute.xlu0 %1016 }
0x1227   :  { %v1019_v58 = vmul.f32 %v1260_v52, %v1017_v62 }
0x1229   :  { %1038 = vrot.lane.b32.xlu1 %v1019_v58, %s1271_s3  ;;  %v1026_v10 = vpack.c.bf16 %v1019_v58, %v1019_v58 }
0x122d   :  { %705 = vrot.lane.b32.xlu2 %v1516_v36, %s1274_s18 }
0x122e   :  { %v382_v34 = vpop.permute.xlu0 %381 }
0x122f   :  { %1100 = vst.msk [vmem:[%s1710_s5 + $0x4] sm:$0xf] %vm275_vm3, %v382_v34 }
0x1235   :  { %817 = vrot.lane.b32.xlu2 %v1546_v30, %s1271_s3 }
0x1236   :  { %v497_v14 = vpop.permute.xlu0 %496 }
0x1237   :  { %1105 = vst.msk [vmem:[%s1710_s5 + $0x14] sm:$0xf] %vm283_vm4, %v497_v14 }
0x1267   :  { %v994_v53 = vpop.permute.xlu2 %993 }
0x1268   :  { %v996_v50 = vmul.f32 %v1264_v61, %v994_v53 }
0x126a   :  { %v1020_v29 = vpack.c.bf16 %v996_v50, %v996_v50  ;;  %1033 = vrot.lane.b32.xlu0 %v996_v50, %s1274_s18 }
0x126c   :  { %1022 = vrot.lane.b32.xlu2 %v1020_v29, %s1274_s18 }
0x126f   :  { %v280_v36 = vpop.permute.xlu2 %279 }
0x1270   :  { %1097 = vst.msk [vmem:[%s1710_s5 + $0x1c] sm:$0xf] %vm283_vm4, %v280_v36 }
0x1272   :  { %711 = vrot.lane.b32.xlu0 %v1520_v41, %s1271_s3 }
0x1277   :  { %v490_v30 = vpop.permute.xlu2 %489 }
0x1278   :  { %1104 = vst.msk [vmem:[%s1710_s5 + $0x8] sm:$0xf] %vm275_vm3, %v490_v30  ;;  %v1045_v9 = vpop.permute.xlu1 %1044 }
0x1279   :  { %1047 = vst.msk [vmem:[%s1711_s7] sm:$0xff] %vm183_vm2, %v1045_v9 }
0x127a   :  { %1048 = vst.msk [vmem:[%s1711_s7] sm:$0xff] %vm1041_vm5, %v1013_v2  ;;  %917 = vrot.lane.b32.xlu0 %v1579_v27, %s1274_s18 }
0x127f   :  { %v605_v41 = vpop.permute.xlu2 %604 }
0x1280   :  { %1109 = vst.msk [vmem:[%s1710_s5 + $0x10] sm:$0xf] %vm283_vm4, %v605_v41  ;;  %v812_v11 = vpop.permute.xlu1 %811 }
0x1281   :  { %1116 = vst.msk [vmem:[%s1710_s5 + $0x14] sm:$0xf] %vm275_vm3, %v812_v11 }
0x1282   :  { %1028 = vrot.lane.b32.xlu0 %v1026_v10, %s1271_s3 }
0x1287   :  { %v706_v13 = vpop.permute.xlu2 %705 }
0x1288   :  { %1112 = vst.msk [vmem:[%s1710_s5 + $0x10] sm:$0xf] %vm275_vm3, %v706_v13  ;;  %v924_v15 = vpop.permute.xlu1 %923 }
0x1289   :  { %1121 = vst.msk [vmem:[%s1710_s5 + $0x4] sm:$0xf] %vm283_vm4, %v924_v15 }
0x128f   :  { %v818_v16 = vpop.permute.xlu2 %817 }
0x1290   :  { %1117 = vst.msk [vmem:[%s1710_s5 + $0x8] sm:$0xf] %vm283_vm4, %v818_v16 }
0x129b   :  { %v1039_v21 = vpop.permute.xlu1 %1038 }
0x12c6   :  { %v1023_v18 = vpop.permute.xlu2 %1022 }
0x12c7   :  { %1124 = vst.msk [vmem:[%s1710_s5 + $0x1c] sm:$0xf] %vm275_vm3, %v1023_v18 }
0x12dc   :  { %v1034_v19 = vpop.permute.xlu0 %1033 }
0x12dd   :  { %1036 = vst.msk [vmem:[%s1712_s6] sm:$0xff] %vm183_vm2, %v1034_v19 }
0x12de   :  { %1042 = vst.msk [vmem:[%s1712_s6] sm:$0xff] %vm1041_vm5, %v1039_v21 }
0x12e4   :  { %v712_v25 = vpop.permute.xlu0 %711 }
0x12e5   :  { %1113 = vst.msk [vmem:[%s1710_s5 + $0xc] sm:$0xf] %vm283_vm4, %v712_v25 }
0x12ec   :  { %v918_v12 = vpop.permute.xlu0 %917 }
0x12ed   :  { %1120 = vst.msk [vmem:[%s1710_s5 + $0x18] sm:$0xf] %vm275_vm3, %v918_v12 }
0x12f4   :  { %v1029_v22 = vpop.permute.xlu0 %1028 }
0x12f5   :  { %1031 = vst.msk [vmem:[%s1710_s5] sm:$0xf] %vm283_vm4, %v1029_v22 }

// kernel: lstm_crf_forward.3
= control target key start
LH: loop header
LB: loop body
LE: loop exit
PB: predicated region body
PF: predicated region fallthrough
CT: control target
= control target key end

     0   :  { %vm48_vm0 = vcmask 130048   ;;  %v1219_v5 = vmov 0   ;;  %vm98_vm1 = vcmask 519168   ;;  %s1222_s22 = smov 16   ;;  %s1223_s23 = smov 32   ;;  %vm250_vm2 = vcmask 125952   ;;  %s1668_s1 = inlined_call_operand.vmem [shape: bf16[16,128], index: 1, kind: input, shape index: {}]   ;;  %s1669_s0 = inlined_call_operand.vmem [shape: f32[8,8,16], index: 0, kind: input, shape index: {}]   ;;  %s1670_s2 = inlined_call_operand.vmem [shape: bf16[16,64], index: 2, kind: input, shape index: {}]   ;;  %s1671_s4 = inlined_call_operand.vmem [shape: f32[1,128], index: 4, kind: input, shape index: {}]   ;;  %s1672_s3 = inlined_call_operand.vmem [shape: bf16[16,64], index: 3, kind: input, shape index: {}]   ;;  %s1673_s5 = inlined_call_operand.vmem [shape: bf16[8,8,32], index: 5, kind: output, shape index: {0}]   ;;  %s1674_s7 = inlined_call_operand.vmem [shape: f32[8,32], index: 7, kind: output, shape index: {2}]   ;;  %s1675_s6 = inlined_call_operand.vmem [shape: f32[8,32], index: 6, kind: output, shape index: {1}]  }
   0x1   :  { %v1080_v0 = vld [vmem:[%s1668_s1] sm:$0xff]  ;;  %v25_v2 = vld [vmem:[%s1669_s0 + $0x8] sm:$0xff]  ;;  %v26_v6 = vld [vmem:[%s1669_s0 + $0x10] sm:$0xff]  ;;  %s1224_s24 = smov 80   ;;  %vm258_vm3 = vcmask 257152   ;;  %s1225_s8 = smov 112  }
   0x2   :  { %v24_v1 = vld [vmem:[%s1669_s0] sm:$0xff]  ;;  %68 = vmatpush.bf16.msra.mxu0 %v1080_v0  ;;  %v27_v7 = vld [vmem:[%s1669_s0 + $0x18] sm:$0xff]  ;;  %v29_v10 = vld [vmem:[%s1669_s0 + $0x28] sm:$0xff]  ;;  %vm1016_vm4 = vcmask 261248  }
   0x3   :  { %v32_v3 = vpack.c.bf16 %v25_v2, %v24_v1  ;;  %v1278_v4 = vld [vmem:[%s1670_s2] sm:$0xff]  ;;  %v33_v8 = vpack.c.bf16 %v27_v7, %v26_v6  ;;  %v30_v12 = vld [vmem:[%s1669_s0 + $0x30] sm:$0xff]  ;;  %v31_v13 = vld [vmem:[%s1669_s0 + $0x38] sm:$0xff] }
   0x4   :  { %169 = vmatpush.bf16.msra.mxu1 %v1278_v4  ;;  %277 = vmatpush.bf16.msra.mxu3 %v1278_v4  ;;  %v28_v9 = vld [vmem:[%s1669_s0 + $0x20] sm:$0xff]  ;;  %v35_v14 = vpack.c.bf16 %v31_v13, %v30_v12 }
   0x5   :  { %1040 = vmatmul.msk.bf16.vlgmr.msra.gmra.mxu0 %vm48_vm0, %v32_v3  ;;  %v34_v11 = vpack.c.bf16 %v29_v10, %v28_v9  ;;  %v1090_v15 = vld [vmem:[%s1671_s4] ss:$0 sm:$0xff]  ;;  %s1221_s4 = smov 96  }
   0x6   :  { %813 = vmatpush.bf16.msrb.mxu0 %v1278_v4  ;;  %v1315_v22 = vld [vmem:[%s1672_s3] sm:$0xff]  ;;  %s1220_s3 = smov 64  }
   0x7   :  { %170 = vmatmul.bf16.vlgmr.msra.gmra.mxu1 %v1219_v5  ;;  %192 = vmatpush.bf16.msra.mxu2 %v1315_v22 }
   0x8   :  { %301 = vmatpush.bf16.msrb.mxu1 %v1315_v22  ;;  %409 = vmatpush.bf16.msrb.mxu3 %v1315_v22 }
   0xa   :  { %193 = vmatmul.bf16.vlgmr.msra.gmra.mxu2 %v1219_v5 }
   0xb   :  { %385 = vmatpush.bf16.msrb.mxu2 %v1278_v4 }
   0xc   :  { %493 = vmatpush.bf16.msra.mxu1 %v1278_v4 }
   0xf   :  { %517 = vmatpush.bf16.msra.mxu2 %v1315_v22 }
  0x15   :  { %1041 = vmatmul.msk.bf16.gmra.mxu0 %vm48_vm0, %v33_v8 }
  0x25   :  { %1042 = vmatmul.msk.bf16.gmra.mxu0 %vm48_vm0, %v34_v11 }
  0x35   :  { %1043 = vmatmul.msk.bf16.gmra.mxu0 %vm48_vm0, %v35_v14 }
  0x82   :  { %v70_v16 = vpop.f32.mrf.mxu0 }
  0x83   :  { %v71_v17 = vadd.f32 %v1090_v15, %v70_v16 }
  0x84   :  { %v171_v18 = vpop.f32.mrf.mxu1 }
  0x85   :  { %v1308_v19 = vpack.c.bf16 %v71_v17, %v71_v17 }
  0x87   :  { %99 = vst.msk [vmem:[#allocation2] sm:$0xf] %vm98_vm1, %v1308_v19 }
  0x8a   :  { %v72_v20 = vpop.f32.mrf.mxu0 }
  0x8b   :  { %v73_v21 = vadd.f32 %v1090_v15, %v72_v20 }
  0x8c   :  { %v173_v23 = vpop.f32.mrf.mxu1 }
  0x8d   :  { %v1317_v24 = vpack.c.bf16 %v73_v21, %v73_v21  ;;  %v194_v47 = vpop.f32.mrf.mxu2 }
  0x8e   :  { %v151_v39 = vld [vmem:[#allocation2] sm:$0xf] }
  0x8f   :  { %100 = vst.msk [vmem:[#allocation2 + $0x4] sm:$0xf] %vm98_vm1, %v1317_v24  ;;  %v152_v41 = vunpack.c.l.bf16 %v151_v39 }
  0x91   :  { %v175_v44 = vadd.f32 %v171_v18, %v152_v41 }
  0x92   :  { %v75_v25 = vpop.f32.mrf.mxu0 }
  0x93   :  { %v76_v26 = vadd.f32 %v1090_v15, %v75_v25  ;;  %1091 = vtanh.f32 %v175_v44  ;;  %v199_v49 = vsub.f32 0.0, %v175_v44 }
  0x95   :  { %v1327_v27 = vpack.c.bf16 %v76_v26, %v76_v26  ;;  %v196_v48 = vpop.f32.mrf.mxu2  ;;  %v200_v51 = vmul.f32 1.442695, %v199_v49 }
  0x97   :  { %101 = vst.msk [vmem:[#allocation2 + $0x8] sm:$0xf] %vm98_vm1, %v1327_v27  ;;  %1093 = vpow2.f32 %v200_v51 }
  0x99   :  { %v1092_v46 = vpop.eup %1091 }
  0x9a   :  { %v77_v28 = vpop.f32.mrf.mxu0 }
  0x9b   :  { %v78_v29 = vadd.f32 %v1090_v15, %v77_v28 }
  0x9d   :  { %v1331_v30 = vpack.c.bf16 %v78_v29, %v78_v29  ;;  %v1094_v55 = vpop.eup %1093 }
  0x9e   :  { %v202_v56 = vadd.f32 1.0, %v1094_v55 }
  0x9f   :  { %102 = vst.msk [vmem:[#allocation2 + $0xc] sm:$0xf] %vm98_vm1, %v1331_v30 }
  0xa2   :  { %v80_v31 = vpop.f32.mrf.mxu0 }
  0xa3   :  { %v81_v32 = vadd.f32 %v1090_v15, %v80_v31  ;;  %v1373_v31 = vld [vmem:[#allocation2 + $0x4] sm:$0xff]  }
  0xa5   :  { %v1335_v33 = vpack.c.bf16 %v81_v32, %v81_v32  ;;  %v262_v32 = vunpack.c.l.bf16 %v1373_v31 }
  0xa7   :  { %103 = vst.msk [vmem:[#allocation2 + $0x10] sm:$0xf] %vm98_vm1, %v1335_v33 }
  0xaa   :  { %v82_v34 = vpop.f32.mrf.mxu0 }
  0xab   :  { %v83_v35 = vadd.f32 %v1090_v15, %v82_v34 }
  0xad   :  { %v1339_v36 = vpack.c.bf16 %v83_v35, %v83_v35 }
  0xaf   :  { %104 = vst.msk [vmem:[#allocation2 + $0x14] sm:$0xf] %vm98_vm1, %v1339_v36 }
  0xb2   :  { %v85_v37 = vpop.f32.mrf.mxu0 }
  0xb3   :  { %v86_v38 = vadd.f32 %v1090_v15, %v85_v37 }
  0xb5   :  { %v96_v40 = vpack.c.bf16 %v86_v38, %v86_v38 }
  0xb7   :  { %105 = vst.msk [vmem:[#allocation2 + $0x18] sm:$0xf] %vm98_vm1, %v96_v40 }
  0xba   :  { %v87_v42 = vpop.f32.mrf.mxu0 }
  0xbb   :  { %v88_v43 = vadd.f32 %v1090_v15, %v87_v42 }
  0xbd   :  { %v97_v45 = vpack.c.bf16 %v88_v43, %v88_v43 }
  0xbf   :  { %106 = vst.msk [vmem:[#allocation2 + $0x1c] sm:$0xf] %vm98_vm1, %v97_v45  ;;  %129 = vrot.lane.b32.xlu0 %v97_v45, %s1220_s3 }
  0xc7   :  { %207 = vrot.lane.b32.xlu0 %v1092_v46, %s1221_s4 }
 0x131   :  { %v130_v50 = vpop.permute.xlu0 %129 }
 0x132   :  { %146 = vst.msk [vmem:[#allocation3 + $0x1c] sm:$0xf] %vm98_vm1, %v130_v50 }
 0x139   :  { %v177_v52 = vld [vmem:[#allocation3 + $0x1c] sm:$0xf]  ;;  %v208_v58 = vpop.permute.xlu0 %207 }
 0x13a   :  { %v178_v53 = vunpack.c.l.bf16 %v177_v52 }
 0x13c   :  { %v198_v54 = vadd.f32 %v194_v47, %v178_v53 }
 0x13e   :  { %1095 = vtanh.f32 %v198_v54  ;;  %v222_v61 = vsub.f32 0.0, %v198_v54 }
 0x13f   :  { %1097 = vrcp.f32 %v202_v56 }
 0x140   :  { %v223_v62 = vmul.f32 1.442695, %v222_v61 }
 0x142   :  { %1099 = vpow2.f32 %v223_v62 }
 0x144   :  { %v1096_v57 = vpop.eup %1095 }
 0x145   :  { %230 = vrot.lane.b32.xlu1 %v1096_v57, %s1221_s4  ;;  %v1098_v59 = vpop.eup %1097 }
 0x146   :  { %v210_v60 = vmul.f32 %v1098_v59, %v208_v58  ;;  %v205_v5 = vmul.f32 0.0, %v1098_v59 }
 0x148   :  { %v1100_v63 = vpop.eup %1099 }
 0x149   :  { %v225_v0 = vadd.f32 1.0, %v1100_v63 }
 0x14b   :  { %1101 = vrcp.f32 %v225_v0 }
 0x14d   :  { %212 = vrot.lane.b32.xlu1 %v210_v60, %s1222_s22 }
 0x151   :  { %v1102_v1 = vpop.eup %1101 }
 0x152   :  { %v228_v9 = vmul.f32 0.0, %v1102_v1 }
 0x1b7   :  { %v231_v2 = vpop.permute.xlu1 %230 }
 0x1b8   :  { %v233_v3 = vmul.f32 %v1102_v1, %v231_v2 }
 0x1ba   :  { %235 = vrot.lane.b32.xlu2 %v233_v3, %s1222_s22 }
 0x1bf   :  { %v213_v6 = vpop.permute.xlu1 %212 }
 0x1c0   :  { %v1351_v7 = vadd.f32 %v213_v6, %v205_v5 }
 0x1c2   :  { %1103 = vtanh.f32 %v1351_v7 }
 0x1c8   :  { %v1104_v8 = vpop.eup %1103 }
 0x1c9   :  { %218 = vrot.lane.b32.xlu2 %v1104_v8, %s1223_s23 }
 0x214   :  { %v236_v10 = vpop.permute.xlu2 %235 }
 0x215   :  { %v1355_v11 = vadd.f32 %v236_v10, %v228_v9 }
 0x217   :  { %1105 = vtanh.f32 %v1355_v11 }
 0x21d   :  { %v1106_v12 = vpop.eup %1105 }
 0x21e   :  { %241 = vrot.lane.b32.xlu0 %v1106_v12, %s1223_s23 }
 0x223   :  { %v219_v13 = vpop.permute.xlu2 %218 }
 0x224   :  { %v221_v14 = vmul.f32 %v1098_v59, %v219_v13 }
 0x226   :  { %v1359_v15 = vpack.c.bf16 %v221_v14, %v221_v14  ;;  %127 = vrot.lane.b32.xlu0 %v96_v40, %s1220_s3 }
 0x228   :  { %v263_v16 = vunpack.c.l.b16 %v1359_v15 }
 0x22a   :  { %v264_v17 = vpack.c.b16 %v263_v16, %v263_v16 }
 0x22c   :  { %265 = vrot.lane.b32.xlu1 %v264_v17, %s1224_s24  ;;  %v370_v17 = vunpack.c.h.bf16 %v1373_v31 }
 0x290   :  { %v242_v18 = vpop.permute.xlu0 %241 }
 0x291   :  { %v244_v20 = vmul.f32 %v1102_v1, %v242_v18 }
 0x293   :  { %v1364_v21 = vpack.c.bf16 %v244_v20, %v244_v20 }
 0x295   :  { %v287_v23 = vunpack.c.l.b16 %v1364_v21 }
 0x297   :  { %v288_v25 = vpack.c.b16 %v287_v23, %v287_v23 }
 0x298   :  { %v128_v26 = vpop.permute.xlu0 %127 }
 0x299   :  { %145 = vst.msk [vmem:[#allocation3 + $0x18] sm:$0xf] %vm98_vm1, %v128_v26  ;;  %289 = vrot.lane.b32.xlu2 %v288_v25, %s1224_s24 }
 0x29e   :  { %v266_v28 = vpop.permute.xlu1 %265 }
 0x29f   :  { %1053 = vmatmul.msk.bf16.vlgmr.msra.gmra.mxu3 %vm48_vm0, %v266_v28 }
 0x2a0   :  { %601 = vmatpush.bf16.msra.mxu3 %v1278_v4  ;;  %v285_v39 = vld [vmem:[#allocation3 + $0x18] sm:$0xf] }
 0x2a1   :  { %v286_v40 = vunpack.c.l.bf16 %v285_v39 }
 0x2f3   :  { %v290_v29 = vpop.permute.xlu2 %289 }
 0x2f4   :  { %1054 = vmatmul.msk.bf16.vlgmr.msrb.gmra.mxu1 %vm48_vm0, %v290_v29 }
 0x2f5   :  { %625 = vmatpush.bf16.msrb.mxu1 %v1315_v22 }
 0x322   :  { %v279_v34 = vpop.f32.mrf.mxu3 }
 0x323   :  { %v283_v35 = vadd.f32 %v279_v34, %v262_v32 }
 0x325   :  { %1107 = vtanh.f32 %v283_v35  ;;  %v308_v45 = vsub.f32 0.0, %v283_v35 }
 0x327   :  { %v309_v46 = vmul.f32 1.442695, %v308_v45 }
 0x32a   :  { %v281_v37 = vpop.f32.mrf.mxu3 }
 0x32b   :  { %v1108_v38 = vpop.eup %1107 }
 0x32c   :  { %316 = vrot.lane.b32.xlu1 %v1108_v38, %s1221_s4 }
 0x371   :  { %v303_v41 = vpop.f32.mrf.mxu1 }
 0x372   :  { %v307_v42 = vadd.f32 %v303_v41, %v286_v40 }
 0x374   :  { %1109 = vtanh.f32 %v307_v42  ;;  %v331_v52 = vsub.f32 0.0, %v307_v42 }
 0x375   :  { %1111 = vpow2.f32 %v309_v46 }
 0x376   :  { %v332_v53 = vmul.f32 1.442695, %v331_v52 }
 0x379   :  { %v305_v43 = vpop.f32.mrf.mxu1 }
 0x37a   :  { %v1110_v44 = vpop.eup %1109 }
 0x37b   :  { %339 = vrot.lane.b32.xlu2 %v1110_v44, %s1221_s4  ;;  %v1112_v47 = vpop.eup %1111 }
 0x37c   :  { %v311_v48 = vadd.f32 1.0, %v1112_v47 }
 0x37e   :  { %1113 = vrcp.f32 %v311_v48 }
 0x37f   :  { %1115 = vpow2.f32 %v332_v53 }
 0x384   :  { %v1114_v49 = vpop.eup %1113 }
 0x385   :  { %v1116_v54 = vpop.eup %1115  ;;  %v314_v59 = vmul.f32 %v1114_v49, %v1351_v7 }
 0x386   :  { %v334_v55 = vadd.f32 1.0, %v1116_v54 }
 0x388   :  { %1117 = vrcp.f32 %v334_v55 }
 0x38e   :  { %v1118_v56 = vpop.eup %1117 }
 0x38f   :  { %v337_v63 = vmul.f32 %v1118_v56, %v1355_v11 }
 0x39e   :  { %v317_v50 = vpop.permute.xlu1 %316 }
 0x39f   :  { %v319_v51 = vmul.f32 %v1114_v49, %v317_v50 }
 0x3a1   :  { %321 = vrot.lane.b32.xlu0 %v319_v51, %s1222_s22 }
 0x3d5   :  { %v340_v57 = vpop.permute.xlu2 %339 }
 0x3d6   :  { %v342_v58 = vmul.f32 %v1118_v56, %v340_v57 }
 0x3d8   :  { %344 = vrot.lane.b32.xlu1 %v342_v58, %s1222_s22 }
 0x413   :  { %v322_v60 = vpop.permute.xlu0 %321 }
 0x414   :  { %v1381_v61 = vadd.f32 %v322_v60, %v314_v59 }
 0x416   :  { %1119 = vtanh.f32 %v1381_v61 }
 0x41c   :  { %v1120_v62 = vpop.eup %1119 }
 0x41d   :  { %327 = vrot.lane.b32.xlu2 %v1120_v62, %s1223_s23 }
 0x44a   :  { %v345_v0 = vpop.permute.xlu1 %344 }
 0x44b   :  { %v1386_v1 = vadd.f32 %v345_v0, %v337_v63 }
 0x44d   :  { %1121 = vtanh.f32 %v1386_v1 }
 0x453   :  { %v1122_v2 = vpop.eup %1121 }
 0x454   :  { %350 = vrot.lane.b32.xlu0 %v1122_v2, %s1223_s23 }
 0x45c   :  { %125 = vrot.lane.b32.xlu0 %v1339_v36, %s1220_s3 }
 0x477   :  { %v328_v3 = vpop.permute.xlu2 %327 }
 0x478   :  { %v330_v5 = vmul.f32 %v1114_v49, %v328_v3 }
 0x47a   :  { %v1392_v6 = vpack.c.bf16 %v330_v5, %v330_v5 }
 0x47c   :  { %v371_v7 = vunpack.c.l.b16 %v1392_v6 }
 0x47e   :  { %v372_v8 = vpack.c.b16 %v371_v7, %v371_v7 }
 0x480   :  { %373 = vrot.lane.b32.xlu1 %v372_v8, %s1224_s24  ;;  %v1435_v8 = vld [vmem:[#allocation2 + $0xc] sm:$0xff]  }
 0x4c6   :  { %v351_v9 = vpop.permute.xlu0 %350 }
 0x4c7   :  { %v353_v10 = vmul.f32 %v1118_v56, %v351_v9  ;;  %v478_v9 = vunpack.c.l.bf16 %v1435_v8 }
 0x4c9   :  { %v1396_v11 = vpack.c.bf16 %v353_v10, %v353_v10 }
 0x4cb   :  { %v395_v12 = vunpack.c.l.b16 %v1396_v11 }
 0x4cd   :  { %v396_v13 = vpack.c.b16 %v395_v12, %v395_v12 }
 0x4ce   :  { %v126_v14 = vpop.permute.xlu0 %125 }
 0x4cf   :  { %144 = vst.msk [vmem:[#allocation3 + $0x14] sm:$0xf] %vm98_vm1, %v126_v14  ;;  %397 = vrot.lane.b32.xlu2 %v396_v13, %s1224_s24 }
 0x4d6   :  { %v393_v26 = vld [vmem:[#allocation3 + $0x14] sm:$0xf] }
 0x4d7   :  { %v394_v28 = vunpack.c.l.bf16 %v393_v26 }
 0x4f2   :  { %v374_v36 = vpop.permute.xlu1 %373 }
 0x4f3   :  { %1057 = vmatmul.msk.bf16.vlgmr.msrb.gmra.mxu2 %vm48_vm0, %v374_v36 }
 0x4f4   :  { %707 = vmatpush.bf16.msrb.mxu2 %v1278_v4 }
 0x529   :  { %v398_v16 = vpop.permute.xlu2 %397 }
 0x52a   :  { %1058 = vmatmul.msk.bf16.vlgmr.msrb.gmra.mxu3 %vm48_vm0, %v398_v16 }
 0x52b   :  { %731 = vmatpush.bf16.msrb.mxu3 %v1315_v22 }
 0x576   :  { %v387_v18 = vpop.f32.mrf.mxu2 }
 0x577   :  { %v391_v20 = vadd.f32 %v387_v18, %v370_v17 }
 0x579   :  { %1123 = vtanh.f32 %v391_v20  ;;  %v416_v37 = vsub.f32 0.0, %v391_v20 }
 0x57b   :  { %v417_v38 = vmul.f32 1.442695, %v416_v37 }
 0x57e   :  { %v389_v23 = vpop.f32.mrf.mxu2 }
 0x57f   :  { %v1124_v25 = vpop.eup %1123 }
 0x580   :  { %424 = vrot.lane.b32.xlu1 %v1124_v25, %s1221_s4 }
 0x5ad   :  { %v411_v29 = vpop.f32.mrf.mxu3 }
 0x5ae   :  { %v415_v32 = vadd.f32 %v411_v29, %v394_v28 }
 0x5b0   :  { %1125 = vtanh.f32 %v415_v32  ;;  %v439_v43 = vsub.f32 0.0, %v415_v32 }
 0x5b1   :  { %1127 = vpow2.f32 %v417_v38 }
 0x5b2   :  { %v440_v44 = vmul.f32 1.442695, %v439_v43 }
 0x5b5   :  { %v413_v34 = vpop.f32.mrf.mxu3 }
 0x5b6   :  { %v1126_v35 = vpop.eup %1125 }
 0x5b7   :  { %447 = vrot.lane.b32.xlu2 %v1126_v35, %s1221_s4  ;;  %v1128_v31 = vpop.eup %1127 }
 0x5b8   :  { %v419_v39 = vadd.f32 1.0, %v1128_v31 }
 0x5ba   :  { %1129 = vrcp.f32 %v419_v39 }
 0x5bb   :  { %1131 = vpow2.f32 %v440_v44 }
 0x5c0   :  { %v1130_v40 = vpop.eup %1129 }
 0x5c1   :  { %v1132_v45 = vpop.eup %1131  ;;  %v422_v50 = vmul.f32 %v1130_v40, %v1381_v61 }
 0x5c2   :  { %v442_v46 = vadd.f32 1.0, %v1132_v45 }
 0x5c4   :  { %1133 = vrcp.f32 %v442_v46 }
 0x5ca   :  { %v1134_v47 = vpop.eup %1133 }
 0x5cb   :  { %v445_v54 = vmul.f32 %v1134_v47, %v1386_v1 }
 0x5f2   :  { %v425_v41 = vpop.permute.xlu1 %424 }
 0x5f3   :  { %v427_v42 = vmul.f32 %v1130_v40, %v425_v41 }
 0x5f5   :  { %429 = vrot.lane.b32.xlu0 %v427_v42, %s1222_s22 }
 0x611   :  { %v448_v48 = vpop.permute.xlu2 %447 }
 0x612   :  { %v450_v49 = vmul.f32 %v1134_v47, %v448_v48 }
 0x614   :  { %452 = vrot.lane.b32.xlu1 %v450_v49, %s1222_s22 }
 0x667   :  { %v430_v51 = vpop.permute.xlu0 %429 }
 0x668   :  { %v1411_v52 = vadd.f32 %v430_v51, %v422_v50 }
 0x66a   :  { %1135 = vtanh.f32 %v1411_v52 }
 0x670   :  { %v1136_v53 = vpop.eup %1135 }
 0x671   :  { %435 = vrot.lane.b32.xlu2 %v1136_v53, %s1223_s23 }
 0x686   :  { %v453_v55 = vpop.permute.xlu1 %452 }
 0x687   :  { %v1416_v56 = vadd.f32 %v453_v55, %v445_v54 }
 0x689   :  { %1137 = vtanh.f32 %v1416_v56 }
 0x68f   :  { %v1138_v57 = vpop.eup %1137 }
 0x690   :  { %458 = vrot.lane.b32.xlu0 %v1138_v57, %s1223_s23 }
 0x698   :  { %123 = vrot.lane.b32.xlu0 %v1335_v33, %s1220_s3 }
 0x6cb   :  { %v436_v58 = vpop.permute.xlu2 %435 }
 0x6cc   :  { %v438_v59 = vmul.f32 %v1130_v40, %v436_v58 }
 0x6ce   :  { %v1422_v60 = vpack.c.bf16 %v438_v59, %v438_v59 }
 0x6d0   :  { %v479_v61 = vunpack.c.l.b16 %v1422_v60 }
 0x6d2   :  { %v480_v62 = vpack.c.b16 %v479_v61, %v479_v61 }
 0x6d4   :  { %481 = vrot.lane.b32.xlu1 %v480_v62, %s1224_s24 }
 0x702   :  { %v459_v63 = vpop.permute.xlu0 %458 }
 0x703   :  { %v461_v0 = vmul.f32 %v1134_v47, %v459_v63  ;;  %v586_v63 = vunpack.c.h.bf16 %v1435_v8 }
 0x705   :  { %v1426_v1 = vpack.c.bf16 %v461_v0, %v461_v0 }
 0x707   :  { %v503_v2 = vunpack.c.l.b16 %v1426_v1 }
 0x709   :  { %v504_v3 = vpack.c.b16 %v503_v2, %v503_v2 }
 0x70a   :  { %v124_v5 = vpop.permute.xlu0 %123 }
 0x70b   :  { %143 = vst.msk [vmem:[#allocation3 + $0x10] sm:$0xf] %vm98_vm1, %v124_v5  ;;  %505 = vrot.lane.b32.xlu2 %v504_v3, %s1224_s24 }
 0x712   :  { %v501_v36 = vld [vmem:[#allocation3 + $0x10] sm:$0xf] }
 0x713   :  { %v502_v16 = vunpack.c.l.bf16 %v501_v36 }
 0x746   :  { %v482_v33 = vpop.permute.xlu1 %481 }
 0x747   :  { %1061 = vmatmul.msk.bf16.vlgmr.msra.gmra.mxu1 %vm48_vm0, %v482_v33 }
 0x748   :  { %837 = vmatpush.bf16.msra.mxu1 %v1315_v22 }
 0x765   :  { %v506_v7 = vpop.permute.xlu2 %505 }
 0x766   :  { %1062 = vmatmul.msk.bf16.vlgmr.msra.gmra.mxu2 %vm48_vm0, %v506_v7 }
 0x767   :  { %919 = vmatpush.bf16.msra.mxu2 %v1278_v4 }
 0x7c4   :  { %v495_v10 = vpop.f32.mrf.mxu1 }
 0x7c5   :  { %v499_v12 = vadd.f32 %v495_v10, %v478_v9 }
 0x7c7   :  { %1139 = vtanh.f32 %v499_v12  ;;  %v524_v4 = vsub.f32 0.0, %v499_v12 }
 0x7c9   :  { %v525_v25 = vmul.f32 1.442695, %v524_v4 }
 0x7cc   :  { %v497_v13 = vpop.f32.mrf.mxu1 }
 0x7cd   :  { %v1140_v14 = vpop.eup %1139 }
 0x7ce   :  { %532 = vrot.lane.b32.xlu1 %v1140_v14, %s1221_s4 }
 0x7e9   :  { %v519_v17 = vpop.f32.mrf.mxu2 }
 0x7ea   :  { %v523_v18 = vadd.f32 %v519_v17, %v502_v16 }
 0x7ec   :  { %1141 = vtanh.f32 %v523_v18  ;;  %v547_v28 = vsub.f32 0.0, %v523_v18 }
 0x7ed   :  { %1143 = vpow2.f32 %v525_v25 }
 0x7ee   :  { %v548_v32 = vmul.f32 1.442695, %v547_v28 }
 0x7f1   :  { %v521_v20 = vpop.f32.mrf.mxu2 }
 0x7f2   :  { %v1142_v23 = vpop.eup %1141 }
 0x7f3   :  { %555 = vrot.lane.b32.xlu2 %v1142_v23, %s1221_s4  ;;  %v1144_v26 = vpop.eup %1143 }
 0x7f4   :  { %v527_v29 = vadd.f32 1.0, %v1144_v26 }
 0x7f6   :  { %1145 = vrcp.f32 %v527_v29 }
 0x7f7   :  { %1147 = vpow2.f32 %v548_v32 }
 0x7fc   :  { %v1146_v34 = vpop.eup %1145 }
 0x7fd   :  { %v1148_v35 = vpop.eup %1147  ;;  %v530_v42 = vmul.f32 %v1146_v34, %v1411_v52 }
 0x7fe   :  { %v550_v31 = vadd.f32 1.0, %v1148_v35 }
 0x800   :  { %1149 = vrcp.f32 %v550_v31 }
 0x806   :  { %v1150_v39 = vpop.eup %1149 }
 0x807   :  { %v553_v46 = vmul.f32 %v1150_v39, %v1416_v56 }
 0x840   :  { %v533_v37 = vpop.permute.xlu1 %532 }
 0x841   :  { %v535_v38 = vmul.f32 %v1146_v34, %v533_v37 }
 0x843   :  { %537 = vrot.lane.b32.xlu0 %v535_v38, %s1222_s22 }
 0x84d   :  { %v556_v40 = vpop.permute.xlu2 %555 }
 0x84e   :  { %v558_v41 = vmul.f32 %v1150_v39, %v556_v40 }
 0x850   :  { %560 = vrot.lane.b32.xlu1 %v558_v41, %s1222_s22 }
 0x8b5   :  { %v538_v43 = vpop.permute.xlu0 %537 }
 0x8b6   :  { %v1443_v44 = vadd.f32 %v538_v43, %v530_v42 }
 0x8b8   :  { %1151 = vtanh.f32 %v1443_v44 }
 0x8be   :  { %v1152_v45 = vpop.eup %1151 }
 0x8bf   :  { %543 = vrot.lane.b32.xlu2 %v1152_v45, %s1223_s23 }
 0x8c2   :  { %v561_v47 = vpop.permute.xlu1 %560 }
 0x8c3   :  { %v563_v48 = vadd.f32 %v561_v47, %v553_v46 }
 0x8c5   :  { %1153 = vtanh.f32 %v563_v48 }
 0x8cb   :  { %v1154_v49 = vpop.eup %1153 }
 0x8cc   :  { %566 = vrot.lane.b32.xlu0 %v1154_v49, %s1223_s23 }
 0x8d4   :  { %121 = vrot.lane.b32.xlu0 %v1331_v30, %s1220_s3 }
 0x919   :  { %v544_v50 = vpop.permute.xlu2 %543 }
 0x91a   :  { %v546_v51 = vmul.f32 %v1146_v34, %v544_v50 }
 0x91c   :  { %v1451_v52 = vpack.c.bf16 %v546_v51, %v546_v51 }
 0x91e   :  { %v587_v53 = vunpack.c.l.b16 %v1451_v52 }
 0x920   :  { %v588_v54 = vpack.c.b16 %v587_v53, %v587_v53 }
 0x922   :  { %589 = vrot.lane.b32.xlu1 %v588_v54, %s1224_s24 }
 0x93e   :  { %v567_v55 = vpop.permute.xlu0 %566 }
 0x93f   :  { %v569_v56 = vmul.f32 %v1150_v39, %v567_v55 }
 0x941   :  { %v1455_v57 = vpack.c.bf16 %v569_v56, %v569_v56 }
 0x943   :  { %v611_v58 = vunpack.c.l.b16 %v1455_v57 }
 0x945   :  { %v612_v59 = vpack.c.b16 %v611_v58, %v611_v58 }
 0x946   :  { %v122_v61 = vpop.permute.xlu0 %121 }
 0x947   :  { %142 = vst.msk [vmem:[#allocation3 + $0xc] sm:$0xf] %vm98_vm1, %v122_v61  ;;  %613 = vrot.lane.b32.xlu2 %v612_v59, %s1224_s24 }
 0x94e   :  { %v609_v3 = vld [vmem:[#allocation3 + $0xc] sm:$0xf] }
 0x94f   :  { %v610_v5 = vunpack.c.l.bf16 %v609_v3 }
 0x994   :  { %v590_v30 = vpop.permute.xlu1 %589 }
 0x995   :  { %1065 = vmatmul.msk.bf16.vlgmr.msra.gmra.mxu3 %vm48_vm0, %v590_v30  ;;  %v1491_v30 = vld [vmem:[#allocation2 + $0x14] sm:$0xff]  }
 0x996   :  { %942 = vmatpush.bf16.msra.mxu3 %v1315_v22 }
 0x9a1   :  { %v614_v62 = vpop.permute.xlu2 %613 }
 0x9a2   :  { %1066 = vmatmul.msk.bf16.vlgmr.msrb.gmra.mxu1 %vm48_vm0, %v614_v62  ;;  %v692_v62 = vunpack.c.l.bf16 %v1491_v30 }
 0xa18   :  { %v603_v0 = vpop.f32.mrf.mxu3 }
 0xa19   :  { %v607_v2 = vadd.f32 %v603_v0, %v586_v63 }
 0xa1b   :  { %1155 = vtanh.f32 %v607_v2  ;;  %v632_v36 = vsub.f32 0.0, %v607_v2 }
 0xa1d   :  { %v633_v17 = vmul.f32 1.442695, %v632_v36 }
 0xa1f   :  { %v627_v33 = vpop.f32.mrf.mxu1 }
 0xa20   :  { %v631_v7 = vadd.f32 %v627_v33, %v610_v5  ;;  %v605_v9 = vpop.f32.mrf.mxu3 }
 0xa21   :  { %v1156_v10 = vpop.eup %1155 }
 0xa22   :  { %1157 = vtanh.f32 %v631_v7  ;;  %640 = vrot.lane.b32.xlu1 %v1156_v10, %s1221_s4  ;;  %v655_v22 = vsub.f32 0.0, %v631_v7 }
 0xa24   :  { %v656_v14 = vmul.f32 1.442695, %v655_v22 }
 0xa26   :  { %1159 = vpow2.f32 %v656_v14 }
 0xa27   :  { %v629_v12 = vpop.f32.mrf.mxu1 }
 0xa28   :  { %v1158_v13 = vpop.eup %1157 }
 0xa29   :  { %663 = vrot.lane.b32.xlu2 %v1158_v13, %s1221_s4 }
 0xa2c   :  { %v1160_v8 = vpop.eup %1159 }
 0xa2d   :  { %v658_v16 = vadd.f32 1.0, %v1160_v8 }
 0xa2f   :  { %1161 = vrcp.f32 %v658_v16 }
 0xa30   :  { %1163 = vpow2.f32 %v633_v17 }
 0xa35   :  { %v1162_v18 = vpop.eup %1161 }
 0xa36   :  { %v1164_v4 = vpop.eup %1163  ;;  %v661_v32 = vmul.f32 %v1162_v18, %v563_v48 }
 0xa37   :  { %v635_v25 = vadd.f32 1.0, %v1164_v4 }
 0xa39   :  { %1165 = vrcp.f32 %v635_v25 }
 0xa3f   :  { %v1166_v26 = vpop.eup %1165 }
 0xa40   :  { %v638_v38 = vmul.f32 %v1166_v26, %v1443_v44 }
 0xa83   :  { %v664_v20 = vpop.permute.xlu2 %663 }
 0xa84   :  { %v666_v23 = vmul.f32 %v1162_v18, %v664_v20 }
 0xa86   :  { %668 = vrot.lane.b32.xlu1 %v666_v23, %s1222_s22 }
 0xa94   :  { %v641_v28 = vpop.permute.xlu1 %640 }
 0xa95   :  { %v643_v29 = vmul.f32 %v1166_v26, %v641_v28 }
 0xa97   :  { %645 = vrot.lane.b32.xlu0 %v643_v29, %s1222_s22 }
 0xaf8   :  { %v669_v34 = vpop.permute.xlu1 %668 }
 0xaf9   :  { %v1468_v35 = vadd.f32 %v669_v34, %v661_v32 }
 0xafb   :  { %1167 = vtanh.f32 %v1468_v35 }
 0xb01   :  { %v1168_v37 = vpop.eup %1167 }
 0xb02   :  { %674 = vrot.lane.b32.xlu0 %v1168_v37, %s1223_s23 }
 0xb09   :  { %v646_v31 = vpop.permute.xlu0 %645 }
 0xb0a   :  { %v1473_v39 = vadd.f32 %v646_v31, %v638_v38  ;;  %119 = vrot.lane.b32.xlu0 %v1327_v27, %s1220_s3 }
 0xb0c   :  { %1169 = vtanh.f32 %v1473_v39 }
 0xb12   :  { %v1170_v40 = vpop.eup %1169 }
 0xb13   :  { %651 = vrot.lane.b32.xlu2 %v1170_v40, %s1223_s23 }
 0xb6d   :  { %v652_v41 = vpop.permute.xlu2 %651 }
 0xb6e   :  { %v654_v42 = vmul.f32 %v1166_v26, %v652_v41 }
 0xb70   :  { %v1479_v43 = vpack.c.bf16 %v654_v42, %v654_v42 }
 0xb72   :  { %v693_v45 = vunpack.c.l.b16 %v1479_v43 }
 0xb74   :  { %v694_v46 = vpack.c.b16 %v693_v45, %v693_v45  ;;  %v675_v47 = vpop.permute.xlu0 %674 }
 0xb75   :  { %v677_v44 = vmul.f32 %v1162_v18, %v675_v47 }
 0xb76   :  { %695 = vrot.lane.b32.xlu1 %v694_v46, %s1224_s24 }
 0xb77   :  { %v1483_v48 = vpack.c.bf16 %v677_v44, %v677_v44 }
 0xb79   :  { %v717_v27 = vunpack.c.l.b16 %v1483_v48 }
 0xb7b   :  { %v718_v49 = vpack.c.b16 %v717_v27, %v717_v27 }
 0xb7c   :  { %v120_v50 = vpop.permute.xlu0 %119 }
 0xb7d   :  { %141 = vst.msk [vmem:[#allocation3 + $0x8] sm:$0xf] %vm98_vm1, %v120_v50  ;;  %719 = vrot.lane.b32.xlu2 %v718_v49, %s1224_s24 }
 0xb84   :  { %v715_v54 = vld [vmem:[#allocation3 + $0x8] sm:$0xf] }
 0xb85   :  { %v716_v55 = vunpack.c.l.bf16 %v715_v54  ;;  %v798_v54 = vunpack.c.h.bf16 %v1491_v30 }
 0xbd7   :  { %v720_v51 = vpop.permute.xlu2 %719 }
 0xbd8   :  { %1070 = vmatmul.msk.bf16.vlgmr.msrb.gmra.mxu3 %vm48_vm0, %v720_v51 }
 0xbe8   :  { %v696_v53 = vpop.permute.xlu1 %695 }
 0xbe9   :  { %1069 = vmatmul.msk.bf16.vlgmr.msrb.gmra.mxu2 %vm48_vm0, %v696_v53 }
 0xc5b   :  { %v733_v56 = vpop.f32.mrf.mxu3 }
 0xc5c   :  { %v737_v58 = vadd.f32 %v733_v56, %v716_v55 }
 0xc5e   :  { %1171 = vtanh.f32 %v737_v58  ;;  %v761_v5 = vsub.f32 0.0, %v737_v58 }
 0xc60   :  { %v762_v33 = vmul.f32 1.442695, %v761_v5 }
 0xc63   :  { %v735_v59 = vpop.f32.mrf.mxu3 }
 0xc64   :  { %v1172_v61 = vpop.eup %1171 }
 0xc65   :  { %769 = vrot.lane.b32.xlu2 %v1172_v61, %s1221_s4 }
 0xc6c   :  { %v709_v63 = vpop.f32.mrf.mxu2 }
 0xc6d   :  { %v713_v0 = vadd.f32 %v709_v63, %v692_v62 }
 0xc6f   :  { %1173 = vtanh.f32 %v713_v0  ;;  %v738_v22 = vsub.f32 0.0, %v713_v0 }
 0xc70   :  { %1175 = vpow2.f32 %v762_v33 }
 0xc71   :  { %v739_v14 = vmul.f32 1.442695, %v738_v22 }
 0xc74   :  { %v711_v2 = vpop.f32.mrf.mxu2 }
 0xc75   :  { %v1174_v3 = vpop.eup %1173 }
 0xc76   :  { %746 = vrot.lane.b32.xlu1 %v1174_v3, %s1221_s4  ;;  %v1176_v7 = vpop.eup %1175 }
 0xc77   :  { %v764_v9 = vadd.f32 1.0, %v1176_v7 }
 0xc79   :  { %1177 = vrcp.f32 %v764_v9 }
 0xc7a   :  { %1179 = vpow2.f32 %v739_v14 }
 0xc7f   :  { %v1178_v10 = vpop.eup %1177 }
 0xc80   :  { %v1180_v8 = vpop.eup %1179  ;;  %v767_v20 = vmul.f32 %v1178_v10, %v1468_v35 }
 0xc81   :  { %v741_v36 = vadd.f32 1.0, %v1180_v8 }
 0xc83   :  { %1181 = vrcp.f32 %v741_v36 }
 0xc89   :  { %v1182_v16 = vpop.eup %1181 }
 0xc8a   :  { %v744_v26 = vmul.f32 %v1182_v16, %v1473_v39 }
 0xcbf   :  { %v770_v12 = vpop.permute.xlu2 %769 }
 0xcc0   :  { %v772_v13 = vmul.f32 %v1178_v10, %v770_v12 }
 0xcc2   :  { %774 = vrot.lane.b32.xlu1 %v772_v13, %s1222_s22 }
 0xce8   :  { %v747_v17 = vpop.permute.xlu1 %746 }
 0xce9   :  { %v749_v18 = vmul.f32 %v1182_v16, %v747_v17 }
 0xceb   :  { %751 = vrot.lane.b32.xlu0 %v749_v18, %s1222_s22 }
 0xd34   :  { %v775_v23 = vpop.permute.xlu1 %774 }
 0xd35   :  { %v1498_v4 = vadd.f32 %v775_v23, %v767_v20 }
 0xd37   :  { %1183 = vtanh.f32 %v1498_v4 }
 0xd3d   :  { %v1184_v25 = vpop.eup %1183 }
 0xd3e   :  { %780 = vrot.lane.b32.xlu0 %v1184_v25, %s1223_s23 }
 0xd46   :  { %117 = vrot.lane.b32.xlu0 %v1317_v24, %s1220_s3 }
 0xd5d   :  { %v752_v28 = vpop.permute.xlu0 %751 }
 0xd5e   :  { %v1505_v29 = vadd.f32 %v752_v28, %v744_v26 }
 0xd60   :  { %1185 = vtanh.f32 %v1505_v29 }
 0xd66   :  { %v1186_v32 = vpop.eup %1185 }
 0xd67   :  { %757 = vrot.lane.b32.xlu2 %v1186_v32, %s1223_s23 }
 0xdb0   :  { %v781_v34 = vpop.permute.xlu0 %780 }
 0xdb1   :  { %v783_v35 = vmul.f32 %v1178_v10, %v781_v34 }
 0xdb3   :  { %v1509_v37 = vpack.c.bf16 %v783_v35, %v783_v35 }
 0xdb5   :  { %v823_v38 = vunpack.c.l.b16 %v1509_v37 }
 0xdb7   :  { %v824_v31 = vpack.c.b16 %v823_v38, %v823_v38 }
 0xdb8   :  { %v118_v40 = vpop.permute.xlu0 %117 }
 0xdb9   :  { %140 = vst.msk [vmem:[#allocation3 + $0x4] sm:$0xf] %vm98_vm1, %v118_v40  ;;  %825 = vrot.lane.b32.xlu2 %v824_v31, %s1224_s24 }
 0xdc0   :  { %v821_v44 = vld [vmem:[#allocation3 + $0x4] sm:$0xf] }
 0xdc1   :  { %v758_v24 = vpop.permute.xlu2 %757  ;;  %v822_v27 = vunpack.c.l.bf16 %v821_v44  ;;  %v903_v44 = vld [vmem:[#allocation2 + $0x1c] sm:$0xf] }
 0xdc2   :  { %v760_v39 = vmul.f32 %v1182_v16, %v758_v24 }
 0xdc4   :  { %v1514_v41 = vpack.c.bf16 %v760_v39, %v760_v39 }
 0xdc6   :  { %v799_v42 = vunpack.c.l.b16 %v1514_v41 }
 0xdc8   :  { %v800_v45 = vpack.c.b16 %v799_v42, %v799_v42 }
 0xdca   :  { %801 = vrot.lane.b32.xlu1 %v800_v45, %s1224_s24 }
 0xe13   :  { %v826_v46 = vpop.permute.xlu2 %825 }
 0xe14   :  { %1074 = vmatmul.msk.bf16.vlgmr.msra.gmra.mxu1 %vm48_vm0, %v826_v46 }
 0xe3c   :  { %v802_v47 = vpop.permute.xlu1 %801 }
 0xe3d   :  { %1073 = vmatmul.msk.bf16.vlgmr.msrb.gmra.mxu0 %vm48_vm0, %v802_v47 }
 0xe91   :  { %v839_v49 = vpop.f32.mrf.mxu1 }
 0xe92   :  { %v843_v50 = vadd.f32 %v839_v49, %v822_v27  ;;  %v904_v27 = vunpack.c.l.bf16 %v903_v44 }
 0xe94   :  { %1187 = vtanh.f32 %v843_v50  ;;  %v867_v61 = vsub.f32 0.0, %v843_v50 }
 0xe96   :  { %v868_v62 = vmul.f32 1.442695, %v867_v61 }
 0xe99   :  { %v841_v51 = vpop.f32.mrf.mxu1 }
 0xe9a   :  { %v1188_v53 = vpop.eup %1187 }
 0xe9b   :  { %875 = vrot.lane.b32.xlu2 %v1188_v53, %s1221_s4 }
 0xeba   :  { %v815_v55 = vpop.f32.mrf.mxu0 }
 0xebb   :  { %v819_v56 = vadd.f32 %v815_v55, %v798_v54 }
 0xebd   :  { %1189 = vtanh.f32 %v819_v56  ;;  %v844_v33 = vsub.f32 0.0, %v819_v56 }
 0xebe   :  { %1191 = vpow2.f32 %v868_v62 }
 0xebf   :  { %v845_v30 = vmul.f32 1.442695, %v844_v33 }
 0xec2   :  { %v817_v58 = vpop.f32.mrf.mxu0 }
 0xec3   :  { %v1190_v59 = vpop.eup %1189 }
 0xec4   :  { %852 = vrot.lane.b32.xlu1 %v1190_v59, %s1221_s4  ;;  %v1192_v63 = vpop.eup %1191 }
 0xec5   :  { %v870_v0 = vadd.f32 1.0, %v1192_v63 }
 0xec7   :  { %1193 = vrcp.f32 %v870_v0 }
 0xec8   :  { %1195 = vpow2.f32 %v845_v30 }
 0xecd   :  { %v1194_v2 = vpop.eup %1193 }
 0xece   :  { %v1196_v7 = vpop.eup %1195  ;;  %v873_v22 = vmul.f32 %v1194_v2, %v1498_v4 }
 0xecf   :  { %v847_v9 = vadd.f32 1.0, %v1196_v7 }
 0xed1   :  { %1197 = vrcp.f32 %v847_v9 }
 0xed7   :  { %v1198_v10 = vpop.eup %1197 }
 0xed8   :  { %v850_v16 = vmul.f32 %v1198_v10, %v1505_v29 }
 0xef5   :  { %v876_v3 = vpop.permute.xlu2 %875 }
 0xef6   :  { %v878_v5 = vmul.f32 %v1194_v2, %v876_v3 }
 0xef8   :  { %880 = vrot.lane.b32.xlu1 %v878_v5, %s1222_s22 }
 0xf36   :  { %v853_v12 = vpop.permute.xlu1 %852 }
 0xf37   :  { %v855_v13 = vmul.f32 %v1198_v10, %v853_v12 }
 0xf39   :  { %857 = vrot.lane.b32.xlu0 %v855_v13, %s1222_s22 }
 0xf6a   :  { %v881_v14 = vpop.permute.xlu1 %880 }
 0xf6b   :  { %v1526_v8 = vadd.f32 %v881_v14, %v873_v22 }
 0xf6d   :  { %1199 = vtanh.f32 %v1526_v8 }
 0xf73   :  { %v1200_v36 = vpop.eup %1199 }
 0xf74   :  { %886 = vrot.lane.b32.xlu0 %v1200_v36, %s1223_s23 }
 0xf7c   :  { %115 = vrot.lane.b32.xlu0 %v1308_v19, %s1220_s3 }
 0xfab   :  { %v858_v17 = vpop.permute.xlu0 %857 }
 0xfac   :  { %v1533_v18 = vadd.f32 %v858_v17, %v850_v16 }
 0xfae   :  { %1201 = vtanh.f32 %v1533_v18 }
 0xfb4   :  { %v1202_v20 = vpop.eup %1201 }
 0xfb5   :  { %863 = vrot.lane.b32.xlu2 %v1202_v20, %s1223_s23 }
 0xfe6   :  { %v887_v23 = vpop.permute.xlu0 %886 }
 0xfe7   :  { %v889_v4 = vmul.f32 %v1194_v2, %v887_v23 }
 0xfe9   :  { %v1537_v25 = vpack.c.bf16 %v889_v4, %v889_v4 }
 0xfeb   :  { %v928_v26 = vunpack.c.l.b16 %v1537_v25 }
 0xfed   :  { %v929_v28 = vpack.c.b16 %v928_v26, %v928_v26 }
 0xfee   :  { %v116_v32 = vpop.permute.xlu0 %115 }
 0xfef   :  { %139 = vst.msk [vmem:[#allocation3] sm:$0xf] %vm98_vm1, %v116_v32  ;;  %930 = vrot.lane.b32.xlu2 %v929_v28, %s1224_s24 }
 0xff6   :  { %v926_v24 = vld [vmem:[#allocation3] sm:$0xf] }
 0xff7   :  { %v927_v39 = vunpack.c.l.bf16 %v926_v24 }
0x100f   :  { %v864_v19 = vpop.permute.xlu2 %863 }
0x1010   :  { %v866_v29 = vmul.f32 %v1198_v10, %v864_v19 }
0x1012   :  { %v1542_v34 = vpack.c.bf16 %v866_v29, %v866_v29 }
0x1014   :  { %v905_v35 = vunpack.c.l.b16 %v1542_v34 }
0x1016   :  { %v906_v38 = vpack.c.b16 %v905_v35, %v905_v35 }
0x1018   :  { %907 = vrot.lane.b32.xlu1 %v906_v38, %s1224_s24 }
0x1049   :  { %v931_v31 = vpop.permute.xlu2 %930 }
0x104a   :  { %1078 = vmatmul.msk.bf16.vlgmr.msra.gmra.mxu3 %vm48_vm0, %v931_v31 }
0x108a   :  { %v908_v40 = vpop.permute.xlu1 %907 }
0x108b   :  { %1077 = vmatmul.msk.bf16.vlgmr.msra.gmra.mxu2 %vm48_vm0, %v908_v40 }
0x10cd   :  { %v944_v42 = vpop.f32.mrf.mxu3 }
0x10ce   :  { %v948_v45 = vadd.f32 %v944_v42, %v927_v39 }
0x10d0   :  { %1203 = vtanh.f32 %v948_v45  ;;  %v972_v51 = vsub.f32 0.0, %v948_v45 }
0x10d2   :  { %v973_v55 = vmul.f32 1.442695, %v972_v51 }
0x10d5   :  { %v946_v46 = vpop.f32.mrf.mxu3 }
0x10d6   :  { %v1204_v47 = vpop.eup %1203 }
0x10d7   :  { %980 = vrot.lane.b32.xlu2 %v1204_v47, %s1221_s4 }
0x110e   :  { %v921_v49 = vpop.f32.mrf.mxu2 }
0x110f   :  { %v925_v50 = vadd.f32 %v921_v49, %v904_v27 }
0x1111   :  { %1205 = vtanh.f32 %v925_v50  ;;  %v949_v63 = vsub.f32 0.0, %v925_v50 }
0x1112   :  { %1207 = vpow2.f32 %v973_v55 }
0x1113   :  { %v950_v0 = vmul.f32 1.442695, %v949_v63 }
0x1116   :  { %v923_v53 = vpop.f32.mrf.mxu2 }
0x1117   :  { %v1206_v54 = vpop.eup %1205 }
0x1118   :  { %957 = vrot.lane.b32.xlu1 %v1206_v54, %s1221_s4  ;;  %v1208_v56 = vpop.eup %1207 }
0x1119   :  { %v975_v58 = vadd.f32 1.0, %v1208_v56 }
0x111b   :  { %1209 = vrcp.f32 %v975_v58 }
0x111c   :  { %1211 = vpow2.f32 %v950_v0 }
0x1121   :  { %v1210_v59 = vpop.eup %1209 }
0x1122   :  { %v1212_v2 = vpop.eup %1211  ;;  %v978_v7 = vmul.f32 %v1210_v59, %v1526_v8 }
0x1123   :  { %v952_v3 = vadd.f32 1.0, %v1212_v2 }
0x1125   :  { %1213 = vrcp.f32 %v952_v3 }
0x112b   :  { %v1214_v5 = vpop.eup %1213 }
0x112c   :  { %v955_v13 = vmul.f32 %v1214_v5, %v1533_v18 }
0x1131   :  { %v981_v61 = vpop.permute.xlu2 %980 }
0x1132   :  { %v983_v62 = vmul.f32 %v1210_v59, %v981_v61 }
0x1134   :  { %985 = vrot.lane.b32.xlu1 %v983_v62, %s1222_s22 }
0x113c   :  { %247 = vrot.lane.b32.xlu1 %v1359_v15, %s1224_s24 }
0x1144   :  { %363 = vrot.lane.b32.xlu1 %v1396_v11, %s1221_s4 }
0x114c   :  { %572 = vrot.lane.b32.xlu1 %v1451_v52, %s1224_s24 }
0x118a   :  { %v958_v33 = vpop.permute.xlu1 %957 }
0x118b   :  { %v960_v30 = vmul.f32 %v1214_v5, %v958_v33 }
0x118d   :  { %962 = vrot.lane.b32.xlu0 %v960_v30, %s1222_s22 }
0x11a6   :  { %v986_v15 = vpop.permute.xlu1 %985 }
0x11a7   :  { %v988_v9 = vadd.f32 %v986_v15, %v978_v7 }
0x11a9   :  { %1215 = vtanh.f32 %v988_v9 }
0x11ae   :  { %v248_v11 = vpop.permute.xlu1 %247 }
0x11af   :  { %v1216_v10 = vpop.eup %1215  ;;  %251 = vst.msk [vmem:[%s1673_s5] sm:$0xf] %vm250_vm2, %v248_v11 }
0x11b0   :  { %991 = vrot.lane.b32.xlu0 %v1216_v10, %s1223_s23 }
0x11b6   :  { %v364_v52 = vpop.permute.xlu1 %363 }
0x11b7   :  { %1056 = vst.msk [vmem:[%s1673_s5 + $0x18] sm:$0xf] %vm258_vm3, %v364_v52 }
0x11b8   :  { %356 = vrot.lane.b32.xlu0 %v1392_v6, %s1224_s24 }
0x11be   :  { %v573_v12 = vpop.permute.xlu1 %572 }
0x11bf   :  { %1063 = vst.msk [vmem:[%s1673_s5 + $0xc] sm:$0xf] %vm250_vm2, %v573_v12 }
0x11c0   :  { %471 = vrot.lane.b32.xlu0 %v1426_v1, %s1221_s4 }
0x11ff   :  { %v963_v22 = vpop.permute.xlu0 %962 }
0x1200   :  { %v965_v14 = vadd.f32 %v963_v22, %v955_v13 }
0x1202   :  { %1217 = vtanh.f32 %v965_v14  ;;  %1019 = vrot.lane.b32.xlu1 %v965_v14, %s1225_s8 }
0x1208   :  { %v1218_v8 = vpop.eup %1217 }
0x1209   :  { %968 = vrot.lane.b32.xlu2 %v1218_v8, %s1223_s23 }
0x120a   :  { %786 = vrot.lane.b32.xlu1 %v1514_v41, %s1224_s24 }
0x1211   :  { %254 = vrot.lane.b32.xlu2 %v1364_v21, %s1221_s4 }
0x1212   :  { %898 = vrot.lane.b32.xlu1 %v1537_v25, %s1221_s4 }
0x1219   :  { %464 = vrot.lane.b32.xlu2 %v1422_v60, %s1224_s24 }
0x1221   :  { %579 = vrot.lane.b32.xlu2 %v1455_v57, %s1221_s4 }
0x1222   :  { %v992_v6 = vpop.permute.xlu0 %991 }
0x1223   :  { %v994_v1 = vmul.f32 %v1210_v59, %v992_v6 }
0x1225   :  { %1013 = vrot.lane.b32.xlu1 %v994_v1, %s1221_s4  ;;  %v1001_v17 = vpack.c.bf16 %v994_v1, %v994_v1 }
0x1229   :  { %680 = vrot.lane.b32.xlu2 %v1479_v43, %s1224_s24 }
0x122a   :  { %v357_v41 = vpop.permute.xlu0 %356 }
0x122b   :  { %1055 = vst.msk [vmem:[%s1673_s5 + $0x4] sm:$0xf] %vm250_vm2, %v357_v41 }
0x1231   :  { %792 = vrot.lane.b32.xlu2 %v1509_v37, %s1221_s4 }
0x1232   :  { %v472_v21 = vpop.permute.xlu0 %471 }
0x1233   :  { %1060 = vst.msk [vmem:[%s1673_s5 + $0x14] sm:$0xf] %vm258_vm3, %v472_v21 }
0x1263   :  { %v969_v60 = vpop.permute.xlu2 %968 }
0x1264   :  { %v971_v57 = vmul.f32 %v1214_v5, %v969_v60 }
0x1266   :  { %v995_v36 = vpack.c.bf16 %v971_v57, %v971_v57  ;;  %1008 = vrot.lane.b32.xlu0 %v971_v57, %s1224_s24 }
0x1268   :  { %997 = vrot.lane.b32.xlu2 %v995_v36, %s1224_s24 }
0x126b   :  { %v255_v43 = vpop.permute.xlu2 %254 }
0x126c   :  { %1052 = vst.msk [vmem:[%s1673_s5 + $0x1c] sm:$0xf] %vm258_vm3, %v255_v43 }
0x126e   :  { %686 = vrot.lane.b32.xlu0 %v1483_v48, %s1221_s4 }
0x1273   :  { %v465_v37 = vpop.permute.xlu2 %464 }
0x1274   :  { %1059 = vst.msk [vmem:[%s1673_s5 + $0x8] sm:$0xf] %vm250_vm2, %v465_v37  ;;  %v1020_v16 = vpop.permute.xlu1 %1019 }
0x1275   :  { %1022 = vst.msk [vmem:[%s1674_s7] sm:$0xff] %vm48_vm0, %v1020_v16 }
0x1276   :  { %1023 = vst.msk [vmem:[%s1674_s7] sm:$0xff] %vm1016_vm4, %v988_v9  ;;  %892 = vrot.lane.b32.xlu0 %v1542_v34, %s1224_s24 }
0x127b   :  { %v580_v48 = vpop.permute.xlu2 %579 }
0x127c   :  { %1064 = vst.msk [vmem:[%s1673_s5 + $0x10] sm:$0xf] %vm258_vm3, %v580_v48  ;;  %v787_v18 = vpop.permute.xlu1 %786 }
0x127d   :  { %1071 = vst.msk [vmem:[%s1673_s5 + $0x14] sm:$0xf] %vm250_vm2, %v787_v18 }
0x127e   :  { %1003 = vrot.lane.b32.xlu0 %v1001_v17, %s1221_s4 }
0x1283   :  { %v681_v20 = vpop.permute.xlu2 %680 }
0x1284   :  { %1067 = vst.msk [vmem:[%s1673_s5 + $0x10] sm:$0xf] %vm250_vm2, %v681_v20  ;;  %v899_v23 = vpop.permute.xlu1 %898 }
0x1285   :  { %1076 = vst.msk [vmem:[%s1673_s5 + $0x4] sm:$0xf] %vm258_vm3, %v899_v23 }
0x128b   :  { %v793_v4 = vpop.permute.xlu2 %792 }
0x128c   :  { %1072 = vst.msk [vmem:[%s1673_s5 + $0x8] sm:$0xf] %vm258_vm3, %v793_v4 }
0x1297   :  { %v1014_v28 = vpop.permute.xlu1 %1013 }
0x12c2   :  { %v998_v25 = vpop.permute.xlu2 %997 }
0x12c3   :  { %1079 = vst.msk [vmem:[%s1673_s5 + $0x1c] sm:$0xf] %vm250_vm2, %v998_v25 }
0x12d8   :  { %v1009_v26 = vpop.permute.xlu0 %1008 }
0x12d9   :  { %1011 = vst.msk [vmem:[%s1675_s6] sm:$0xff] %vm48_vm0, %v1009_v26 }
0x12da   :  { %1017 = vst.msk [vmem:[%s1675_s6] sm:$0xff] %vm1016_vm4, %v1014_v28 }
0x12e0   :  { %v687_v32 = vpop.permute.xlu0 %686 }
0x12e1   :  { %1068 = vst.msk [vmem:[%s1673_s5 + $0xc] sm:$0xf] %vm258_vm3, %v687_v32 }
0x12e8   :  { %v893_v19 = vpop.permute.xlu0 %892 }
0x12e9   :  { %1075 = vst.msk [vmem:[%s1673_s5 + $0x18] sm:$0xf] %vm250_vm2, %v893_v19 }
0x12f0   :  { %v1004_v29 = vpop.permute.xlu0 %1003 }
0x12f1   :  { %1006 = vst.msk [vmem:[%s1673_s5] sm:$0xf] %vm258_vm3, %v1004_v29 }

</bundles_post_ra>
